<compile_context>
chip_gen: v7x
topology: tpu7x:2x2x1
jax: 0.10.0
libtpu: 0.0.40
codegen_flags: <defaults>
</compile_context>

<pallas_src>
from functools import partial

import jax
import jax.numpy as jnp
from jax import lax
from jax.experimental import pallas as pl
from jax.experimental.pallas import tpu as pltpu


def _layernorm_f32(x, w, b, eps=1e-5):
    # LayerNorm computed in float32 (matches the PyTorch LayerNorm subclass).
    xf = x.astype(jnp.float32)
    mu = jnp.mean(xf, axis=-1, keepdims=True)
    var = jnp.mean((xf - mu) ** 2, axis=-1, keepdims=True)
    return (xf - mu) * lax.rsqrt(var + eps) * w.astype(jnp.float32) + b.astype(jnp.float32)


def resblock_kernel(x_ref, ln1w, ln1b, wqkv, bqkv, wo, bo,
                    ln2w, ln2b, wfc, bfc, wpr, bpr,
                    o_ref, ctx_slab, *, n_head, n_seq, seq_len):
    """One fused pre-LN residual block for n_seq sequences of length seq_len.

    x_ref/o_ref: (n_seq*seq_len, D) blocks.  ctx_slab: bf16 VMEM scratch that
    collects every head's attention context so the output projection is a
    single full-width (K = D) MXU matmul.
    """
    x = x_ref[...].astype(jnp.float32)              # (M, D) residual stream, f32
    M, D = x.shape
    L = seq_len
    hd = D // n_head
    scale = 1.0 / (hd ** 0.5)

    # ---------------- attention branch ----------------
    xn = _layernorm_f32(x, ln1w[...], ln1b[...])    # (M, D) f32, all sequences at once
    qkv = jnp.dot(xn.astype(jnp.bfloat16), wqkv[...],
                  preferred_element_type=jnp.float32) + bqkv[...]
    q = (qkv[:, :D] * scale).astype(jnp.bfloat16)   # scale q once, bf16 MXU operands
    k = qkv[:, D:2 * D].astype(jnp.bfloat16)
    v = qkv[:, 2 * D:].astype(jnp.bfloat16)

    # Per-(sequence, head) softmax attention.  Contexts are stored into the
    # VMEM slab so each iteration's temporaries die at the store (bounded vreg
    # pressure even though the loops are static).
    # TODO(synk): for very large head counts a lax.fori_loop with 128-lane
    # aligned head packing would shrink code size further.
    for b in range(n_seq):
        rows = slice(b * L, (b + 1) * L)
        for h in range(n_head):
            cols = slice(h * hd, (h + 1) * hd)
            qh = q[rows, cols]
            kh = k[rows, cols]
            vh = v[rows, cols]
            # Contract the last dims of q and k directly -> no explicit kh.T.
            s = lax.dot_general(qh, kh, (((1,), (1,)), ((), ())),
                                preferred_element_type=jnp.float32)      # (L, L)
            # TODO(synk): attn_mask support omitted (module built with attn_mask=None)
            s = s - jnp.max(s, axis=-1, keepdims=True)
            p = jnp.exp(s)
            p = p * pl.reciprocal(jnp.sum(p, axis=-1, keepdims=True), approx=True)
            ctx = jnp.dot(p.astype(jnp.bfloat16), vh,
                          preferred_element_type=jnp.float32)            # (L, hd)
            ctx_slab[rows, cols] = ctx.astype(ctx_slab.dtype)

    # Single output projection with full K = D contraction width.
    attn = jnp.dot(ctx_slab[...], wo[...],
                   preferred_element_type=jnp.float32) + bo[...]
    x = x + attn

    # ---------------- MLP branch ----------------
    xn2 = _layernorm_f32(x, ln2w[...], ln2b[...])
    hdn = jnp.dot(xn2.astype(jnp.bfloat16), wfc[...],
                  preferred_element_type=jnp.float32) + bfc[...]
    hdn = hdn * jax.nn.sigmoid(1.702 * hdn)         # QuickGELU in f32
    mlp = jnp.dot(hdn.astype(jnp.bfloat16), wpr[...],
                  preferred_element_type=jnp.float32) + bpr[...]
    x = x + mlp

    o_ref[...] = x.astype(o_ref.dtype)


def _physical_vmem_bytes():
    try:
        return int(pltpu.get_tpu_info().vmem_capacity_bytes)
    except Exception:
        return 64 << 20          # conservative fallback: v7x per-TensorCore VMEM


def _estimate_vmem_bytes(tb, L, D, weights, x_itemsize, weight_buffers):
    """Footprint of one grid step, counting the real f32 intermediates."""
    f32, bf16 = 4, 2
    M = tb * L
    weight_bytes = sum(int(w.size) * w.dtype.itemsize for w in weights)
    io_bytes = 2 * 2 * M * D * x_itemsize            # x/out blocks, double-buffered
    interm = (6 * M * D * f32                        # x, xn, attn, xn2, mlp, residual temps
              + M * 3 * D * (f32 + bf16)             # qkv f32 + q/k/v bf16
              + 2 * M * 4 * D * f32                  # c_fc output + QuickGELU temp
              + M * D * bf16                         # bf16 context slab (scratch)
              + 3 * L * L * f32)                     # per-head scores / probs
    return weight_buffers * weight_bytes + io_bytes + interm


def _choose_tb(B, L, D, weights, x_itemsize, vmem_cap):
    """Batch TB sequences per grid step so TB*L rows fill the MXU, bounded by VMEM."""
    fitting = []
    for tb in range(1, B + 1):
        if B % tb:
            continue
        if (tb * L) % 8 != 0 and tb != B:            # keep block sublane dim 8-aligned
            continue
        need = int(1.25 * _estimate_vmem_bytes(tb, L, D, weights, x_itemsize, 2)) + (4 << 20)
        if need <= vmem_cap:
            fitting.append(tb)
    if not fitting:
        return 1
    for tb in fitting:                               # smallest tb that fills the MXU
        if tb * L >= 256:
            return tb
    return fitting[-1]                               # otherwise largest that fits


def apply_resblock(x_bld, p, n_head, tb=None, vmem_cap=None):
    """x_bld: (B, L, D).  p: dict of per-layer parameters (pre-transposed)."""
    B, L, D = x_bld.shape
    weights = [p["ln1w"], p["ln1b"], p["wqkv"], p["bqkv"], p["wo"], p["bo"],
               p["ln2w"], p["ln2b"], p["wfc"], p["bfc"], p["wpr"], p["bpr"]]

    if vmem_cap is None:
        # Never request the full physical VMEM: leave headroom for Mosaic
        # scratch/spill.  ~56 MiB on v7x (64 MiB), ~112 MiB on v5e/v6e (128 MiB).
        vmem_cap = (_physical_vmem_bytes() * 7) // 8
    if tb is None:
        tb = _choose_tb(B, L, D, weights, x_bld.dtype.itemsize, vmem_cap)
    M = tb * L

    vmem_limit = int(1.25 * _estimate_vmem_bytes(tb, L, D, weights,
                                                 x_bld.dtype.itemsize, 2)) + (4 << 20)
    vmem_limit = max(16 << 20, min(vmem_limit, vmem_cap))
    # TODO(synk): for D >= 1024 on v7x the fused block may still not fit; split
    # into separate attention / MLP pallas_calls (or K-tile the 4D hidden dim).

    # 2-D view: rows are (sequence, position); a block of M rows is exactly tb
    # whole sequences and the output stays lane-dense (last dim = D).
    x2d = x_bld.reshape(B * L, D)
    kernel = partial(resblock_kernel, n_head=n_head, n_seq=tb, seq_len=L)
    x_spec = pl.BlockSpec((M, D), lambda i: (i, 0))
    o_spec = pl.BlockSpec((M, D), lambda i: (i, 0))
    scratch = [pltpu.VMEM((M, D), jnp.bfloat16)]

    def run(single_buffer_weights):
        def w_spec(w):
            nd = len(w.shape)
            imap = lambda i, _n=nd: (0,) * _n
            if single_buffer_weights:
                # Weights never change across the batch grid: keep ONE resident
                # copy instead of the default double buffer (halves weight VMEM).
                return pl.BlockSpec(w.shape, imap, pipeline_mode=pl.Buffered(1))
            return pl.BlockSpec(w.shape, imap)

        return pl.pallas_call(
            kernel,
            out_shape=jax.ShapeDtypeStruct((B * L, D), x_bld.dtype),
            grid=(B // tb,),
            in_specs=[x_spec] + [w_spec(w) for w in weights],
            out_specs=o_spec,
            scratch_shapes=scratch,
            compiler_params=pltpu.CompilerParams(
                dimension_semantics=("parallel",),   # batch blocks independent
                vmem_limit_bytes=vmem_limit),
        )(x2d, *weights)

    try:
        out2d = run(hasattr(pl, "Buffered"))
    except Exception:
        out2d = run(False)   # fall back to default (double-buffered) weight specs
    return out2d.reshape(B, L, D)


def init_transformer_params(key, width, layers):
    """Deterministic synthetic parameters.  Matmul weights are stored
    pre-transposed and in bf16 so the kernel does y = x @ W (+ b), matching
    PyTorch's y = x @ W.T + b.  Biases / LN params stay f32."""
    params = []
    D = width
    for l in range(layers):
        k = jax.random.fold_in(key, l)
        k1, k2, k3, k4 = jax.random.split(k, 4)
        std = 0.02
        params.append(dict(
            ln1w=jnp.ones((1, D), jnp.float32),
            ln1b=jnp.zeros((1, D), jnp.float32),
            wqkv=(jax.random.normal(k1, (D, 3 * D), jnp.float32) * std).astype(jnp.bfloat16),
            bqkv=jnp.zeros((1, 3 * D), jnp.float32),
            wo=(jax.random.normal(k2, (D, D), jnp.float32) * std).astype(jnp.bfloat16),
            bo=jnp.zeros((1, D), jnp.float32),
            ln2w=jnp.ones((1, D), jnp.float32),
            ln2b=jnp.zeros((1, D), jnp.float32),
            wfc=(jax.random.normal(k3, (D, 4 * D), jnp.float32) * std).astype(jnp.bfloat16),
            bfc=jnp.zeros((1, 4 * D), jnp.float32),
            wpr=(jax.random.normal(k4, (4 * D, D), jnp.float32) * std).astype(jnp.bfloat16),
            bpr=jnp.zeros((1, D), jnp.float32),
        ))
    return params


def transformer_forward(x_lbd, params, n_head, activation_dtype=jnp.float32):
    """x_lbd: (L, B, D) -- PyTorch nn.MultiheadAttention convention.

    The inter-layer residual stream stays float32 by default for parity with
    the PyTorch module; pass activation_dtype=jnp.bfloat16 to halve per-layer
    activation HBM traffic when strict parity is not required."""
    orig_dtype = x_lbd.dtype
    x = jnp.transpose(x_lbd, (1, 0, 2)).astype(activation_dtype)   # (B, L, D)
    vmem_cap = (_physical_vmem_bytes() * 7) // 8
    # TODO(synk): when B*L is very small, fusing pairs of layers into one
    # pallas_call (layer grid axis + per-layer weight index_maps) would hide
    # next-layer weight DMA behind compute; kept per-layer here for simplicity.
    for p in params:
        x = apply_resblock(x, p, n_head, vmem_cap=vmem_cap)
    return jnp.transpose(x, (1, 0, 2)).astype(orig_dtype)          # back to (L, B, D)


if __name__ == "__main__":
    # Small but lane-friendly demo: D = 128 (one 128-lane group), L = 8 (one
    # sublane group), B = 2, 4 heads, 2 layers.
    width, layers, heads = 128, 2, 4
    L, B = 8, 2

    key = jax.random.PRNGKey(0)
    kx, kp = jax.random.split(key)
    x = jax.random.normal(kx, (L, B, width), jnp.float32)
    params = init_transformer_params(kp, width, layers)

    out = transformer_forward(x, params, heads)
    jax.block_until_ready(out)
    assert out.shape == (L, B, width)
    print("KERNEL_OK")
</pallas_src>

<mosaic_0001>
module attributes {stable_mosaic.version = 11 : i64} {
  func.func @resblock_kernel(%arg0: i32, %arg1: memref<16x128xf32, #tpu.memory_space<vmem>>, %arg2: memref<1x128xf32, #tpu.memory_space<vmem>>, %arg3: memref<1x128xf32, #tpu.memory_space<vmem>>, %arg4: memref<128x384xbf16, #tpu.memory_space<vmem>>, %arg5: memref<1x384xf32, #tpu.memory_space<vmem>>, %arg6: memref<128x128xbf16, #tpu.memory_space<vmem>>, %arg7: memref<1x128xf32, #tpu.memory_space<vmem>>, %arg8: memref<1x128xf32, #tpu.memory_space<vmem>>, %arg9: memref<1x128xf32, #tpu.memory_space<vmem>>, %arg10: memref<128x512xbf16, #tpu.memory_space<vmem>>, %arg11: memref<1x512xf32, #tpu.memory_space<vmem>>, %arg12: memref<512x128xbf16, #tpu.memory_space<vmem>>, %arg13: memref<1x128xf32, #tpu.memory_space<vmem>>, %arg14: memref<16x128xf32, #tpu.memory_space<vmem>>, %arg15: memref<16x128xbf16, #tpu.memory_space<vmem>>) attributes {dimension_semantics = [#tpu.dimension_semantics<parallel>], iteration_bounds = array<i64: 1>, scalar_prefetch = 0 : i64, scratch_operands = 1 : i64, tpu.core_type = #tpu.core_type<tc>, window_params = [{transform_indices = @transform_0, window_bounds = array<i64: 16, 128>}, {pipeline_mode = #tpu.pipeline_mode<synchronous>, transform_indices = @transform_1, window_bounds = array<i64: 1, 128>}, {pipeline_mode = #tpu.pipeline_mode<synchronous>, transform_indices = @transform_2, window_bounds = array<i64: 1, 128>}, {pipeline_mode = #tpu.pipeline_mode<synchronous>, transform_indices = @transform_3, window_bounds = array<i64: 128, 384>}, {pipeline_mode = #tpu.pipeline_mode<synchronous>, transform_indices = @transform_4, window_bounds = array<i64: 1, 384>}, {pipeline_mode = #tpu.pipeline_mode<synchronous>, transform_indices = @transform_5, window_bounds = array<i64: 128, 128>}, {pipeline_mode = #tpu.pipeline_mode<synchronous>, transform_indices = @transform_6, window_bounds = array<i64: 1, 128>}, {pipeline_mode = #tpu.pipeline_mode<synchronous>, transform_indices = @transform_7, window_bounds = array<i64: 1, 128>}, {pipeline_mode = #tpu.pipeline_mode<synchronous>, transform_indices = @transform_8, window_bounds = array<i64: 1, 128>}, {pipeline_mode = #tpu.pipeline_mode<synchronous>, transform_indices = @transform_9, window_bounds = array<i64: 128, 512>}, {pipeline_mode = #tpu.pipeline_mode<synchronous>, transform_indices = @transform_10, window_bounds = array<i64: 1, 512>}, {pipeline_mode = #tpu.pipeline_mode<synchronous>, transform_indices = @transform_11, window_bounds = array<i64: 512, 128>}, {pipeline_mode = #tpu.pipeline_mode<synchronous>, transform_indices = @transform_12, window_bounds = array<i64: 1, 128>}, {transform_indices = @transform_13, window_bounds = array<i64: 16, 128>}]} {
    %c0 = arith.constant 0 : index
    %c0_0 = arith.constant 0 : index
    %0 = vector.load %arg1[%c0, %c0_0] : memref<16x128xf32, #tpu.memory_space<vmem>>, vector<16x128xf32>
    %c0_1 = arith.constant 0 : index
    %c0_2 = arith.constant 0 : index
    %1 = vector.load %arg2[%c0_1, %c0_2] : memref<1x128xf32, #tpu.memory_space<vmem>>, vector<1x128xf32>
    %c0_3 = arith.constant 0 : index
    %c0_4 = arith.constant 0 : index
    %2 = vector.load %arg3[%c0_3, %c0_4] : memref<1x128xf32, #tpu.memory_space<vmem>>, vector<1x128xf32>
    %cst = arith.constant dense<0.000000e+00> : vector<16xf32>
    %3 = vector.multi_reduction <add>, %0, %cst [1] : vector<16x128xf32> to vector<16xf32>
    %4 = vector.shape_cast %3 : vector<16xf32> to vector<16x1xf32>
    %cst_5 = arith.constant 1.280000e+02 : f32
    %5 = vector.broadcast %cst_5 : f32 to vector<16x1xf32>
    %6 = arith.divf %4, %5 : vector<16x1xf32>
    %7 = vector.broadcast %6 : vector<16x1xf32> to vector<16x128xf32>
    %8 = arith.subf %0, %7 : vector<16x128xf32>
    %9 = arith.mulf %8, %8 : vector<16x128xf32>
    %cst_6 = arith.constant dense<0.000000e+00> : vector<16xf32>
    %10 = vector.multi_reduction <add>, %9, %cst_6 [1] : vector<16x128xf32> to vector<16xf32>
    %11 = vector.shape_cast %10 : vector<16xf32> to vector<16x1xf32>
    %cst_7 = arith.constant 1.280000e+02 : f32
    %12 = vector.broadcast %cst_7 : f32 to vector<16x1xf32>
    %13 = arith.divf %11, %12 : vector<16x1xf32>
    %14 = vector.broadcast %6 : vector<16x1xf32> to vector<16x128xf32>
    %15 = arith.subf %0, %14 : vector<16x128xf32>
    %cst_8 = arith.constant 9.99999974E-6 : f32
    %16 = vector.broadcast %cst_8 : f32 to vector<16x1xf32>
    %17 = arith.addf %13, %16 : vector<16x1xf32>
    %18 = math.rsqrt %17 : vector<16x1xf32>
    %19 = vector.broadcast %18 : vector<16x1xf32> to vector<16x128xf32>
    %20 = arith.mulf %15, %19 : vector<16x128xf32>
    %21 = vector.broadcast %1 : vector<1x128xf32> to vector<16x128xf32>
    %22 = arith.mulf %20, %21 : vector<16x128xf32>
    %23 = vector.broadcast %2 : vector<1x128xf32> to vector<16x128xf32>
    %24 = arith.addf %22, %23 : vector<16x128xf32>
    %25 = arith.truncf %24 : vector<16x128xf32> to vector<16x128xbf16>
    %c0_9 = arith.constant 0 : index
    %c0_10 = arith.constant 0 : index
    %26 = vector.load %arg4[%c0_9, %c0_10] : memref<128x384xbf16, #tpu.memory_space<vmem>>, vector<128x384xbf16>
    %cst_11 = arith.constant dense<0.000000e+00> : vector<16x384xf32>
    %27 = tpu.matmul %25, %26, %cst_11 {dimension_numbers = #tpu.dot_dimension_numbers<[1], [0], [0], [1], [0, 0, 1, 1], [], []>} : vector<16x128xbf16>, vector<128x384xbf16>, vector<16x384xf32> -> vector<16x384xf32>
    %c0_12 = arith.constant 0 : index
    %c0_13 = arith.constant 0 : index
    %28 = vector.load %arg5[%c0_12, %c0_13] : memref<1x384xf32, #tpu.memory_space<vmem>>, vector<1x384xf32>
    %29 = vector.broadcast %28 : vector<1x384xf32> to vector<16x384xf32>
    %30 = arith.addf %27, %29 : vector<16x384xf32>
    %31 = vector.extract_strided_slice %30 {offsets = [0, 0], sizes = [16, 128], strides = [1, 1]} : vector<16x384xf32> to vector<16x128xf32>
    %cst_14 = arith.constant 0.176776692 : f32
    %32 = vector.broadcast %cst_14 : f32 to vector<16x128xf32>
    %33 = arith.mulf %31, %32 : vector<16x128xf32>
    %34 = arith.truncf %33 : vector<16x128xf32> to vector<16x128xbf16>
    %35 = vector.extract_strided_slice %30 {offsets = [0, 128], sizes = [16, 128], strides = [1, 1]} : vector<16x384xf32> to vector<16x128xf32>
    %36 = arith.truncf %35 : vector<16x128xf32> to vector<16x128xbf16>
    %37 = vector.extract_strided_slice %30 {offsets = [0, 256], sizes = [16, 128], strides = [1, 1]} : vector<16x384xf32> to vector<16x128xf32>
    %38 = arith.truncf %37 : vector<16x128xf32> to vector<16x128xbf16>
    %39 = vector.extract_strided_slice %34 {offsets = [0, 0], sizes = [8, 32], strides = [1, 1]} : vector<16x128xbf16> to vector<8x32xbf16>
    %40 = vector.extract_strided_slice %36 {offsets = [0, 0], sizes = [8, 32], strides = [1, 1]} : vector<16x128xbf16> to vector<8x32xbf16>
    %41 = vector.extract_strided_slice %38 {offsets = [0, 0], sizes = [8, 32], strides = [1, 1]} : vector<16x128xbf16> to vector<8x32xbf16>
    %cst_15 = arith.constant dense<0.000000e+00> : vector<8x8xf32>
    %42 = tpu.matmul %39, %40, %cst_15 {dimension_numbers = #tpu.dot_dimension_numbers<[1], [1], [0], [0], [0, 0, 1, 0], [], []>} : vector<8x32xbf16>, vector<8x32xbf16>, vector<8x8xf32> -> vector<8x8xf32>
    %cst_16 = arith.constant dense<0xFF800000> : vector<8xf32>
    %43 = vector.multi_reduction <maximumf>, %42, %cst_16 [1] : vector<8x8xf32> to vector<8xf32>
    %44 = vector.shape_cast %43 : vector<8xf32> to vector<8x1xf32>
    %45 = vector.broadcast %44 : vector<8x1xf32> to vector<8x8xf32>
    %46 = arith.subf %42, %45 : vector<8x8xf32>
    %47 = math.exp %46 : vector<8x8xf32>
    %cst_17 = arith.constant dense<0.000000e+00> : vector<8xf32>
    %48 = vector.multi_reduction <add>, %47, %cst_17 [1] : vector<8x8xf32> to vector<8xf32>
    %49 = vector.shape_cast %48 : vector<8xf32> to vector<8x1xf32>
    %50 = tpu.reciprocal %49 {approx = true} : vector<8x1xf32> -> vector<8x1xf32>
    %51 = vector.broadcast %50 : vector<8x1xf32> to vector<8x8xf32>
    %52 = arith.mulf %47, %51 : vector<8x8xf32>
    %53 = arith.truncf %52 : vector<8x8xf32> to vector<8x8xbf16>
    %cst_18 = arith.constant dense<0.000000e+00> : vector<8x32xf32>
    %54 = tpu.matmul %53, %41, %cst_18 {dimension_numbers = #tpu.dot_dimension_numbers<[1], [0], [0], [1], [0, 0, 1, 1], [], []>} : vector<8x8xbf16>, vector<8x32xbf16>, vector<8x32xf32> -> vector<8x32xf32>
    %55 = arith.truncf %54 : vector<8x32xf32> to vector<8x32xbf16>
    %c0_19 = arith.constant 0 : index
    %c0_20 = arith.constant 0 : index
    %56 = vector.load %arg15[%c0_19, %c0_20] : memref<16x128xbf16, #tpu.memory_space<vmem>>, vector<8x32xbf16>
    tpu.vector_store %arg15[%c0_19, %c0_20], %55 {strides = array<i32>} : memref<16x128xbf16, #tpu.memory_space<vmem>>, vector<8x32xbf16>,
    %57 = vector.extract_strided_slice %34 {offsets = [0, 32], sizes = [8, 32], strides = [1, 1]} : vector<16x128xbf16> to vector<8x32xbf16>
    %58 = vector.extract_strided_slice %36 {offsets = [0, 32], sizes = [8, 32], strides = [1, 1]} : vector<16x128xbf16> to vector<8x32xbf16>
    %59 = vector.extract_strided_slice %38 {offsets = [0, 32], sizes = [8, 32], strides = [1, 1]} : vector<16x128xbf16> to vector<8x32xbf16>
    %cst_21 = arith.constant dense<0.000000e+00> : vector<8x8xf32>
    %60 = tpu.matmul %57, %58, %cst_21 {dimension_numbers = #tpu.dot_dimension_numbers<[1], [1], [0], [0], [0, 0, 1, 0], [], []>} : vector<8x32xbf16>, vector<8x32xbf16>, vector<8x8xf32> -> vector<8x8xf32>
    %cst_22 = arith.constant dense<0xFF800000> : vector<8xf32>
    %61 = vector.multi_reduction <maximumf>, %60, %cst_22 [1] : vector<8x8xf32> to vector<8xf32>
    %62 = vector.shape_cast %61 : vector<8xf32> to vector<8x1xf32>
    %63 = vector.broadcast %62 : vector<8x1xf32> to vector<8x8xf32>
    %64 = arith.subf %60, %63 : vector<8x8xf32>
    %65 = math.exp %64 : vector<8x8xf32>
    %cst_23 = arith.constant dense<0.000000e+00> : vector<8xf32>
    %66 = vector.multi_reduction <add>, %65, %cst_23 [1] : vector<8x8xf32> to vector<8xf32>
    %67 = vector.shape_cast %66 : vector<8xf32> to vector<8x1xf32>
    %68 = tpu.reciprocal %67 {approx = true} : vector<8x1xf32> -> vector<8x1xf32>
    %69 = vector.broadcast %68 : vector<8x1xf32> to vector<8x8xf32>
    %70 = arith.mulf %65, %69 : vector<8x8xf32>
    %71 = arith.truncf %70 : vector<8x8xf32> to vector<8x8xbf16>
    %cst_24 = arith.constant dense<0.000000e+00> : vector<8x32xf32>
    %72 = tpu.matmul %71, %59, %cst_24 {dimension_numbers = #tpu.dot_dimension_numbers<[1], [0], [0], [1], [0, 0, 1, 1], [], []>} : vector<8x8xbf16>, vector<8x32xbf16>, vector<8x32xf32> -> vector<8x32xf32>
    %73 = arith.truncf %72 : vector<8x32xf32> to vector<8x32xbf16>
    %c0_25 = arith.constant 0 : index
    %c32 = arith.constant 32 : index
    %74 = vector.load %arg15[%c0_25, %c32] : memref<16x128xbf16, #tpu.memory_space<vmem>>, vector<8x32xbf16>
    tpu.vector_store %arg15[%c0_25, %c32], %73 {strides = array<i32>} : memref<16x128xbf16, #tpu.memory_space<vmem>>, vector<8x32xbf16>,
    %75 = vector.extract_strided_slice %34 {offsets = [0, 64], sizes = [8, 32], strides = [1, 1]} : vector<16x128xbf16> to vector<8x32xbf16>
    %76 = vector.extract_strided_slice %36 {offsets = [0, 64], sizes = [8, 32], strides = [1, 1]} : vector<16x128xbf16> to vector<8x32xbf16>
    %77 = vector.extract_strided_slice %38 {offsets = [0, 64], sizes = [8, 32], strides = [1, 1]} : vector<16x128xbf16> to vector<8x32xbf16>
    %cst_26 = arith.constant dense<0.000000e+00> : vector<8x8xf32>
    %78 = tpu.matmul %75, %76, %cst_26 {dimension_numbers = #tpu.dot_dimension_numbers<[1], [1], [0], [0], [0, 0, 1, 0], [], []>} : vector<8x32xbf16>, vector<8x32xbf16>, vector<8x8xf32> -> vector<8x8xf32>
    %cst_27 = arith.constant dense<0xFF800000> : vector<8xf32>
    %79 = vector.multi_reduction <maximumf>, %78, %cst_27 [1] : vector<8x8xf32> to vector<8xf32>
    %80 = vector.shape_cast %79 : vector<8xf32> to vector<8x1xf32>
    %81 = vector.broadcast %80 : vector<8x1xf32> to vector<8x8xf32>
    %82 = arith.subf %78, %81 : vector<8x8xf32>
    %83 = math.exp %82 : vector<8x8xf32>
    %cst_28 = arith.constant dense<0.000000e+00> : vector<8xf32>
    %84 = vector.multi_reduction <add>, %83, %cst_28 [1] : vector<8x8xf32> to vector<8xf32>
    %85 = vector.shape_cast %84 : vector<8xf32> to vector<8x1xf32>
    %86 = tpu.reciprocal %85 {approx = true} : vector<8x1xf32> -> vector<8x1xf32>
    %87 = vector.broadcast %86 : vector<8x1xf32> to vector<8x8xf32>
    %88 = arith.mulf %83, %87 : vector<8x8xf32>
    %89 = arith.truncf %88 : vector<8x8xf32> to vector<8x8xbf16>
    %cst_29 = arith.constant dense<0.000000e+00> : vector<8x32xf32>
    %90 = tpu.matmul %89, %77, %cst_29 {dimension_numbers = #tpu.dot_dimension_numbers<[1], [0], [0], [1], [0, 0, 1, 1], [], []>} : vector<8x8xbf16>, vector<8x32xbf16>, vector<8x32xf32> -> vector<8x32xf32>
    %91 = arith.truncf %90 : vector<8x32xf32> to vector<8x32xbf16>
    %c0_30 = arith.constant 0 : index
    %c64 = arith.constant 64 : index
    %92 = vector.load %arg15[%c0_30, %c64] : memref<16x128xbf16, #tpu.memory_space<vmem>>, vector<8x32xbf16>
    tpu.vector_store %arg15[%c0_30, %c64], %91 {strides = array<i32>} : memref<16x128xbf16, #tpu.memory_space<vmem>>, vector<8x32xbf16>,
    %93 = vector.extract_strided_slice %34 {offsets = [0, 96], sizes = [8, 32], strides = [1, 1]} : vector<16x128xbf16> to vector<8x32xbf16>
    %94 = vector.extract_strided_slice %36 {offsets = [0, 96], sizes = [8, 32], strides = [1, 1]} : vector<16x128xbf16> to vector<8x32xbf16>
    %95 = vector.extract_strided_slice %38 {offsets = [0, 96], sizes = [8, 32], strides = [1, 1]} : vector<16x128xbf16> to vector<8x32xbf16>
    %cst_31 = arith.constant dense<0.000000e+00> : vector<8x8xf32>
    %96 = tpu.matmul %93, %94, %cst_31 {dimension_numbers = #tpu.dot_dimension_numbers<[1], [1], [0], [0], [0, 0, 1, 0], [], []>} : vector<8x32xbf16>, vector<8x32xbf16>, vector<8x8xf32> -> vector<8x8xf32>
    %cst_32 = arith.constant dense<0xFF800000> : vector<8xf32>
    %97 = vector.multi_reduction <maximumf>, %96, %cst_32 [1] : vector<8x8xf32> to vector<8xf32>
    %98 = vector.shape_cast %97 : vector<8xf32> to vector<8x1xf32>
    %99 = vector.broadcast %98 : vector<8x1xf32> to vector<8x8xf32>
    %100 = arith.subf %96, %99 : vector<8x8xf32>
    %101 = math.exp %100 : vector<8x8xf32>
    %cst_33 = arith.constant dense<0.000000e+00> : vector<8xf32>
    %102 = vector.multi_reduction <add>, %101, %cst_33 [1] : vector<8x8xf32> to vector<8xf32>
    %103 = vector.shape_cast %102 : vector<8xf32> to vector<8x1xf32>
    %104 = tpu.reciprocal %103 {approx = true} : vector<8x1xf32> -> vector<8x1xf32>
    %105 = vector.broadcast %104 : vector<8x1xf32> to vector<8x8xf32>
    %106 = arith.mulf %101, %105 : vector<8x8xf32>
    %107 = arith.truncf %106 : vector<8x8xf32> to vector<8x8xbf16>
    %cst_34 = arith.constant dense<0.000000e+00> : vector<8x32xf32>
    %108 = tpu.matmul %107, %95, %cst_34 {dimension_numbers = #tpu.dot_dimension_numbers<[1], [0], [0], [1], [0, 0, 1, 1], [], []>} : vector<8x8xbf16>, vector<8x32xbf16>, vector<8x32xf32> -> vector<8x32xf32>
    %109 = arith.truncf %108 : vector<8x32xf32> to vector<8x32xbf16>
    %c0_35 = arith.constant 0 : index
    %c96 = arith.constant 96 : index
    %110 = vector.load %arg15[%c0_35, %c96] : memref<16x128xbf16, #tpu.memory_space<vmem>>, vector<8x32xbf16>
    tpu.vector_store %arg15[%c0_35, %c96], %109 {strides = array<i32>} : memref<16x128xbf16, #tpu.memory_space<vmem>>, vector<8x32xbf16>,
    %111 = vector.extract_strided_slice %34 {offsets = [8, 0], sizes = [8, 32], strides = [1, 1]} : vector<16x128xbf16> to vector<8x32xbf16>
    %112 = vector.extract_strided_slice %36 {offsets = [8, 0], sizes = [8, 32], strides = [1, 1]} : vector<16x128xbf16> to vector<8x32xbf16>
    %113 = vector.extract_strided_slice %38 {offsets = [8, 0], sizes = [8, 32], strides = [1, 1]} : vector<16x128xbf16> to vector<8x32xbf16>
    %cst_36 = arith.constant dense<0.000000e+00> : vector<8x8xf32>
    %114 = tpu.matmul %111, %112, %cst_36 {dimension_numbers = #tpu.dot_dimension_numbers<[1], [1], [0], [0], [0, 0, 1, 0], [], []>} : vector<8x32xbf16>, vector<8x32xbf16>, vector<8x8xf32> -> vector<8x8xf32>
    %cst_37 = arith.constant dense<0xFF800000> : vector<8xf32>
    %115 = vector.multi_reduction <maximumf>, %114, %cst_37 [1] : vector<8x8xf32> to vector<8xf32>
    %116 = vector.shape_cast %115 : vector<8xf32> to vector<8x1xf32>
    %117 = vector.broadcast %116 : vector<8x1xf32> to vector<8x8xf32>
    %118 = arith.subf %114, %117 : vector<8x8xf32>
    %119 = math.exp %118 : vector<8x8xf32>
    %cst_38 = arith.constant dense<0.000000e+00> : vector<8xf32>
    %120 = vector.multi_reduction <add>, %119, %cst_38 [1] : vector<8x8xf32> to vector<8xf32>
    %121 = vector.shape_cast %120 : vector<8xf32> to vector<8x1xf32>
    %122 = tpu.reciprocal %121 {approx = true} : vector<8x1xf32> -> vector<8x1xf32>
    %123 = vector.broadcast %122 : vector<8x1xf32> to vector<8x8xf32>
    %124 = arith.mulf %119, %123 : vector<8x8xf32>
    %125 = arith.truncf %124 : vector<8x8xf32> to vector<8x8xbf16>
    %cst_39 = arith.constant dense<0.000000e+00> : vector<8x32xf32>
    %126 = tpu.matmul %125, %113, %cst_39 {dimension_numbers = #tpu.dot_dimension_numbers<[1], [0], [0], [1], [0, 0, 1, 1], [], []>} : vector<8x8xbf16>, vector<8x32xbf16>, vector<8x32xf32> -> vector<8x32xf32>
    %127 = arith.truncf %126 : vector<8x32xf32> to vector<8x32xbf16>
    %c8 = arith.constant 8 : index
    %c0_40 = arith.constant 0 : index
    %128 = vector.load %arg15[%c8, %c0_40] : memref<16x128xbf16, #tpu.memory_space<vmem>>, vector<8x32xbf16>
    tpu.vector_store %arg15[%c8, %c0_40], %127 {strides = array<i32>} : memref<16x128xbf16, #tpu.memory_space<vmem>>, vector<8x32xbf16>,
    %129 = vector.extract_strided_slice %34 {offsets = [8, 32], sizes = [8, 32], strides = [1, 1]} : vector<16x128xbf16> to vector<8x32xbf16>
    %130 = vector.extract_strided_slice %36 {offsets = [8, 32], sizes = [8, 32], strides = [1, 1]} : vector<16x128xbf16> to vector<8x32xbf16>
    %131 = vector.extract_strided_slice %38 {offsets = [8, 32], sizes = [8, 32], strides = [1, 1]} : vector<16x128xbf16> to vector<8x32xbf16>
    %cst_41 = arith.constant dense<0.000000e+00> : vector<8x8xf32>
    %132 = tpu.matmul %129, %130, %cst_41 {dimension_numbers = #tpu.dot_dimension_numbers<[1], [1], [0], [0], [0, 0, 1, 0], [], []>} : vector<8x32xbf16>, vector<8x32xbf16>, vector<8x8xf32> -> vector<8x8xf32>
    %cst_42 = arith.constant dense<0xFF800000> : vector<8xf32>
    %133 = vector.multi_reduction <maximumf>, %132, %cst_42 [1] : vector<8x8xf32> to vector<8xf32>
    %134 = vector.shape_cast %133 : vector<8xf32> to vector<8x1xf32>
    %135 = vector.broadcast %134 : vector<8x1xf32> to vector<8x8xf32>
    %136 = arith.subf %132, %135 : vector<8x8xf32>
    %137 = math.exp %136 : vector<8x8xf32>
    %cst_43 = arith.constant dense<0.000000e+00> : vector<8xf32>
    %138 = vector.multi_reduction <add>, %137, %cst_43 [1] : vector<8x8xf32> to vector<8xf32>
    %139 = vector.shape_cast %138 : vector<8xf32> to vector<8x1xf32>
    %140 = tpu.reciprocal %139 {approx = true} : vector<8x1xf32> -> vector<8x1xf32>
    %141 = vector.broadcast %140 : vector<8x1xf32> to vector<8x8xf32>
    %142 = arith.mulf %137, %141 : vector<8x8xf32>
    %143 = arith.truncf %142 : vector<8x8xf32> to vector<8x8xbf16>
    %cst_44 = arith.constant dense<0.000000e+00> : vector<8x32xf32>
    %144 = tpu.matmul %143, %131, %cst_44 {dimension_numbers = #tpu.dot_dimension_numbers<[1], [0], [0], [1], [0, 0, 1, 1], [], []>} : vector<8x8xbf16>, vector<8x32xbf16>, vector<8x32xf32> -> vector<8x32xf32>
    %145 = arith.truncf %144 : vector<8x32xf32> to vector<8x32xbf16>
    %c8_45 = arith.constant 8 : index
    %c32_46 = arith.constant 32 : index
    %146 = vector.load %arg15[%c8_45, %c32_46] : memref<16x128xbf16, #tpu.memory_space<vmem>>, vector<8x32xbf16>
    tpu.vector_store %arg15[%c8_45, %c32_46], %145 {strides = array<i32>} : memref<16x128xbf16, #tpu.memory_space<vmem>>, vector<8x32xbf16>,
    %147 = vector.extract_strided_slice %34 {offsets = [8, 64], sizes = [8, 32], strides = [1, 1]} : vector<16x128xbf16> to vector<8x32xbf16>
    %148 = vector.extract_strided_slice %36 {offsets = [8, 64], sizes = [8, 32], strides = [1, 1]} : vector<16x128xbf16> to vector<8x32xbf16>
    %149 = vector.extract_strided_slice %38 {offsets = [8, 64], sizes = [8, 32], strides = [1, 1]} : vector<16x128xbf16> to vector<8x32xbf16>
    %cst_47 = arith.constant dense<0.000000e+00> : vector<8x8xf32>
    %150 = tpu.matmul %147, %148, %cst_47 {dimension_numbers = #tpu.dot_dimension_numbers<[1], [1], [0], [0], [0, 0, 1, 0], [], []>} : vector<8x32xbf16>, vector<8x32xbf16>, vector<8x8xf32> -> vector<8x8xf32>
    %cst_48 = arith.constant dense<0xFF800000> : vector<8xf32>
    %151 = vector.multi_reduction <maximumf>, %150, %cst_48 [1] : vector<8x8xf32> to vector<8xf32>
    %152 = vector.shape_cast %151 : vector<8xf32> to vector<8x1xf32>
    %153 = vector.broadcast %152 : vector<8x1xf32> to vector<8x8xf32>
    %154 = arith.subf %150, %153 : vector<8x8xf32>
    %155 = math.exp %154 : vector<8x8xf32>
    %cst_49 = arith.constant dense<0.000000e+00> : vector<8xf32>
    %156 = vector.multi_reduction <add>, %155, %cst_49 [1] : vector<8x8xf32> to vector<8xf32>
    %157 = vector.shape_cast %156 : vector<8xf32> to vector<8x1xf32>
    %158 = tpu.reciprocal %157 {approx = true} : vector<8x1xf32> -> vector<8x1xf32>
    %159 = vector.broadcast %158 : vector<8x1xf32> to vector<8x8xf32>
    %160 = arith.mulf %155, %159 : vector<8x8xf32>
    %161 = arith.truncf %160 : vector<8x8xf32> to vector<8x8xbf16>
    %cst_50 = arith.constant dense<0.000000e+00> : vector<8x32xf32>
    %162 = tpu.matmul %161, %149, %cst_50 {dimension_numbers = #tpu.dot_dimension_numbers<[1], [0], [0], [1], [0, 0, 1, 1], [], []>} : vector<8x8xbf16>, vector<8x32xbf16>, vector<8x32xf32> -> vector<8x32xf32>
    %163 = arith.truncf %162 : vector<8x32xf32> to vector<8x32xbf16>
    %c8_51 = arith.constant 8 : index
    %c64_52 = arith.constant 64 : index
    %164 = vector.load %arg15[%c8_51, %c64_52] : memref<16x128xbf16, #tpu.memory_space<vmem>>, vector<8x32xbf16>
    tpu.vector_store %arg15[%c8_51, %c64_52], %163 {strides = array<i32>} : memref<16x128xbf16, #tpu.memory_space<vmem>>, vector<8x32xbf16>,
    %165 = vector.extract_strided_slice %34 {offsets = [8, 96], sizes = [8, 32], strides = [1, 1]} : vector<16x128xbf16> to vector<8x32xbf16>
    %166 = vector.extract_strided_slice %36 {offsets = [8, 96], sizes = [8, 32], strides = [1, 1]} : vector<16x128xbf16> to vector<8x32xbf16>
    %167 = vector.extract_strided_slice %38 {offsets = [8, 96], sizes = [8, 32], strides = [1, 1]} : vector<16x128xbf16> to vector<8x32xbf16>
    %cst_53 = arith.constant dense<0.000000e+00> : vector<8x8xf32>
    %168 = tpu.matmul %165, %166, %cst_53 {dimension_numbers = #tpu.dot_dimension_numbers<[1], [1], [0], [0], [0, 0, 1, 0], [], []>} : vector<8x32xbf16>, vector<8x32xbf16>, vector<8x8xf32> -> vector<8x8xf32>
    %cst_54 = arith.constant dense<0xFF800000> : vector<8xf32>
    %169 = vector.multi_reduction <maximumf>, %168, %cst_54 [1] : vector<8x8xf32> to vector<8xf32>
    %170 = vector.shape_cast %169 : vector<8xf32> to vector<8x1xf32>
    %171 = vector.broadcast %170 : vector<8x1xf32> to vector<8x8xf32>
    %172 = arith.subf %168, %171 : vector<8x8xf32>
    %173 = math.exp %172 : vector<8x8xf32>
    %cst_55 = arith.constant dense<0.000000e+00> : vector<8xf32>
    %174 = vector.multi_reduction <add>, %173, %cst_55 [1] : vector<8x8xf32> to vector<8xf32>
    %175 = vector.shape_cast %174 : vector<8xf32> to vector<8x1xf32>
    %176 = tpu.reciprocal %175 {approx = true} : vector<8x1xf32> -> vector<8x1xf32>
    %177 = vector.broadcast %176 : vector<8x1xf32> to vector<8x8xf32>
    %178 = arith.mulf %173, %177 : vector<8x8xf32>
    %179 = arith.truncf %178 : vector<8x8xf32> to vector<8x8xbf16>
    %cst_56 = arith.constant dense<0.000000e+00> : vector<8x32xf32>
    %180 = tpu.matmul %179, %167, %cst_56 {dimension_numbers = #tpu.dot_dimension_numbers<[1], [0], [0], [1], [0, 0, 1, 1], [], []>} : vector<8x8xbf16>, vector<8x32xbf16>, vector<8x32xf32> -> vector<8x32xf32>
    %181 = arith.truncf %180 : vector<8x32xf32> to vector<8x32xbf16>
    %c8_57 = arith.constant 8 : index
    %c96_58 = arith.constant 96 : index
    %182 = vector.load %arg15[%c8_57, %c96_58] : memref<16x128xbf16, #tpu.memory_space<vmem>>, vector<8x32xbf16>
    tpu.vector_store %arg15[%c8_57, %c96_58], %181 {strides = array<i32>} : memref<16x128xbf16, #tpu.memory_space<vmem>>, vector<8x32xbf16>,
    %c0_59 = arith.constant 0 : index
    %c0_60 = arith.constant 0 : index
    %183 = vector.load %arg15[%c0_59, %c0_60] : memref<16x128xbf16, #tpu.memory_space<vmem>>, vector<16x128xbf16>
    %c0_61 = arith.constant 0 : index
    %c0_62 = arith.constant 0 : index
    %184 = vector.load %arg6[%c0_61, %c0_62] : memref<128x128xbf16, #tpu.memory_space<vmem>>, vector<128x128xbf16>
    %cst_63 = arith.constant dense<0.000000e+00> : vector<16x128xf32>
    %185 = tpu.matmul %183, %184, %cst_63 {dimension_numbers = #tpu.dot_dimension_numbers<[1], [0], [0], [1], [0, 0, 1, 1], [], []>} : vector<16x128xbf16>, vector<128x128xbf16>, vector<16x128xf32> -> vector<16x128xf32>
    %c0_64 = arith.constant 0 : index
    %c0_65 = arith.constant 0 : index
    %186 = vector.load %arg7[%c0_64, %c0_65] : memref<1x128xf32, #tpu.memory_space<vmem>>, vector<1x128xf32>
    %187 = vector.broadcast %186 : vector<1x128xf32> to vector<16x128xf32>
    %188 = arith.addf %185, %187 : vector<16x128xf32>
    %189 = arith.addf %0, %188 : vector<16x128xf32>
    %c0_66 = arith.constant 0 : index
    %c0_67 = arith.constant 0 : index
    %190 = vector.load %arg8[%c0_66, %c0_67] : memref<1x128xf32, #tpu.memory_space<vmem>>, vector<1x128xf32>
    %c0_68 = arith.constant 0 : index
    %c0_69 = arith.constant 0 : index
    %191 = vector.load %arg9[%c0_68, %c0_69] : memref<1x128xf32, #tpu.memory_space<vmem>>, vector<1x128xf32>
    %cst_70 = arith.constant dense<0.000000e+00> : vector<16xf32>
    %192 = vector.multi_reduction <add>, %189, %cst_70 [1] : vector<16x128xf32> to vector<16xf32>
    %193 = vector.shape_cast %192 : vector<16xf32> to vector<16x1xf32>
    %cst_71 = arith.constant 1.280000e+02 : f32
    %194 = vector.broadcast %cst_71 : f32 to vector<16x1xf32>
    %195 = arith.divf %193, %194 : vector<16x1xf32>
    %196 = vector.broadcast %195 : vector<16x1xf32> to vector<16x128xf32>
    %197 = arith.subf %189, %196 : vector<16x128xf32>
    %198 = arith.mulf %197, %197 : vector<16x128xf32>
    %cst_72 = arith.constant dense<0.000000e+00> : vector<16xf32>
    %199 = vector.multi_reduction <add>, %198, %cst_72 [1] : vector<16x128xf32> to vector<16xf32>
    %200 = vector.shape_cast %199 : vector<16xf32> to vector<16x1xf32>
    %cst_73 = arith.constant 1.280000e+02 : f32
    %201 = vector.broadcast %cst_73 : f32 to vector<16x1xf32>
    %202 = arith.divf %200, %201 : vector<16x1xf32>
    %203 = vector.broadcast %195 : vector<16x1xf32> to vector<16x128xf32>
    %204 = arith.subf %189, %203 : vector<16x128xf32>
    %cst_74 = arith.constant 9.99999974E-6 : f32
    %205 = vector.broadcast %cst_74 : f32 to vector<16x1xf32>
    %206 = arith.addf %202, %205 : vector<16x1xf32>
    %207 = math.rsqrt %206 : vector<16x1xf32>
    %208 = vector.broadcast %207 : vector<16x1xf32> to vector<16x128xf32>
    %209 = arith.mulf %204, %208 : vector<16x128xf32>
    %210 = vector.broadcast %190 : vector<1x128xf32> to vector<16x128xf32>
    %211 = arith.mulf %209, %210 : vector<16x128xf32>
    %212 = vector.broadcast %191 : vector<1x128xf32> to vector<16x128xf32>
    %213 = arith.addf %211, %212 : vector<16x128xf32>
    %214 = arith.truncf %213 : vector<16x128xf32> to vector<16x128xbf16>
    %c0_75 = arith.constant 0 : index
    %c0_76 = arith.constant 0 : index
    %215 = vector.load %arg10[%c0_75, %c0_76] : memref<128x512xbf16, #tpu.memory_space<vmem>>, vector<128x512xbf16>
    %cst_77 = arith.constant dense<0.000000e+00> : vector<16x512xf32>
    %216 = tpu.matmul %214, %215, %cst_77 {dimension_numbers = #tpu.dot_dimension_numbers<[1], [0], [0], [1], [0, 0, 1, 1], [], []>} : vector<16x128xbf16>, vector<128x512xbf16>, vector<16x512xf32> -> vector<16x512xf32>
    %c0_78 = arith.constant 0 : index
    %c0_79 = arith.constant 0 : index
    %217 = vector.load %arg11[%c0_78, %c0_79] : memref<1x512xf32, #tpu.memory_space<vmem>>, vector<1x512xf32>
    %218 = vector.broadcast %217 : vector<1x512xf32> to vector<16x512xf32>
    %219 = arith.addf %216, %218 : vector<16x512xf32>
    %cst_80 = arith.constant 1.702000e+00 : f32
    %220 = vector.broadcast %cst_80 : f32 to vector<16x512xf32>
    %221 = arith.mulf %220, %219 : vector<16x512xf32>
    %222 = arith.negf %221 : vector<16x512xf32>
    %223 = math.exp %222 : vector<16x512xf32>
    %cst_81 = arith.constant 1.000000e+00 : f32
    %224 = vector.broadcast %cst_81 : f32 to vector<16x512xf32>
    %225 = arith.addf %224, %223 : vector<16x512xf32>
    %226 = arith.divf %224, %225 : vector<16x512xf32>
    %227 = arith.mulf %219, %226 : vector<16x512xf32>
    %228 = arith.truncf %227 : vector<16x512xf32> to vector<16x512xbf16>
    %c0_82 = arith.constant 0 : index
    %c0_83 = arith.constant 0 : index
    %229 = vector.load %arg12[%c0_82, %c0_83] : memref<512x128xbf16, #tpu.memory_space<vmem>>, vector<512x128xbf16>
    %cst_84 = arith.constant dense<0.000000e+00> : vector<16x128xf32>
    %230 = tpu.matmul %228, %229, %cst_84 {dimension_numbers = #tpu.dot_dimension_numbers<[1], [0], [0], [1], [0, 0, 1, 1], [], []>} : vector<16x512xbf16>, vector<512x128xbf16>, vector<16x128xf32> -> vector<16x128xf32>
    %c0_85 = arith.constant 0 : index
    %c0_86 = arith.constant 0 : index
    %231 = vector.load %arg13[%c0_85, %c0_86] : memref<1x128xf32, #tpu.memory_space<vmem>>, vector<1x128xf32>
    %232 = vector.broadcast %231 : vector<1x128xf32> to vector<16x128xf32>
    %233 = arith.addf %230, %232 : vector<16x128xf32>
    %234 = arith.addf %189, %233 : vector<16x128xf32>
    %c0_87 = arith.constant 0 : index
    %c0_88 = arith.constant 0 : index
    %235 = vector.load %arg14[%c0_87, %c0_88] : memref<16x128xf32, #tpu.memory_space<vmem>>, vector<16x128xf32>
    tpu.vector_store %arg14[%c0_87, %c0_88], %234 {strides = array<i32>} : memref<16x128xf32, #tpu.memory_space<vmem>>, vector<16x128xf32>,
    return
  }
  func.func @transform_0(%arg0: i32) -> (i32, i32) {
    %c0_i32 = arith.constant 0 : i32
    %c0_i32_0 = arith.constant 0 : i32
    return %arg0, %c0_i32 : i32, i32
  }
  func.func @transform_1(%arg0: i32) -> (i32, i32) {
    %c0_i32 = arith.constant 0 : i32
    %c0_i32_0 = arith.constant 0 : i32
    %c0_i32_1 = arith.constant 0 : i32
    return %c0_i32, %c0_i32_0 : i32, i32
  }
  func.func @transform_2(%arg0: i32) -> (i32, i32) {
    %c0_i32 = arith.constant 0 : i32
    %c0_i32_0 = arith.constant 0 : i32
    %c0_i32_1 = arith.constant 0 : i32
    return %c0_i32, %c0_i32_0 : i32, i32
  }
  func.func @transform_3(%arg0: i32) -> (i32, i32) {
    %c0_i32 = arith.constant 0 : i32
    %c0_i32_0 = arith.constant 0 : i32
    %c0_i32_1 = arith.constant 0 : i32
    return %c0_i32, %c0_i32_0 : i32, i32
  }
  func.func @transform_4(%arg0: i32) -> (i32, i32) {
    %c0_i32 = arith.constant 0 : i32
    %c0_i32_0 = arith.constant 0 : i32
    %c0_i32_1 = arith.constant 0 : i32
    return %c0_i32, %c0_i32_0 : i32, i32
  }
  func.func @transform_5(%arg0: i32) -> (i32, i32) {
    %c0_i32 = arith.constant 0 : i32
    %c0_i32_0 = arith.constant 0 : i32
    %c0_i32_1 = arith.constant 0 : i32
    return %c0_i32, %c0_i32_0 : i32, i32
  }
  func.func @transform_6(%arg0: i32) -> (i32, i32) {
    %c0_i32 = arith.constant 0 : i32
    %c0_i32_0 = arith.constant 0 : i32
    %c0_i32_1 = arith.constant 0 : i32
    return %c0_i32, %c0_i32_0 : i32, i32
  }
  func.func @transform_7(%arg0: i32) -> (i32, i32) {
    %c0_i32 = arith.constant 0 : i32
    %c0_i32_0 = arith.constant 0 : i32
    %c0_i32_1 = arith.constant 0 : i32
    return %c0_i32, %c0_i32_0 : i32, i32
  }
  func.func @transform_8(%arg0: i32) -> (i32, i32) {
    %c0_i32 = arith.constant 0 : i32
    %c0_i32_0 = arith.constant 0 : i32
    %c0_i32_1 = arith.constant 0 : i32
    return %c0_i32, %c0_i32_0 : i32, i32
  }
  func.func @transform_9(%arg0: i32) -> (i32, i32) {
    %c0_i32 = arith.constant 0 : i32
    %c0_i32_0 = arith.constant 0 : i32
    %c0_i32_1 = arith.constant 0 : i32
    return %c0_i32, %c0_i32_0 : i32, i32
  }
  func.func @transform_10(%arg0: i32) -> (i32, i32) {
    %c0_i32 = arith.constant 0 : i32
    %c0_i32_0 = arith.constant 0 : i32
    %c0_i32_1 = arith.constant 0 : i32
    return %c0_i32, %c0_i32_0 : i32, i32
  }
  func.func @transform_11(%arg0: i32) -> (i32, i32) {
    %c0_i32 = arith.constant 0 : i32
    %c0_i32_0 = arith.constant 0 : i32
    %c0_i32_1 = arith.constant 0 : i32
    return %c0_i32, %c0_i32_0 : i32, i32
  }
  func.func @transform_12(%arg0: i32) -> (i32, i32) {
    %c0_i32 = arith.constant 0 : i32
    %c0_i32_0 = arith.constant 0 : i32
    %c0_i32_1 = arith.constant 0 : i32
    return %c0_i32, %c0_i32_0 : i32, i32
  }
  func.func @transform_13(%arg0: i32) -> (i32, i32) {
    %c0_i32 = arith.constant 0 : i32
    %c0_i32_0 = arith.constant 0 : i32
    return %arg0, %c0_i32 : i32, i32
  }
}

module attributes {stable_mosaic.version = 11 : i64} {
  func.func @resblock_kernel(%arg0: i32, %arg1: memref<16x128xf32, #tpu.memory_space<vmem>>, %arg2: memref<1x128xf32, #tpu.memory_space<vmem>>, %arg3: memref<1x128xf32, #tpu.memory_space<vmem>>, %arg4: memref<128x384xbf16, #tpu.memory_space<vmem>>, %arg5: memref<1x384xf32, #tpu.memory_space<vmem>>, %arg6: memref<128x128xbf16, #tpu.memory_space<vmem>>, %arg7: memref<1x128xf32, #tpu.memory_space<vmem>>, %arg8: memref<1x128xf32, #tpu.memory_space<vmem>>, %arg9: memref<1x128xf32, #tpu.memory_space<vmem>>, %arg10: memref<128x512xbf16, #tpu.memory_space<vmem>>, %arg11: memref<1x512xf32, #tpu.memory_space<vmem>>, %arg12: memref<512x128xbf16, #tpu.memory_space<vmem>>, %arg13: memref<1x128xf32, #tpu.memory_space<vmem>>, %arg14: memref<16x128xf32, #tpu.memory_space<vmem>>, %arg15: memref<16x128xbf16, #tpu.memory_space<vmem>>) attributes {dimension_semantics = [#tpu.dimension_semantics<parallel>], iteration_bounds = array<i64: 1>, scalar_prefetch = 0 : i64, scratch_operands = 1 : i64, tpu.core_type = #tpu.core_type<tc>, window_params = [{transform_indices = @transform_0, window_bounds = array<i64: 16, 128>}, {pipeline_mode = #tpu.pipeline_mode<synchronous>, transform_indices = @transform_1, window_bounds = array<i64: 1, 128>}, {pipeline_mode = #tpu.pipeline_mode<synchronous>, transform_indices = @transform_2, window_bounds = array<i64: 1, 128>}, {pipeline_mode = #tpu.pipeline_mode<synchronous>, transform_indices = @transform_3, window_bounds = array<i64: 128, 384>}, {pipeline_mode = #tpu.pipeline_mode<synchronous>, transform_indices = @transform_4, window_bounds = array<i64: 1, 384>}, {pipeline_mode = #tpu.pipeline_mode<synchronous>, transform_indices = @transform_5, window_bounds = array<i64: 128, 128>}, {pipeline_mode = #tpu.pipeline_mode<synchronous>, transform_indices = @transform_6, window_bounds = array<i64: 1, 128>}, {pipeline_mode = #tpu.pipeline_mode<synchronous>, transform_indices = @transform_7, window_bounds = array<i64: 1, 128>}, {pipeline_mode = #tpu.pipeline_mode<synchronous>, transform_indices = @transform_8, window_bounds = array<i64: 1, 128>}, {pipeline_mode = #tpu.pipeline_mode<synchronous>, transform_indices = @transform_9, window_bounds = array<i64: 128, 512>}, {pipeline_mode = #tpu.pipeline_mode<synchronous>, transform_indices = @transform_10, window_bounds = array<i64: 1, 512>}, {pipeline_mode = #tpu.pipeline_mode<synchronous>, transform_indices = @transform_11, window_bounds = array<i64: 512, 128>}, {pipeline_mode = #tpu.pipeline_mode<synchronous>, transform_indices = @transform_12, window_bounds = array<i64: 1, 128>}, {transform_indices = @transform_13, window_bounds = array<i64: 16, 128>}]} {
    %c0 = arith.constant 0 : index
    %c0_0 = arith.constant 0 : index
    %0 = vector.load %arg1[%c0, %c0_0] : memref<16x128xf32, #tpu.memory_space<vmem>>, vector<16x128xf32>
    %c0_1 = arith.constant 0 : index
    %c0_2 = arith.constant 0 : index
    %1 = vector.load %arg2[%c0_1, %c0_2] : memref<1x128xf32, #tpu.memory_space<vmem>>, vector<1x128xf32>
    %c0_3 = arith.constant 0 : index
    %c0_4 = arith.constant 0 : index
    %2 = vector.load %arg3[%c0_3, %c0_4] : memref<1x128xf32, #tpu.memory_space<vmem>>, vector<1x128xf32>
    %cst = arith.constant dense<0.000000e+00> : vector<16xf32>
    %3 = vector.multi_reduction <add>, %0, %cst [1] : vector<16x128xf32> to vector<16xf32>
    %4 = vector.shape_cast %3 : vector<16xf32> to vector<16x1xf32>
    %cst_5 = arith.constant 1.280000e+02 : f32
    %5 = vector.broadcast %cst_5 : f32 to vector<16x1xf32>
    %6 = arith.divf %4, %5 : vector<16x1xf32>
    %7 = vector.broadcast %6 : vector<16x1xf32> to vector<16x128xf32>
    %8 = arith.subf %0, %7 : vector<16x128xf32>
    %9 = arith.mulf %8, %8 : vector<16x128xf32>
    %cst_6 = arith.constant dense<0.000000e+00> : vector<16xf32>
    %10 = vector.multi_reduction <add>, %9, %cst_6 [1] : vector<16x128xf32> to vector<16xf32>
    %11 = vector.shape_cast %10 : vector<16xf32> to vector<16x1xf32>
    %cst_7 = arith.constant 1.280000e+02 : f32
    %12 = vector.broadcast %cst_7 : f32 to vector<16x1xf32>
    %13 = arith.divf %11, %12 : vector<16x1xf32>
    %14 = vector.broadcast %6 : vector<16x1xf32> to vector<16x128xf32>
    %15 = arith.subf %0, %14 : vector<16x128xf32>
    %cst_8 = arith.constant 9.99999974E-6 : f32
    %16 = vector.broadcast %cst_8 : f32 to vector<16x1xf32>
    %17 = arith.addf %13, %16 : vector<16x1xf32>
    %18 = math.rsqrt %17 : vector<16x1xf32>
    %19 = vector.broadcast %18 : vector<16x1xf32> to vector<16x128xf32>
    %20 = arith.mulf %15, %19 : vector<16x128xf32>
    %21 = vector.broadcast %1 : vector<1x128xf32> to vector<16x128xf32>
    %22 = arith.mulf %20, %21 : vector<16x128xf32>
    %23 = vector.broadcast %2 : vector<1x128xf32> to vector<16x128xf32>
    %24 = arith.addf %22, %23 : vector<16x128xf32>
    %25 = arith.truncf %24 : vector<16x128xf32> to vector<16x128xbf16>
    %c0_9 = arith.constant 0 : index
    %c0_10 = arith.constant 0 : index
    %26 = vector.load %arg4[%c0_9, %c0_10] : memref<128x384xbf16, #tpu.memory_space<vmem>>, vector<128x384xbf16>
    %cst_11 = arith.constant dense<0.000000e+00> : vector<16x384xf32>
    %27 = tpu.matmul %25, %26, %cst_11 {dimension_numbers = #tpu.dot_dimension_numbers<[1], [0], [0], [1], [0, 0, 1, 1], [], []>} : vector<16x128xbf16>, vector<128x384xbf16>, vector<16x384xf32> -> vector<16x384xf32>
    %c0_12 = arith.constant 0 : index
    %c0_13 = arith.constant 0 : index
    %28 = vector.load %arg5[%c0_12, %c0_13] : memref<1x384xf32, #tpu.memory_space<vmem>>, vector<1x384xf32>
    %29 = vector.broadcast %28 : vector<1x384xf32> to vector<16x384xf32>
    %30 = arith.addf %27, %29 : vector<16x384xf32>
    %31 = vector.extract_strided_slice %30 {offsets = [0, 0], sizes = [16, 128], strides = [1, 1]} : vector<16x384xf32> to vector<16x128xf32>
    %cst_14 = arith.constant 0.176776692 : f32
    %32 = vector.broadcast %cst_14 : f32 to vector<16x128xf32>
    %33 = arith.mulf %31, %32 : vector<16x128xf32>
    %34 = arith.truncf %33 : vector<16x128xf32> to vector<16x128xbf16>
    %35 = vector.extract_strided_slice %30 {offsets = [0, 128], sizes = [16, 128], strides = [1, 1]} : vector<16x384xf32> to vector<16x128xf32>
    %36 = arith.truncf %35 : vector<16x128xf32> to vector<16x128xbf16>
    %37 = vector.extract_strided_slice %30 {offsets = [0, 256], sizes = [16, 128], strides = [1, 1]} : vector<16x384xf32> to vector<16x128xf32>
    %38 = arith.truncf %37 : vector<16x128xf32> to vector<16x128xbf16>
    %39 = vector.extract_strided_slice %34 {offsets = [0, 0], sizes = [8, 32], strides = [1, 1]} : vector<16x128xbf16> to vector<8x32xbf16>
    %40 = vector.extract_strided_slice %36 {offsets = [0, 0], sizes = [8, 32], strides = [1, 1]} : vector<16x128xbf16> to vector<8x32xbf16>
    %41 = vector.extract_strided_slice %38 {offsets = [0, 0], sizes = [8, 32], strides = [1, 1]} : vector<16x128xbf16> to vector<8x32xbf16>
    %cst_15 = arith.constant dense<0.000000e+00> : vector<8x8xf32>
    %42 = tpu.matmul %39, %40, %cst_15 {dimension_numbers = #tpu.dot_dimension_numbers<[1], [1], [0], [0], [0, 0, 1, 0], [], []>} : vector<8x32xbf16>, vector<8x32xbf16>, vector<8x8xf32> -> vector<8x8xf32>
    %cst_16 = arith.constant dense<0xFF800000> : vector<8xf32>
    %43 = vector.multi_reduction <maximumf>, %42, %cst_16 [1] : vector<8x8xf32> to vector<8xf32>
    %44 = vector.shape_cast %43 : vector<8xf32> to vector<8x1xf32>
    %45 = vector.broadcast %44 : vector<8x1xf32> to vector<8x8xf32>
    %46 = arith.subf %42, %45 : vector<8x8xf32>
    %47 = math.exp %46 : vector<8x8xf32>
    %cst_17 = arith.constant dense<0.000000e+00> : vector<8xf32>
    %48 = vector.multi_reduction <add>, %47, %cst_17 [1] : vector<8x8xf32> to vector<8xf32>
    %49 = vector.shape_cast %48 : vector<8xf32> to vector<8x1xf32>
    %50 = tpu.reciprocal %49 {approx = true} : vector<8x1xf32> -> vector<8x1xf32>
    %51 = vector.broadcast %50 : vector<8x1xf32> to vector<8x8xf32>
    %52 = arith.mulf %47, %51 : vector<8x8xf32>
    %53 = arith.truncf %52 : vector<8x8xf32> to vector<8x8xbf16>
    %cst_18 = arith.constant dense<0.000000e+00> : vector<8x32xf32>
    %54 = tpu.matmul %53, %41, %cst_18 {dimension_numbers = #tpu.dot_dimension_numbers<[1], [0], [0], [1], [0, 0, 1, 1], [], []>} : vector<8x8xbf16>, vector<8x32xbf16>, vector<8x32xf32> -> vector<8x32xf32>
    %55 = arith.truncf %54 : vector<8x32xf32> to vector<8x32xbf16>
    %c0_19 = arith.constant 0 : index
    %c0_20 = arith.constant 0 : index
    %56 = vector.load %arg15[%c0_19, %c0_20] : memref<16x128xbf16, #tpu.memory_space<vmem>>, vector<8x32xbf16>
    tpu.vector_store %arg15[%c0_19, %c0_20], %55 {strides = array<i32>} : memref<16x128xbf16, #tpu.memory_space<vmem>>, vector<8x32xbf16>,
    %57 = vector.extract_strided_slice %34 {offsets = [0, 32], sizes = [8, 32], strides = [1, 1]} : vector<16x128xbf16> to vector<8x32xbf16>
    %58 = vector.extract_strided_slice %36 {offsets = [0, 32], sizes = [8, 32], strides = [1, 1]} : vector<16x128xbf16> to vector<8x32xbf16>
    %59 = vector.extract_strided_slice %38 {offsets = [0, 32], sizes = [8, 32], strides = [1, 1]} : vector<16x128xbf16> to vector<8x32xbf16>
    %cst_21 = arith.constant dense<0.000000e+00> : vector<8x8xf32>
    %60 = tpu.matmul %57, %58, %cst_21 {dimension_numbers = #tpu.dot_dimension_numbers<[1], [1], [0], [0], [0, 0, 1, 0], [], []>} : vector<8x32xbf16>, vector<8x32xbf16>, vector<8x8xf32> -> vector<8x8xf32>
    %cst_22 = arith.constant dense<0xFF800000> : vector<8xf32>
    %61 = vector.multi_reduction <maximumf>, %60, %cst_22 [1] : vector<8x8xf32> to vector<8xf32>
    %62 = vector.shape_cast %61 : vector<8xf32> to vector<8x1xf32>
    %63 = vector.broadcast %62 : vector<8x1xf32> to vector<8x8xf32>
    %64 = arith.subf %60, %63 : vector<8x8xf32>
    %65 = math.exp %64 : vector<8x8xf32>
    %cst_23 = arith.constant dense<0.000000e+00> : vector<8xf32>
    %66 = vector.multi_reduction <add>, %65, %cst_23 [1] : vector<8x8xf32> to vector<8xf32>
    %67 = vector.shape_cast %66 : vector<8xf32> to vector<8x1xf32>
    %68 = tpu.reciprocal %67 {approx = true} : vector<8x1xf32> -> vector<8x1xf32>
    %69 = vector.broadcast %68 : vector<8x1xf32> to vector<8x8xf32>
    %70 = arith.mulf %65, %69 : vector<8x8xf32>
    %71 = arith.truncf %70 : vector<8x8xf32> to vector<8x8xbf16>
    %cst_24 = arith.constant dense<0.000000e+00> : vector<8x32xf32>
    %72 = tpu.matmul %71, %59, %cst_24 {dimension_numbers = #tpu.dot_dimension_numbers<[1], [0], [0], [1], [0, 0, 1, 1], [], []>} : vector<8x8xbf16>, vector<8x32xbf16>, vector<8x32xf32> -> vector<8x32xf32>
    %73 = arith.truncf %72 : vector<8x32xf32> to vector<8x32xbf16>
    %c0_25 = arith.constant 0 : index
    %c32 = arith.constant 32 : index
    %74 = vector.load %arg15[%c0_25, %c32] : memref<16x128xbf16, #tpu.memory_space<vmem>>, vector<8x32xbf16>
    tpu.vector_store %arg15[%c0_25, %c32], %73 {strides = array<i32>} : memref<16x128xbf16, #tpu.memory_space<vmem>>, vector<8x32xbf16>,
    %75 = vector.extract_strided_slice %34 {offsets = [0, 64], sizes = [8, 32], strides = [1, 1]} : vector<16x128xbf16> to vector<8x32xbf16>
    %76 = vector.extract_strided_slice %36 {offsets = [0, 64], sizes = [8, 32], strides = [1, 1]} : vector<16x128xbf16> to vector<8x32xbf16>
    %77 = vector.extract_strided_slice %38 {offsets = [0, 64], sizes = [8, 32], strides = [1, 1]} : vector<16x128xbf16> to vector<8x32xbf16>
    %cst_26 = arith.constant dense<0.000000e+00> : vector<8x8xf32>
    %78 = tpu.matmul %75, %76, %cst_26 {dimension_numbers = #tpu.dot_dimension_numbers<[1], [1], [0], [0], [0, 0, 1, 0], [], []>} : vector<8x32xbf16>, vector<8x32xbf16>, vector<8x8xf32> -> vector<8x8xf32>
    %cst_27 = arith.constant dense<0xFF800000> : vector<8xf32>
    %79 = vector.multi_reduction <maximumf>, %78, %cst_27 [1] : vector<8x8xf32> to vector<8xf32>
    %80 = vector.shape_cast %79 : vector<8xf32> to vector<8x1xf32>
    %81 = vector.broadcast %80 : vector<8x1xf32> to vector<8x8xf32>
    %82 = arith.subf %78, %81 : vector<8x8xf32>
    %83 = math.exp %82 : vector<8x8xf32>
    %cst_28 = arith.constant dense<0.000000e+00> : vector<8xf32>
    %84 = vector.multi_reduction <add>, %83, %cst_28 [1] : vector<8x8xf32> to vector<8xf32>
    %85 = vector.shape_cast %84 : vector<8xf32> to vector<8x1xf32>
    %86 = tpu.reciprocal %85 {approx = true} : vector<8x1xf32> -> vector<8x1xf32>
    %87 = vector.broadcast %86 : vector<8x1xf32> to vector<8x8xf32>
    %88 = arith.mulf %83, %87 : vector<8x8xf32>
    %89 = arith.truncf %88 : vector<8x8xf32> to vector<8x8xbf16>
    %cst_29 = arith.constant dense<0.000000e+00> : vector<8x32xf32>
    %90 = tpu.matmul %89, %77, %cst_29 {dimension_numbers = #tpu.dot_dimension_numbers<[1], [0], [0], [1], [0, 0, 1, 1], [], []>} : vector<8x8xbf16>, vector<8x32xbf16>, vector<8x32xf32> -> vector<8x32xf32>
    %91 = arith.truncf %90 : vector<8x32xf32> to vector<8x32xbf16>
    %c0_30 = arith.constant 0 : index
    %c64 = arith.constant 64 : index
    %92 = vector.load %arg15[%c0_30, %c64] : memref<16x128xbf16, #tpu.memory_space<vmem>>, vector<8x32xbf16>
    tpu.vector_store %arg15[%c0_30, %c64], %91 {strides = array<i32>} : memref<16x128xbf16, #tpu.memory_space<vmem>>, vector<8x32xbf16>,
    %93 = vector.extract_strided_slice %34 {offsets = [0, 96], sizes = [8, 32], strides = [1, 1]} : vector<16x128xbf16> to vector<8x32xbf16>
    %94 = vector.extract_strided_slice %36 {offsets = [0, 96], sizes = [8, 32], strides = [1, 1]} : vector<16x128xbf16> to vector<8x32xbf16>
    %95 = vector.extract_strided_slice %38 {offsets = [0, 96], sizes = [8, 32], strides = [1, 1]} : vector<16x128xbf16> to vector<8x32xbf16>
    %cst_31 = arith.constant dense<0.000000e+00> : vector<8x8xf32>
    %96 = tpu.matmul %93, %94, %cst_31 {dimension_numbers = #tpu.dot_dimension_numbers<[1], [1], [0], [0], [0, 0, 1, 0], [], []>} : vector<8x32xbf16>, vector<8x32xbf16>, vector<8x8xf32> -> vector<8x8xf32>
    %cst_32 = arith.constant dense<0xFF800000> : vector<8xf32>
    %97 = vector.multi_reduction <maximumf>, %96, %cst_32 [1] : vector<8x8xf32> to vector<8xf32>
    %98 = vector.shape_cast %97 : vector<8xf32> to vector<8x1xf32>
    %99 = vector.broadcast %98 : vector<8x1xf32> to vector<8x8xf32>
    %100 = arith.subf %96, %99 : vector<8x8xf32>
    %101 = math.exp %100 : vector<8x8xf32>
    %cst_33 = arith.constant dense<0.000000e+00> : vector<8xf32>
    %102 = vector.multi_reduction <add>, %101, %cst_33 [1] : vector<8x8xf32> to vector<8xf32>
    %103 = vector.shape_cast %102 : vector<8xf32> to vector<8x1xf32>
    %104 = tpu.reciprocal %103 {approx = true} : vector<8x1xf32> -> vector<8x1xf32>
    %105 = vector.broadcast %104 : vector<8x1xf32> to vector<8x8xf32>
    %106 = arith.mulf %101, %105 : vector<8x8xf32>
    %107 = arith.truncf %106 : vector<8x8xf32> to vector<8x8xbf16>
    %cst_34 = arith.constant dense<0.000000e+00> : vector<8x32xf32>
    %108 = tpu.matmul %107, %95, %cst_34 {dimension_numbers = #tpu.dot_dimension_numbers<[1], [0], [0], [1], [0, 0, 1, 1], [], []>} : vector<8x8xbf16>, vector<8x32xbf16>, vector<8x32xf32> -> vector<8x32xf32>
    %109 = arith.truncf %108 : vector<8x32xf32> to vector<8x32xbf16>
    %c0_35 = arith.constant 0 : index
    %c96 = arith.constant 96 : index
    %110 = vector.load %arg15[%c0_35, %c96] : memref<16x128xbf16, #tpu.memory_space<vmem>>, vector<8x32xbf16>
    tpu.vector_store %arg15[%c0_35, %c96], %109 {strides = array<i32>} : memref<16x128xbf16, #tpu.memory_space<vmem>>, vector<8x32xbf16>,
    %111 = vector.extract_strided_slice %34 {offsets = [8, 0], sizes = [8, 32], strides = [1, 1]} : vector<16x128xbf16> to vector<8x32xbf16>
    %112 = vector.extract_strided_slice %36 {offsets = [8, 0], sizes = [8, 32], strides = [1, 1]} : vector<16x128xbf16> to vector<8x32xbf16>
    %113 = vector.extract_strided_slice %38 {offsets = [8, 0], sizes = [8, 32], strides = [1, 1]} : vector<16x128xbf16> to vector<8x32xbf16>
    %cst_36 = arith.constant dense<0.000000e+00> : vector<8x8xf32>
    %114 = tpu.matmul %111, %112, %cst_36 {dimension_numbers = #tpu.dot_dimension_numbers<[1], [1], [0], [0], [0, 0, 1, 0], [], []>} : vector<8x32xbf16>, vector<8x32xbf16>, vector<8x8xf32> -> vector<8x8xf32>
    %cst_37 = arith.constant dense<0xFF800000> : vector<8xf32>
    %115 = vector.multi_reduction <maximumf>, %114, %cst_37 [1] : vector<8x8xf32> to vector<8xf32>
    %116 = vector.shape_cast %115 : vector<8xf32> to vector<8x1xf32>
    %117 = vector.broadcast %116 : vector<8x1xf32> to vector<8x8xf32>
    %118 = arith.subf %114, %117 : vector<8x8xf32>
    %119 = math.exp %118 : vector<8x8xf32>
    %cst_38 = arith.constant dense<0.000000e+00> : vector<8xf32>
    %120 = vector.multi_reduction <add>, %119, %cst_38 [1] : vector<8x8xf32> to vector<8xf32>
    %121 = vector.shape_cast %120 : vector<8xf32> to vector<8x1xf32>
    %122 = tpu.reciprocal %121 {approx = true} : vector<8x1xf32> -> vector<8x1xf32>
    %123 = vector.broadcast %122 : vector<8x1xf32> to vector<8x8xf32>
    %124 = arith.mulf %119, %123 : vector<8x8xf32>
    %125 = arith.truncf %124 : vector<8x8xf32> to vector<8x8xbf16>
    %cst_39 = arith.constant dense<0.000000e+00> : vector<8x32xf32>
    %126 = tpu.matmul %125, %113, %cst_39 {dimension_numbers = #tpu.dot_dimension_numbers<[1], [0], [0], [1], [0, 0, 1, 1], [], []>} : vector<8x8xbf16>, vector<8x32xbf16>, vector<8x32xf32> -> vector<8x32xf32>
    %127 = arith.truncf %126 : vector<8x32xf32> to vector<8x32xbf16>
    %c8 = arith.constant 8 : index
    %c0_40 = arith.constant 0 : index
    %128 = vector.load %arg15[%c8, %c0_40] : memref<16x128xbf16, #tpu.memory_space<vmem>>, vector<8x32xbf16>
    tpu.vector_store %arg15[%c8, %c0_40], %127 {strides = array<i32>} : memref<16x128xbf16, #tpu.memory_space<vmem>>, vector<8x32xbf16>,
    %129 = vector.extract_strided_slice %34 {offsets = [8, 32], sizes = [8, 32], strides = [1, 1]} : vector<16x128xbf16> to vector<8x32xbf16>
    %130 = vector.extract_strided_slice %36 {offsets = [8, 32], sizes = [8, 32], strides = [1, 1]} : vector<16x128xbf16> to vector<8x32xbf16>
    %131 = vector.extract_strided_slice %38 {offsets = [8, 32], sizes = [8, 32], strides = [1, 1]} : vector<16x128xbf16> to vector<8x32xbf16>
    %cst_41 = arith.constant dense<0.000000e+00> : vector<8x8xf32>
    %132 = tpu.matmul %129, %130, %cst_41 {dimension_numbers = #tpu.dot_dimension_numbers<[1], [1], [0], [0], [0, 0, 1, 0], [], []>} : vector<8x32xbf16>, vector<8x32xbf16>, vector<8x8xf32> -> vector<8x8xf32>
    %cst_42 = arith.constant dense<0xFF800000> : vector<8xf32>
    %133 = vector.multi_reduction <maximumf>, %132, %cst_42 [1] : vector<8x8xf32> to vector<8xf32>
    %134 = vector.shape_cast %133 : vector<8xf32> to vector<8x1xf32>
    %135 = vector.broadcast %134 : vector<8x1xf32> to vector<8x8xf32>
    %136 = arith.subf %132, %135 : vector<8x8xf32>
    %137 = math.exp %136 : vector<8x8xf32>
    %cst_43 = arith.constant dense<0.000000e+00> : vector<8xf32>
    %138 = vector.multi_reduction <add>, %137, %cst_43 [1] : vector<8x8xf32> to vector<8xf32>
    %139 = vector.shape_cast %138 : vector<8xf32> to vector<8x1xf32>
    %140 = tpu.reciprocal %139 {approx = true} : vector<8x1xf32> -> vector<8x1xf32>
    %141 = vector.broadcast %140 : vector<8x1xf32> to vector<8x8xf32>
    %142 = arith.mulf %137, %141 : vector<8x8xf32>
    %143 = arith.truncf %142 : vector<8x8xf32> to vector<8x8xbf16>
    %cst_44 = arith.constant dense<0.000000e+00> : vector<8x32xf32>
    %144 = tpu.matmul %143, %131, %cst_44 {dimension_numbers = #tpu.dot_dimension_numbers<[1], [0], [0], [1], [0, 0, 1, 1], [], []>} : vector<8x8xbf16>, vector<8x32xbf16>, vector<8x32xf32> -> vector<8x32xf32>
    %145 = arith.truncf %144 : vector<8x32xf32> to vector<8x32xbf16>
    %c8_45 = arith.constant 8 : index
    %c32_46 = arith.constant 32 : index
    %146 = vector.load %arg15[%c8_45, %c32_46] : memref<16x128xbf16, #tpu.memory_space<vmem>>, vector<8x32xbf16>
    tpu.vector_store %arg15[%c8_45, %c32_46], %145 {strides = array<i32>} : memref<16x128xbf16, #tpu.memory_space<vmem>>, vector<8x32xbf16>,
    %147 = vector.extract_strided_slice %34 {offsets = [8, 64], sizes = [8, 32], strides = [1, 1]} : vector<16x128xbf16> to vector<8x32xbf16>
    %148 = vector.extract_strided_slice %36 {offsets = [8, 64], sizes = [8, 32], strides = [1, 1]} : vector<16x128xbf16> to vector<8x32xbf16>
    %149 = vector.extract_strided_slice %38 {offsets = [8, 64], sizes = [8, 32], strides = [1, 1]} : vector<16x128xbf16> to vector<8x32xbf16>
    %cst_47 = arith.constant dense<0.000000e+00> : vector<8x8xf32>
    %150 = tpu.matmul %147, %148, %cst_47 {dimension_numbers = #tpu.dot_dimension_numbers<[1], [1], [0], [0], [0, 0, 1, 0], [], []>} : vector<8x32xbf16>, vector<8x32xbf16>, vector<8x8xf32> -> vector<8x8xf32>
    %cst_48 = arith.constant dense<0xFF800000> : vector<8xf32>
    %151 = vector.multi_reduction <maximumf>, %150, %cst_48 [1] : vector<8x8xf32> to vector<8xf32>
    %152 = vector.shape_cast %151 : vector<8xf32> to vector<8x1xf32>
    %153 = vector.broadcast %152 : vector<8x1xf32> to vector<8x8xf32>
    %154 = arith.subf %150, %153 : vector<8x8xf32>
    %155 = math.exp %154 : vector<8x8xf32>
    %cst_49 = arith.constant dense<0.000000e+00> : vector<8xf32>
    %156 = vector.multi_reduction <add>, %155, %cst_49 [1] : vector<8x8xf32> to vector<8xf32>
    %157 = vector.shape_cast %156 : vector<8xf32> to vector<8x1xf32>
    %158 = tpu.reciprocal %157 {approx = true} : vector<8x1xf32> -> vector<8x1xf32>
    %159 = vector.broadcast %158 : vector<8x1xf32> to vector<8x8xf32>
    %160 = arith.mulf %155, %159 : vector<8x8xf32>
    %161 = arith.truncf %160 : vector<8x8xf32> to vector<8x8xbf16>
    %cst_50 = arith.constant dense<0.000000e+00> : vector<8x32xf32>
    %162 = tpu.matmul %161, %149, %cst_50 {dimension_numbers = #tpu.dot_dimension_numbers<[1], [0], [0], [1], [0, 0, 1, 1], [], []>} : vector<8x8xbf16>, vector<8x32xbf16>, vector<8x32xf32> -> vector<8x32xf32>
    %163 = arith.truncf %162 : vector<8x32xf32> to vector<8x32xbf16>
    %c8_51 = arith.constant 8 : index
    %c64_52 = arith.constant 64 : index
    %164 = vector.load %arg15[%c8_51, %c64_52] : memref<16x128xbf16, #tpu.memory_space<vmem>>, vector<8x32xbf16>
    tpu.vector_store %arg15[%c8_51, %c64_52], %163 {strides = array<i32>} : memref<16x128xbf16, #tpu.memory_space<vmem>>, vector<8x32xbf16>,
    %165 = vector.extract_strided_slice %34 {offsets = [8, 96], sizes = [8, 32], strides = [1, 1]} : vector<16x128xbf16> to vector<8x32xbf16>
    %166 = vector.extract_strided_slice %36 {offsets = [8, 96], sizes = [8, 32], strides = [1, 1]} : vector<16x128xbf16> to vector<8x32xbf16>
    %167 = vector.extract_strided_slice %38 {offsets = [8, 96], sizes = [8, 32], strides = [1, 1]} : vector<16x128xbf16> to vector<8x32xbf16>
    %cst_53 = arith.constant dense<0.000000e+00> : vector<8x8xf32>
    %168 = tpu.matmul %165, %166, %cst_53 {dimension_numbers = #tpu.dot_dimension_numbers<[1], [1], [0], [0], [0, 0, 1, 0], [], []>} : vector<8x32xbf16>, vector<8x32xbf16>, vector<8x8xf32> -> vector<8x8xf32>
    %cst_54 = arith.constant dense<0xFF800000> : vector<8xf32>
    %169 = vector.multi_reduction <maximumf>, %168, %cst_54 [1] : vector<8x8xf32> to vector<8xf32>
    %170 = vector.shape_cast %169 : vector<8xf32> to vector<8x1xf32>
    %171 = vector.broadcast %170 : vector<8x1xf32> to vector<8x8xf32>
    %172 = arith.subf %168, %171 : vector<8x8xf32>
    %173 = math.exp %172 : vector<8x8xf32>
    %cst_55 = arith.constant dense<0.000000e+00> : vector<8xf32>
    %174 = vector.multi_reduction <add>, %173, %cst_55 [1] : vector<8x8xf32> to vector<8xf32>
    %175 = vector.shape_cast %174 : vector<8xf32> to vector<8x1xf32>
    %176 = tpu.reciprocal %175 {approx = true} : vector<8x1xf32> -> vector<8x1xf32>
    %177 = vector.broadcast %176 : vector<8x1xf32> to vector<8x8xf32>
    %178 = arith.mulf %173, %177 : vector<8x8xf32>
    %179 = arith.truncf %178 : vector<8x8xf32> to vector<8x8xbf16>
    %cst_56 = arith.constant dense<0.000000e+00> : vector<8x32xf32>
    %180 = tpu.matmul %179, %167, %cst_56 {dimension_numbers = #tpu.dot_dimension_numbers<[1], [0], [0], [1], [0, 0, 1, 1], [], []>} : vector<8x8xbf16>, vector<8x32xbf16>, vector<8x32xf32> -> vector<8x32xf32>
    %181 = arith.truncf %180 : vector<8x32xf32> to vector<8x32xbf16>
    %c8_57 = arith.constant 8 : index
    %c96_58 = arith.constant 96 : index
    %182 = vector.load %arg15[%c8_57, %c96_58] : memref<16x128xbf16, #tpu.memory_space<vmem>>, vector<8x32xbf16>
    tpu.vector_store %arg15[%c8_57, %c96_58], %181 {strides = array<i32>} : memref<16x128xbf16, #tpu.memory_space<vmem>>, vector<8x32xbf16>,
    %c0_59 = arith.constant 0 : index
    %c0_60 = arith.constant 0 : index
    %183 = vector.load %arg15[%c0_59, %c0_60] : memref<16x128xbf16, #tpu.memory_space<vmem>>, vector<16x128xbf16>
    %c0_61 = arith.constant 0 : index
    %c0_62 = arith.constant 0 : index
    %184 = vector.load %arg6[%c0_61, %c0_62] : memref<128x128xbf16, #tpu.memory_space<vmem>>, vector<128x128xbf16>
    %cst_63 = arith.constant dense<0.000000e+00> : vector<16x128xf32>
    %185 = tpu.matmul %183, %184, %cst_63 {dimension_numbers = #tpu.dot_dimension_numbers<[1], [0], [0], [1], [0, 0, 1, 1], [], []>} : vector<16x128xbf16>, vector<128x128xbf16>, vector<16x128xf32> -> vector<16x128xf32>
    %c0_64 = arith.constant 0 : index
    %c0_65 = arith.constant 0 : index
    %186 = vector.load %arg7[%c0_64, %c0_65] : memref<1x128xf32, #tpu.memory_space<vmem>>, vector<1x128xf32>
    %187 = vector.broadcast %186 : vector<1x128xf32> to vector<16x128xf32>
    %188 = arith.addf %185, %187 : vector<16x128xf32>
    %189 = arith.addf %0, %188 : vector<16x128xf32>
    %c0_66 = arith.constant 0 : index
    %c0_67 = arith.constant 0 : index
    %190 = vector.load %arg8[%c0_66, %c0_67] : memref<1x128xf32, #tpu.memory_space<vmem>>, vector<1x128xf32>
    %c0_68 = arith.constant 0 : index
    %c0_69 = arith.constant 0 : index
    %191 = vector.load %arg9[%c0_68, %c0_69] : memref<1x128xf32, #tpu.memory_space<vmem>>, vector<1x128xf32>
    %cst_70 = arith.constant dense<0.000000e+00> : vector<16xf32>
    %192 = vector.multi_reduction <add>, %189, %cst_70 [1] : vector<16x128xf32> to vector<16xf32>
    %193 = vector.shape_cast %192 : vector<16xf32> to vector<16x1xf32>
    %cst_71 = arith.constant 1.280000e+02 : f32
    %194 = vector.broadcast %cst_71 : f32 to vector<16x1xf32>
    %195 = arith.divf %193, %194 : vector<16x1xf32>
    %196 = vector.broadcast %195 : vector<16x1xf32> to vector<16x128xf32>
    %197 = arith.subf %189, %196 : vector<16x128xf32>
    %198 = arith.mulf %197, %197 : vector<16x128xf32>
    %cst_72 = arith.constant dense<0.000000e+00> : vector<16xf32>
    %199 = vector.multi_reduction <add>, %198, %cst_72 [1] : vector<16x128xf32> to vector<16xf32>
    %200 = vector.shape_cast %199 : vector<16xf32> to vector<16x1xf32>
    %cst_73 = arith.constant 1.280000e+02 : f32
    %201 = vector.broadcast %cst_73 : f32 to vector<16x1xf32>
    %202 = arith.divf %200, %201 : vector<16x1xf32>
    %203 = vector.broadcast %195 : vector<16x1xf32> to vector<16x128xf32>
    %204 = arith.subf %189, %203 : vector<16x128xf32>
    %cst_74 = arith.constant 9.99999974E-6 : f32
    %205 = vector.broadcast %cst_74 : f32 to vector<16x1xf32>
    %206 = arith.addf %202, %205 : vector<16x1xf32>
    %207 = math.rsqrt %206 : vector<16x1xf32>
    %208 = vector.broadcast %207 : vector<16x1xf32> to vector<16x128xf32>
    %209 = arith.mulf %204, %208 : vector<16x128xf32>
    %210 = vector.broadcast %190 : vector<1x128xf32> to vector<16x128xf32>
    %211 = arith.mulf %209, %210 : vector<16x128xf32>
    %212 = vector.broadcast %191 : vector<1x128xf32> to vector<16x128xf32>
    %213 = arith.addf %211, %212 : vector<16x128xf32>
    %214 = arith.truncf %213 : vector<16x128xf32> to vector<16x128xbf16>
    %c0_75 = arith.constant 0 : index
    %c0_76 = arith.constant 0 : index
    %215 = vector.load %arg10[%c0_75, %c0_76] : memref<128x512xbf16, #tpu.memory_space<vmem>>, vector<128x512xbf16>
    %cst_77 = arith.constant dense<0.000000e+00> : vector<16x512xf32>
    %216 = tpu.matmul %214, %215, %cst_77 {dimension_numbers = #tpu.dot_dimension_numbers<[1], [0], [0], [1], [0, 0, 1, 1], [], []>} : vector<16x128xbf16>, vector<128x512xbf16>, vector<16x512xf32> -> vector<16x512xf32>
    %c0_78 = arith.constant 0 : index
    %c0_79 = arith.constant 0 : index
    %217 = vector.load %arg11[%c0_78, %c0_79] : memref<1x512xf32, #tpu.memory_space<vmem>>, vector<1x512xf32>
    %218 = vector.broadcast %217 : vector<1x512xf32> to vector<16x512xf32>
    %219 = arith.addf %216, %218 : vector<16x512xf32>
    %cst_80 = arith.constant 1.702000e+00 : f32
    %220 = vector.broadcast %cst_80 : f32 to vector<16x512xf32>
    %221 = arith.mulf %220, %219 : vector<16x512xf32>
    %222 = arith.negf %221 : vector<16x512xf32>
    %223 = math.exp %222 : vector<16x512xf32>
    %cst_81 = arith.constant 1.000000e+00 : f32
    %224 = vector.broadcast %cst_81 : f32 to vector<16x512xf32>
    %225 = arith.addf %224, %223 : vector<16x512xf32>
    %226 = arith.divf %224, %225 : vector<16x512xf32>
    %227 = arith.mulf %219, %226 : vector<16x512xf32>
    %228 = arith.truncf %227 : vector<16x512xf32> to vector<16x512xbf16>
    %c0_82 = arith.constant 0 : index
    %c0_83 = arith.constant 0 : index
    %229 = vector.load %arg12[%c0_82, %c0_83] : memref<512x128xbf16, #tpu.memory_space<vmem>>, vector<512x128xbf16>
    %cst_84 = arith.constant dense<0.000000e+00> : vector<16x128xf32>
    %230 = tpu.matmul %228, %229, %cst_84 {dimension_numbers = #tpu.dot_dimension_numbers<[1], [0], [0], [1], [0, 0, 1, 1], [], []>} : vector<16x512xbf16>, vector<512x128xbf16>, vector<16x128xf32> -> vector<16x128xf32>
    %c0_85 = arith.constant 0 : index
    %c0_86 = arith.constant 0 : index
    %231 = vector.load %arg13[%c0_85, %c0_86] : memref<1x128xf32, #tpu.memory_space<vmem>>, vector<1x128xf32>
    %232 = vector.broadcast %231 : vector<1x128xf32> to vector<16x128xf32>
    %233 = arith.addf %230, %232 : vector<16x128xf32>
    %234 = arith.addf %189, %233 : vector<16x128xf32>
    %c0_87 = arith.constant 0 : index
    %c0_88 = arith.constant 0 : index
    %235 = vector.load %arg14[%c0_87, %c0_88] : memref<16x128xf32, #tpu.memory_space<vmem>>, vector<16x128xf32>
    tpu.vector_store %arg14[%c0_87, %c0_88], %234 {strides = array<i32>} : memref<16x128xf32, #tpu.memory_space<vmem>>, vector<16x128xf32>,
    return
  }
  func.func @transform_0(%arg0: i32) -> (i32, i32) {
    %c0_i32 = arith.constant 0 : i32
    %c0_i32_0 = arith.constant 0 : i32
    return %arg0, %c0_i32 : i32, i32
  }
  func.func @transform_1(%arg0: i32) -> (i32, i32) {
    %c0_i32 = arith.constant 0 : i32
    %c0_i32_0 = arith.constant 0 : i32
    %c0_i32_1 = arith.constant 0 : i32
    return %c0_i32, %c0_i32_0 : i32, i32
  }
  func.func @transform_2(%arg0: i32) -> (i32, i32) {
    %c0_i32 = arith.constant 0 : i32
    %c0_i32_0 = arith.constant 0 : i32
    %c0_i32_1 = arith.constant 0 : i32
    return %c0_i32, %c0_i32_0 : i32, i32
  }
  func.func @transform_3(%arg0: i32) -> (i32, i32) {
    %c0_i32 = arith.constant 0 : i32
    %c0_i32_0 = arith.constant 0 : i32
    %c0_i32_1 = arith.constant 0 : i32
    return %c0_i32, %c0_i32_0 : i32, i32
  }
  func.func @transform_4(%arg0: i32) -> (i32, i32) {
    %c0_i32 = arith.constant 0 : i32
    %c0_i32_0 = arith.constant 0 : i32
    %c0_i32_1 = arith.constant 0 : i32
    return %c0_i32, %c0_i32_0 : i32, i32
  }
  func.func @transform_5(%arg0: i32) -> (i32, i32) {
    %c0_i32 = arith.constant 0 : i32
    %c0_i32_0 = arith.constant 0 : i32
    %c0_i32_1 = arith.constant 0 : i32
    return %c0_i32, %c0_i32_0 : i32, i32
  }
  func.func @transform_6(%arg0: i32) -> (i32, i32) {
    %c0_i32 = arith.constant 0 : i32
    %c0_i32_0 = arith.constant 0 : i32
    %c0_i32_1 = arith.constant 0 : i32
    return %c0_i32, %c0_i32_0 : i32, i32
  }
  func.func @transform_7(%arg0: i32) -> (i32, i32) {
    %c0_i32 = arith.constant 0 : i32
    %c0_i32_0 = arith.constant 0 : i32
    %c0_i32_1 = arith.constant 0 : i32
    return %c0_i32, %c0_i32_0 : i32, i32
  }
  func.func @transform_8(%arg0: i32) -> (i32, i32) {
    %c0_i32 = arith.constant 0 : i32
    %c0_i32_0 = arith.constant 0 : i32
    %c0_i32_1 = arith.constant 0 : i32
    return %c0_i32, %c0_i32_0 : i32, i32
  }
  func.func @transform_9(%arg0: i32) -> (i32, i32) {
    %c0_i32 = arith.constant 0 : i32
    %c0_i32_0 = arith.constant 0 : i32
    %c0_i32_1 = arith.constant 0 : i32
    return %c0_i32, %c0_i32_0 : i32, i32
  }
  func.func @transform_10(%arg0: i32) -> (i32, i32) {
    %c0_i32 = arith.constant 0 : i32
    %c0_i32_0 = arith.constant 0 : i32
    %c0_i32_1 = arith.constant 0 : i32
    return %c0_i32, %c0_i32_0 : i32, i32
  }
  func.func @transform_11(%arg0: i32) -> (i32, i32) {
    %c0_i32 = arith.constant 0 : i32
    %c0_i32_0 = arith.constant 0 : i32
    %c0_i32_1 = arith.constant 0 : i32
    return %c0_i32, %c0_i32_0 : i32, i32
  }
  func.func @transform_12(%arg0: i32) -> (i32, i32) {
    %c0_i32 = arith.constant 0 : i32
    %c0_i32_0 = arith.constant 0 : i32
    %c0_i32_1 = arith.constant 0 : i32
    return %c0_i32, %c0_i32_0 : i32, i32
  }
  func.func @transform_13(%arg0: i32) -> (i32, i32) {
    %c0_i32 = arith.constant 0 : i32
    %c0_i32_0 = arith.constant 0 : i32
    return %arg0, %c0_i32 : i32, i32
  }
}

</mosaic_0001>

<bundles_post_ra>
// kernel: tpu_custom_call.1
= control target key start
LH: loop header
LB: loop body
LE: loop exit
PB: predicated region body
PF: predicated region fallthrough
CT: control target
= control target key end

     0   :  { %18 = vsyncpa [#allocation4], 0  ;;  %s3495_s0 = inlined_call_operand.hbm [shape: f32[16,128], index: 0, kind: input, shape index: {}]   ;;  %s3496_s1 = inlined_call_operand.hbm [shape: f32[1,128], index: 1, kind: input, shape index: {}]   ;;  %s3497_s2 = inlined_call_operand.hbm [shape: f32[1,128], index: 2, kind: input, shape index: {}]   ;;  %s3498_s3 = inlined_call_operand.hbm [shape: bf16[128,384], index: 3, kind: input, shape index: {}]   ;;  %s3499_s4 = inlined_call_operand.vmem [shape: f32[1,384], index: 4, kind: input, shape index: {}]   ;;  %s3500_s5 = inlined_call_operand.hbm [shape: bf16[128,128], index: 5, kind: input, shape index: {}]   ;;  %s3501_s6 = inlined_call_operand.vmem [shape: f32[1,128], index: 6, kind: input, shape index: {}]   ;;  %s3502_s7 = inlined_call_operand.vmem [shape: f32[1,128], index: 7, kind: input, shape index: {}]   ;;  %s3503_s8 = inlined_call_operand.vmem [shape: f32[1,128], index: 8, kind: input, shape index: {}]   ;;  %s3504_s9 = inlined_call_operand.hbm [shape: bf16[128,512], index: 9, kind: input, shape index: {}]   ;;  %s3505_s10 = inlined_call_operand.vmem [shape: f32[1,512], index: 10, kind: input, shape index: {}]   ;;  %s3506_s11 = inlined_call_operand.hbm [shape: bf16[512,128], index: 11, kind: input, shape index: {}]   ;;  %s3507_s12 = inlined_call_operand.vmem [shape: f32[1,128], index: 12, kind: input, shape index: {}]   ;;  %s3508_s13 = inlined_call_operand.hbm [shape: f32[16,128], index: 13, kind: output, shape index: {}]  }
   0x1   :  { %19 = vsyncpa [#allocation7], 0 }
   0x2   :  { %20 = vsyncpa [#allocation10], 0 }
   0x3   :  { %21 = vsyncpa [#allocation13], 0 }
   0x4   :  { %22 = vsyncpa [#allocation5], 0  ;;  %s3028_s25 = smov [#allocation6]   ;;  %s3029_s27 = smov [#allocation9]  }
   0x5   :  { %s41_s26 = sshll.u32 %s3028_s25, 4  ;;  %s60_s28 = sshll.u32 %s3029_s27, 4  ;;  %s42_s26 = int_to_ptr.vmem [resolvable:$true] %s41_s26  ;;  %s3119_s28 = int_to_ptr.vmem [resolvable:$true] %s60_s28 }
   0x6   :  { %s2842_s14 = scalar_lea.hbm %s3496_s1, 16 }
   0x7   :  { %p2843_p0 = scmp.ne.s32.totalorder %s3496_s1, %s2842_s14  ;;  %p2846_p1 = scmp.lt.u32.totalorder %s2842_s14, %s3496_s1 }
   0x9   :  { %p2848_p2 = pnand %p2846_p1, %p2843_p0 }
   0xb   :  { %2851 = shalt.err (!%p2848_p2)
}
   0xc   :  { %s2852_s19 = scalar_lea.vmem %s42_s26, 16  ;;  %s2856_s20 = scalar_lea.vmem %s42_s26, 32 }
   0xd   :  { %p2853_p3 = scmp.ne.s32.totalorder %s42_s26, %s2852_s19  ;;  %p2857_p4 = scmp.lt.s32.totalorder %s42_s26, %s42_s26 }
   0xe   :  { %p2858_p5 = scmp.lt.s32.totalorder %s2856_s20, %s2852_s19 }
  0x10   :  { %p2859_p6 = por %p2858_p5, %p2857_p4 }
  0x12   :  { %p2860_p7 = pnand %p2859_p6, %p2853_p3 }
  0x14   :  { %2863 = shalt.err (!%p2860_p7)
}
  0x15   :  { %44 = dma.hbm_to_vmem [thread:$0]  %s3496_s1, 16, %s42_s26, [#allocation7]  }
  0x16   :  { %s2864_s25 = scalar_lea.hbm %s3498_s3, 3072 }
  0x17   :  { %p2865_p8 = scmp.ne.s32.totalorder %s3498_s3, %s2864_s25  ;;  %p2868_p9 = scmp.lt.u32.totalorder %s2864_s25, %s3498_s3 }
  0x19   :  { %p2870_p10 = pnand %p2868_p9, %p2865_p8 }
  0x1b   :  { %2873 = shalt.err (!%p2870_p10)
}
  0x1c   :  { %s2874_s15 = scalar_lea.vmem %s3119_s28, 3072  ;;  %p2879_p12 = scmp.lt.s32.totalorder %s3119_s28, %s3119_s28 }
  0x1d   :  { %p2875_p11 = scmp.ne.s32.totalorder %s3119_s28, %s2874_s15  ;;  %p2880_p13 = scmp.lt.s32.totalorder %s2874_s15, %s2874_s15 }
  0x1f   :  { %p2881_p0 = por %p2880_p13, %p2879_p12 }
  0x21   :  { %p2882_p1 = pnand %p2881_p0, %p2875_p11 }
  0x23   :  { %2885 = shalt.err (!%p2882_p1)
}
  0x24   :  { %s3030_s1 = smov 192   ;;  %s3031_s26 = smov 12  }
  0x25   :  { %66 = dma.hbm_to_vmem [thread:$0]  %s3498_s3, 3072, %s3119_s28, [#allocation10], %s3030_s1, %s3030_s1, %s3031_s26  }
  0x26   :  { %s3032_s18 = smov [#allocation12]   ;;  %s2886_s22 = scalar_lea.hbm %s3504_s9, 4096 }
  0x27   :  { %s92_s19 = sshll.u32 %s3032_s18, 4  ;;  %p2887_p2 = scmp.ne.s32.totalorder %s3504_s9, %s2886_s22  ;;  %s93_s19 = int_to_ptr.vmem [resolvable:$true] %s92_s19 }
  0x28   :  { %p2890_p3 = scmp.lt.u32.totalorder %s2886_s22, %s3504_s9 }
  0x2a   :  { %p2892_p4 = pnand %p2890_p3, %p2887_p2 }
  0x2c   :  { %2895 = shalt.err (!%p2892_p4)
}
  0x2d   :  { %s2896_s29 = scalar_lea.vmem %s93_s19, 4096  ;;  %p2901_p6 = scmp.lt.s32.totalorder %s93_s19, %s93_s19 }
  0x2e   :  { %p2897_p5 = scmp.ne.s32.totalorder %s93_s19, %s2896_s29  ;;  %p2902_p7 = scmp.lt.s32.totalorder %s2896_s29, %s2896_s29 }
  0x30   :  { %p2903_p8 = por %p2902_p7, %p2901_p6 }
  0x32   :  { %p2904_p9 = pnand %p2903_p8, %p2897_p5 }
  0x34   :  { %2907 = shalt.err (!%p2904_p9)
}
  0x35   :  { %s3033_s3 = smov 256   ;;  %s3034_s28 = smov 16  }
  0x36   :  { %98 = dma.hbm_to_vmem [thread:$0]  %s3504_s9, 4096, %s93_s19, [#allocation13], %s3033_s3, %s3033_s3, %s3034_s28  }
  0x37   :  { %s3035_s15 = smov [#allocation3]   ;;  %s2908_s17 = scalar_lea.hbm %s3495_s0, 256 }
  0x38   :  { %s28_s1 = sshll.u32 %s3035_s15, 4  ;;  %p2909_p10 = scmp.ne.s32.totalorder %s3495_s0, %s2908_s17  ;;  %s29_s1 = int_to_ptr.vmem [resolvable:$true] %s28_s1 }
  0x39   :  { %p2912_p11 = scmp.lt.u32.totalorder %s2908_s17, %s3495_s0 }
  0x3b   :  { %p2914_p12 = pnand %p2912_p11, %p2909_p10 }
  0x3d   :  { %2917 = shalt.err (!%p2914_p12)
}
  0x3e   :  { %s2918_s23 = scalar_lea.vmem %s29_s1, 256  ;;  %p2923_p0 = scmp.lt.s32.totalorder %s29_s1, %s29_s1 }
  0x3f   :  { %p2919_p13 = scmp.ne.s32.totalorder %s29_s1, %s2918_s23  ;;  %p2924_p1 = scmp.lt.s32.totalorder %s2918_s23, %s2918_s23 }
  0x41   :  { %p2925_p2 = por %p2924_p1, %p2923_p0 }
  0x43   :  { %p2926_p3 = pnand %p2925_p2, %p2919_p13 }
  0x45   :  { %2929 = shalt.err (!%p2926_p3)
}
  0x46   :  { %s3036_s9 = smov 128   ;;  %s3037_s19 = smov 8  }
  0x47   :  { %34 = dma.hbm_to_vmem [thread:$0]  %s3495_s0, 256, %s29_s1, [#allocation4], %s3036_s9, %s3036_s9, %s3037_s19  }
  0x48   :  { %s3038_s27 = smov [#allocation8]   ;;  %s3039_s3 = smov [#allocation11]  }
  0x49   :  { %s51_s29 = sshll.u32 %s3038_s27, 4  ;;  %s74_s28 = sshll.u32 %s3039_s3, 4  ;;  %s52_s29 = int_to_ptr.vmem [resolvable:$true] %s51_s29  ;;  %s3177_s28 = int_to_ptr.vmem [resolvable:$true] %s74_s28 }
  0x4a   :  { %s2930_s15 = scalar_lea.hbm %s3497_s2, 16 }
  0x4b   :  { %p2931_p4 = scmp.ne.s32.totalorder %s3497_s2, %s2930_s15  ;;  %p2934_p5 = scmp.lt.u32.totalorder %s2930_s15, %s3497_s2 }
  0x4d   :  { %p2936_p6 = pnand %p2934_p5, %p2931_p4 }
  0x4f   :  { %2939 = shalt.err (!%p2936_p6)
}
  0x50   :  { %s2940_s0 = scalar_lea.vmem %s52_s29, 16  ;;  %s2944_s1 = scalar_lea.vmem %s52_s29, 32 }
  0x51   :  { %p2941_p7 = scmp.ne.s32.totalorder %s52_s29, %s2940_s0  ;;  %p2945_p8 = scmp.lt.s32.totalorder %s52_s29, %s52_s29 }
  0x52   :  { %p2946_p9 = scmp.lt.s32.totalorder %s2944_s1, %s2940_s0 }
  0x54   :  { %p2947_p10 = por %p2946_p9, %p2945_p8 }
  0x56   :  { %p2948_p11 = pnand %p2947_p10, %p2941_p7 }
  0x58   :  { %2951 = shalt.err (!%p2948_p11)
}
  0x59   :  { %54 = dma.hbm_to_vmem [thread:$0]  %s3497_s2, 16, %s52_s29, [#allocation7]  }
  0x5a   :  { %s2952_s24 = scalar_lea.hbm %s3500_s5, 1024 }
  0x5b   :  { %p2953_p12 = scmp.ne.s32.totalorder %s3500_s5, %s2952_s24  ;;  %p2956_p13 = scmp.lt.u32.totalorder %s2952_s24, %s3500_s5 }
  0x5d   :  { %p2958_p0 = pnand %p2956_p13, %p2953_p12 }
  0x5f   :  { %2961 = shalt.err (!%p2958_p0)
}
  0x60   :  { %s2962_s14 = scalar_lea.vmem %s3177_s28, 1024  ;;  %p2967_p2 = scmp.lt.s32.totalorder %s3177_s28, %s3177_s28 }
  0x61   :  { %p2963_p1 = scmp.ne.s32.totalorder %s3177_s28, %s2962_s14  ;;  %p2968_p3 = scmp.lt.s32.totalorder %s2962_s14, %s2962_s14 }
  0x63   :  { %p2969_p4 = por %p2968_p3, %p2967_p2 }
  0x65   :  { %p2970_p5 = pnand %p2969_p4, %p2963_p1 }
  0x67   :  { %2973 = shalt.err (!%p2970_p5)
}
  0x68   :  { %s3040_s2 = smov 64   ;;  %s3041_s29 = smov 4  }
  0x69   :  { %80 = dma.hbm_to_vmem [thread:$0]  %s3500_s5, 1024, %s3177_s28, [#allocation10], %s3040_s2, %s3040_s2, %s3041_s29  }
  0x6a   :  { %s3042_s16 = smov [#allocation14]   ;;  %s2974_s1 = scalar_lea.hbm %s3506_s11, 4096 }
  0x6b   :  { %s106_s17 = sshll.u32 %s3042_s16, 4  ;;  %p2975_p6 = scmp.ne.s32.totalorder %s3506_s11, %s2974_s1  ;;  %s107_s17 = int_to_ptr.vmem [resolvable:$true] %s106_s17 }
  0x6c   :  { %p2978_p7 = scmp.lt.u32.totalorder %s2974_s1, %s3506_s11 }
  0x6e   :  { %p2980_p8 = pnand %p2978_p7, %p2975_p6 }
  0x70   :  { %2983 = shalt.err (!%p2980_p8)
}
  0x71   :  { %s2984_s24 = scalar_lea.vmem %s107_s17, 4096  ;;  %p2989_p10 = scmp.lt.s32.totalorder %s107_s17, %s107_s17 }
  0x72   :  { %p2985_p9 = scmp.ne.s32.totalorder %s107_s17, %s2984_s24  ;;  %p2990_p11 = scmp.lt.s32.totalorder %s2984_s24, %s2984_s24 }
  0x74   :  { %p2991_p12 = por %p2990_p11, %p2989_p10 }
  0x76   :  { %p2992_p13 = pnand %p2991_p12, %p2985_p9 }
  0x78   :  { %2995 = shalt.err (!%p2992_p13)
}
  0x79   :  { %112 = dma.hbm_to_vmem [thread:$0]  %s3506_s11, 4096, %s107_s17, [#allocation13], %s3040_s2, %s3040_s2, %s3041_s29  }
  0x7a   :  { %3018 = dma.done.wait [#allocation4], 256  }
  0x7b   :  { %3019 = vsyncadd [#allocation4], 4294967040 }
  0x7c   :  { %3020 = dma.done.wait [#allocation7], 32  }
  0x7d   :  { %3021 = vsyncadd [#allocation7], 4294967264 }
  0x7e   :  { %3022 = dma.done.wait [#allocation10], 4096  }
  0x7f   :  { %3023 = vsyncadd [#allocation10], 4294963200 }
  0x80   :  { %3024 = dma.done.wait [#allocation13], 8192  }
  0x81   :  { %3025 = vsyncadd [#allocation13], 4294959104  ;;  %v137_v0 = vld [vmem:[#allocation3] sm:$0xff]  ;;  %v138_v1 = vld [vmem:[#allocation3 + $0x8] sm:$0xff]  ;;  %v3043_v4 = vmov 0.0   ;;  %v3044_v30 = vmov 0   ;;  %v215_v53 = vlaneseq }
  0x82   :  { %141 = vadd.xlane.f32.xlu0 %v137_v0  ;;  %v2648_v2 = vld [vmem:[#allocation9 + $0x4] ss:$12 sps:$4 sm:$0xff]   ;;  %v2650_v3 = vld [vmem:[#allocation9] ss:$12 sps:$4 sm:$0xff]   ;;  %2491 = vmatprep.subr.bf16.mxu1 %v3043_v4  ;;  %v2651_v5 = vld [vmem:[#allocation9 + $0x8] ss:$12 sps:$4 sm:$0xff]  }
  0x83   :  { %v2652_v6 = vld [vmem:[#allocation9 + $0x1c] ss:$12 sps:$4 sm:$0xff]   ;;  %358 = vmatprep.subr.bf16.mxu0 %v2648_v2  ;;  %2492 = vmatpush3.bf16.msra.mxu1 %v2651_v5  ;;  %v2654_v15 = vld [vmem:[#allocation9 + $0x18] ss:$12 sps:$4 sm:$0xff]   ;;  %v2655_v16 = vld [vmem:[#allocation9 + $0x20] ss:$12 sps:$4 sm:$0xff]  }
  0x84   :  { %359 = vmatpush1.bf16.msra.mxu0 %v2650_v3  ;;  %2493 = vmatprep.subr.bf16.mxu1 %v3043_v4  ;;  %v2656_v17 = vld [vmem:[#allocation9 + $0x34] ss:$12 sps:$4 sm:$0xff]   ;;  %v2658_v18 = vld [vmem:[#allocation9 + $0x30] ss:$12 sps:$4 sm:$0xff]   ;;  %v2659_v19 = vld [vmem:[#allocation9 + $0x38] ss:$12 sps:$4 sm:$0xff]  }
  0x85   :  { %360 = vmatprep.subr.bf16.mxu0 %v2652_v6  ;;  %v2660_v20 = vld [vmem:[#allocation9 + $0x4c] ss:$12 sps:$4 sm:$0xff]   ;;  %v2662_v21 = vld [vmem:[#allocation9 + $0x48] ss:$12 sps:$4 sm:$0xff]   ;;  %v2663_v22 = vld [vmem:[#allocation9 + $0x50] ss:$12 sps:$4 sm:$0xff]   ;;  %390 = vmatprep.mubr.bf16.mxu0 %v3044_v30 }
  0x86   :  { %143 = vadd.xlane.f32.xlu0 %v138_v1  ;;  %v2664_v23 = vld [vmem:[#allocation9 + $0x64] ss:$12 sps:$4 sm:$0xff]   ;;  %v2666_v24 = vld [vmem:[#allocation9 + $0x60] ss:$12 sps:$4 sm:$0xff]   ;;  %v2667_v25 = vld [vmem:[#allocation9 + $0x68] ss:$12 sps:$4 sm:$0xff]  }
  0x87   :  { %2494 = vmatpush3.bf16.msra.mxu1 %v2655_v16  ;;  %v2668_v26 = vld [vmem:[#allocation9 + $0x7c] ss:$12 sps:$4 sm:$0xff]   ;;  %v2670_v27 = vld [vmem:[#allocation9 + $0x78] ss:$12 sps:$4 sm:$0xff]   ;;  %v2671_v28 = vld [vmem:[#allocation9 + $0x80] ss:$12 sps:$4 sm:$0xff]  }
  0x88   :  { %361 = vmatpush1.bf16.msra.mxu0 %v2654_v15  ;;  %2495 = vmatprep.subr.bf16.mxu1 %v3043_v4  ;;  %v2672_v29 = vld [vmem:[#allocation9 + $0x94] ss:$12 sps:$4 sm:$0xff]   ;;  %vm3045_vm0 = vmmov 0   ;;  %v2674_v31 = vld [vmem:[#allocation9 + $0x90] ss:$12 sps:$4 sm:$0xff]   ;;  %v3251_v54 = vshrl.u32 %v215_v53, 7 }
  0x89   :  { %362 = vmatprep.subr.bf16.mxu0 %v2656_v17  ;;  %2507 = vmatprep.mubr.msk.bf16.mxu1 %vm3045_vm0, %v3043_v4  ;;  %v2675_v32 = vld [vmem:[#allocation9 + $0x98] ss:$12 sps:$4 sm:$0xff]   ;;  %v2678_v34 = vld [vmem:[#allocation9 + $0xa8] ss:$12 sps:$4 sm:$0xff]   ;;  %v2679_v35 = vld [vmem:[#allocation9 + $0xb0] ss:$12 sps:$4 sm:$0xff]  }
  0x8a   :  { %v2676_v33 = vld [vmem:[#allocation9 + $0xac] ss:$12 sps:$4 sm:$0xff]   ;;  %v2271_v44 = vld [vmem:[#allocation6] ss:$0 sm:$0xff]  ;;  %v2272_v48 = vld [vmem:[#allocation8] ss:$0 sm:$0xff] }
  0x8b   :  { %2496 = vmatpush3.bf16.msra.mxu1 %v2659_v19  ;;  %v217_v55 = vsub.s32 0, %v3251_v54  ;;  %v213_v56 = vld [vmem:[%s3499_s4] sm:$0x7]  ;;  %v225_v57 = vsub.s32 2, %v3251_v54  ;;  %v221_v58 = vsub.s32 1, %v3251_v54  ;;  %vm447_vm1 = vcmask 261120  }
  0x8c   :  { %363 = vmatpush1.bf16.msra.mxu0 %v2658_v18  ;;  %2497 = vmatprep.subr.bf16.mxu1 %v3043_v4  ;;  %vm510_vm2 = vcmask 1043456   ;;  %vm494_vm3 = vcmask 64512   ;;  %s3046_s4 = smov 96   ;;  %s3047_s27 = smov 32   ;;  %vm555_vm4 = vcmask 257024   ;;  %vm1022_vm5 = vcmask 261124  }
  0x8d   :  { %364 = vmatprep.subr.bf16.mxu0 %v2660_v20  ;;  %v218_v59 = vrot.slane %v213_v56, %v217_v55  ;;  %v226_v60 = vrot.slane %v213_v56, %v225_v57  ;;  %v222_v63 = vrot.slane %v213_v56, %v221_v58  ;;  %vm675_vm6 = vcmask 519424   ;;  %s3048_s26 = smov [#allocation15]  }
  0x8e   :  { %vm792_vm7 = vcmask 781824   ;;  %vm909_vm8 = vcmask 1044224   ;;  %vm1140_vm9 = vcmask 523524   ;;  %vm1258_vm10 = vcmask 785924   ;;  %s2256_s16 = sshll.u32 %s3048_s26, 4  ;;  %s2257_s16 = int_to_ptr.vmem [resolvable:$true] %s2256_s16 }
  0x8f   :  { %2498 = vmatpush3.bf16.msra.mxu1 %v2663_v22  ;;  %vm1376_vm11 = vcmask 1048324   ;;  %p3001_p1 = scmp.lt.s32.totalorder %s2257_s16, %s2257_s16 }
  0x90   :  { %365 = vmatpush1.bf16.msra.mxu0 %v2662_v21  ;;  %2499 = vmatprep.subr.bf16.mxu1 %v3043_v4 }
  0x91   :  { %366 = vmatprep.subr.bf16.mxu0 %v2664_v23 }
  0x93   :  { %2500 = vmatpush3.bf16.msra.mxu1 %v2667_v25 }
  0x94   :  { %367 = vmatpush1.bf16.msra.mxu0 %v2666_v24  ;;  %2501 = vmatprep.subr.bf16.mxu1 %v3043_v4 }
  0x95   :  { %368 = vmatprep.subr.bf16.mxu0 %v2668_v26 }
  0x97   :  { %2502 = vmatpush3.bf16.msra.mxu1 %v2671_v28 }
  0x98   :  { %369 = vmatpush1.bf16.msra.mxu0 %v2670_v27  ;;  %2503 = vmatprep.subr.bf16.mxu1 %v3043_v4 }
  0x99   :  { %370 = vmatprep.subr.bf16.mxu0 %v2672_v29 }
  0x9b   :  { %2504 = vmatpush3.bf16.msra.mxu1 %v2675_v32 }
  0x9c   :  { %371 = vmatpush1.bf16.msra.mxu0 %v2674_v31  ;;  %2505 = vmatprep.subr.bf16.mxu1 %v3043_v4 }
  0x9d   :  { %372 = vmatprep.subr.bf16.mxu0 %v2676_v33 }
  0x9f   :  { %2506 = vmatpush3.bf16.msra.mxu1 %v2679_v35 }
  0xa0   :  { %373 = vmatpush1.bf16.msra.mxu0 %v2678_v34  ;;  %2511 = vmatprep.subr.bf16.mxu1 %v3043_v4 }
  0xa1   :  { %2535 = vmatprep.subr.bf16.mxu0 %v3043_v4 }
 0x10f   :  { %v142_v7 = vpop.xlane.xlu0 %141 }
 0x110   :  { %v146_v8 = vmul.f32 0.0078125, %v142_v7 }
 0x112   :  { %v3226_v9 = vsub.f32 %v137_v0, %v146_v8 }
 0x113   :  { %v144_v10 = vpop.xlane.xlu0 %143 }
 0x114   :  { %v147_v11 = vmul.f32 0.0078125, %v144_v10  ;;  %v150_v12 = vmul.f32 %v3226_v9, %v3226_v9 }
 0x116   :  { %v3230_v13 = vsub.f32 %v138_v1, %v147_v11  ;;  %152 = vadd.xlane.f32.xlu1 %v150_v12 }
 0x118   :  { %v151_v14 = vmul.f32 %v3230_v13, %v3230_v13 }
 0x11a   :  { %154 = vadd.xlane.f32.xlu1 %v151_v14 }
 0x1a3   :  { %v153_v36 = vpop.xlane.xlu1 %152 }
 0x1a4   :  { %v156_v37 = vmul.f32 0.0078125, %v153_v36 }
 0x1a6   :  { %v158_v38 = vadd.f32 1e-05, %v156_v37 }
 0x1a7   :  { %v155_v39 = vpop.xlane.xlu1 %154 }
 0x1a8   :  { %2768 = vrsqrt.f32 %v158_v38  ;;  %v157_v40 = vmul.f32 0.0078125, %v155_v39 }
 0x1aa   :  { %v159_v41 = vadd.f32 1e-05, %v157_v40 }
 0x1ac   :  { %2770 = vrsqrt.f32 %v159_v41 }
 0x1b2   :  { %v2769_v42 = vpop.eup %2768 }
 0x1b3   :  { %v162_v43 = vmul.f32 %v2769_v42, %v3226_v9 }
 0x1b5   :  { %v170_v47 = vmul.f32 %v2271_v44, %v162_v43 }
 0x1b6   :  { %v2771_v45 = vpop.eup %2770 }
 0x1b7   :  { %v163_v46 = vmul.f32 %v2771_v45, %v3230_v13  ;;  %v178_v50 = vadd.f32 %v2272_v48, %v170_v47 }
 0x1b9   :  { %v171_v49 = vmul.f32 %v2271_v44, %v163_v46 }
 0x1bb   :  { %v179_v51 = vadd.f32 %v2272_v48, %v171_v49 }
 0x1bd   :  { %v180_v52 = vpack.c.bf16 %v179_v51, %v178_v50 }
 0x1bf   :  { %391 = vmatmul.mubr.bf16.vlgmr.msra.gmra.mrb[0].mxu0 %v180_v52  ;;  %2508 = vmatmul.mubr.bf16.vlgmr.msra.gmra.mrb[0].mxu1 %v180_v52 }
 0x1c0   :  { %2513 = vmatprep.mubr.msk.bf16.mxu1 %vm3045_vm0, %v3043_v4  ;;  %2537 = vmatprep.mubr.msk.bf16.mxu0 %vm3045_vm0, %v3043_v4 }
 0x292   :  { %v392_v61 = vpop.f32.mrb[0].mxu0  ;;  %v435_v62 = vpop.f32.mrb[0].mxu1 }
 0x293   :  { %v393_v0 = vadd.f32 %v392_v61, %v218_v59  ;;  %v394_v1 = vpop.f32.mrb[1].mxu0  ;;  %v2509_v2 = vpop.f32.mrb[1].mxu1  ;;  %v436_v6 = vadd.f32 %v435_v62, %v226_v60 }
 0x294   :  { %v396_v3 = vpop.f32.mrb[2].mxu0  ;;  %v438_v5 = vpop.f32.mrb[2].mxu1  ;;  %v395_v11 = vadd.f32 %v394_v1, %v222_v63 }
 0x295   :  { %v397_v7 = vadd.f32 %v396_v3, %v218_v59  ;;  %v439_v8 = vadd.f32 %v438_v5, %v226_v60  ;;  %v398_v9 = vpop.f32.mrb[3].mxu0  ;;  %v2510_v10 = vpop.f32.mrb[3].mxu1  ;;  %v442_v13 = vmul.f32 0.17677669, %v393_v0 }
 0x296   :  { %v399_v12 = vadd.f32 %v398_v9, %v222_v63 }
 0x297   :  { %v443_v14 = vmul.f32 0.17677669, %v397_v7  ;;  %v3265_v15 = vpack.c.bf16 %v439_v8, %v436_v6 }
 0x298   :  { %v445_v16 = vpack.c.bf16 %v399_v12, %v395_v11 }
 0x299   :  { %v444_v17 = vpack.c.bf16 %v443_v14, %v442_v13  ;;  %v512_v19 = vsel %vm510_vm2, %v3265_v15, 0 }
 0x29a   :  { %v452_v18 = vsel %vm447_vm1, %v445_v16, 0  ;;  %v912_v25 = vrot.slane %v445_v16, 4 }
 0x29b   :  { %2512 = vmatpush3.bf16.xpose.msra.mxu1 %v452_v18  ;;  %v911_v32 = vrot.slane %v444_v17, 4 }
 0x29c   :  { %2517 = vmatprep.subr.bf16.mxu1 %v3043_v4  ;;  %v917_v46 = vsel %vm447_vm1, %v912_v25, 0 }
 0x2a2   :  { %2514 = vmatmul.mubr.msk.bf16.vlgmr.msra.gmra.mrb[4].mxu1 %vm447_vm1, %v444_v17 }
 0x2a3   :  { %2518 = vmatpush3.bf16.msra.mxu1 %v512_v19  ;;  %2519 = vmatprep.mubr.msk.bf16.mxu1 %vm3045_vm0, %v3043_v4 }
 0x2a4   :  { %2523 = vmatprep.subr.bf16.mxu1 %v3043_v4 }
 0x375   :  { %v488_v20 = vpop.f32.mrb[4].mxu1 }
 0x376   :  { %v2515_v21 = vpop.f32.mrb[5].mxu1  ;;  %v495_v22 = vsel %vm494_vm3, %v488_v20, -inf }
 0x377   :  { %496 = vmax.xlane.f32.xlu0 %v495_v22  ;;  %v491_v23 = vpop.f32.mrb[6].mxu1 }
 0x378   :  { %v2516_v24 = vpop.f32.mrb[7].mxu1 }
 0x38d   :  { %561 = vrot.lane.b32.xlu0 %v445_v16, %s3046_s4 }
 0x391   :  { %796 = vrot.lane.b32.xlu0 %v445_v16, %s3047_s27 }
 0x395   :  { %1026 = vrot.lane.b32.xlu0 %v912_v25, %s3046_s4 }
 0x399   :  { %1144 = vrot.lane.b32.xlu0 %v912_v25, %s3040_s2 }
 0x39d   :  { %1262 = vrot.lane.b32.xlu0 %v912_v25, %s3047_s27 }
 0x404   :  { %v497_v26 = vpop.xlane.xlu0 %496 }
 0x405   :  { %v498_v27 = vsub.f32 %v488_v20, %v497_v26 }
 0x407   :  { %v499_v28 = vmul.f32 1.442695, %v498_v27 }
 0x408   :  { %v562_v35 = vpop.permute.xlu0 %561 }
 0x409   :  { %2772 = vpow2.f32 %v499_v28  ;;  %v567_v42 = vsel %vm447_vm1, %v562_v35, 0 }
 0x40c   :  { %v797_v40 = vpop.permute.xlu0 %796 }
 0x40d   :  { %v802_v44 = vsel %vm447_vm1, %v797_v40, 0 }
 0x410   :  { %v1027_v47 = vpop.permute.xlu0 %1026 }
 0x411   :  { %v1032_v48 = vsel %vm447_vm1, %v1027_v47, 0 }
 0x413   :  { %v2773_v29 = vpop.eup %2772 }
 0x414   :  { %v501_v31 = vsel %vm494_vm3, %v2773_v29, 0.0  ;;  %v1145_v49 = vpop.permute.xlu0 %1144 }
 0x415   :  { %502 = vadd.xlane.f32.xlu1 %v501_v31  ;;  %v1150_v51 = vsel %vm447_vm1, %v1145_v49, 0 }
 0x418   :  { %v1263_v52 = vpop.permute.xlu0 %1262 }
 0x419   :  { %v1268_v56 = vsel %vm447_vm1, %v1263_v52, 0 }
 0x426   :  { %558 = vrot.lane.b32.xlu1 %v444_v17, %s3046_s4 }
 0x42a   :  { %679 = vrot.lane.b32.xlu1 %v445_v16, %s3040_s2 }
 0x42e   :  { %677 = vrot.lane.b32.xlu1 %v444_v17, %s3040_s2 }
 0x432   :  { %794 = vrot.lane.b32.xlu1 %v444_v17, %s3047_s27 }
 0x436   :  { %1024 = vrot.lane.b32.xlu1 %v911_v32, %s3046_s4 }
 0x43a   :  { %1142 = vrot.lane.b32.xlu1 %v911_v32, %s3040_s2 }
 0x43e   :  { %1260 = vrot.lane.b32.xlu1 %v911_v32, %s3047_s27 }
 0x4a2   :  { %v503_v33 = vpop.xlane.xlu1 %502 }
 0x4a3   :  { %2774 = vrcp.f32 %v503_v33 }
 0x4a6   :  { %v559_v34 = vpop.permute.xlu1 %558 }
 0x4aa   :  { %v680_v36 = vpop.permute.xlu1 %679 }
 0x4ab   :  { %v685_v37 = vsel %vm447_vm1, %v680_v36, 0 }
 0x4ac   :  { %2536 = vmatpush3.bf16.xpose.msra.mxu0 %v685_v37 }
 0x4ad   :  { %v2775_v38 = vpop.eup %2774  ;;  %2547 = vmatprep.subr.bf16.mxu0 %v3043_v4 }
 0x4ae   :  { %v505_v39 = vmul.f32 %v2775_v38, %v2773_v29  ;;  %v678_v43 = vpop.permute.xlu1 %677 }
 0x4b0   :  { %v506_v41 = vpack.c.bf16 %v505_v39, %v505_v39 }
 0x4b2   :  { %2520 = vmatmul.mubr.msk.bf16.vlgmr.msra.gmra.mrb[8].mxu1 %vm494_vm3, %v506_v41  ;;  %v795_v45 = vpop.permute.xlu1 %794 }
 0x4b3   :  { %2524 = vmatpush3.bf16.xpose.msra.mxu1 %v567_v42  ;;  %2538 = vmatmul.mubr.msk.bf16.vlgmr.msra.gmra.mrb[4].mxu0 %vm447_vm1, %v678_v43 }
 0x4b4   :  { %2548 = vmatpush3.bf16.xpose.msra.mxu0 %v802_v44  ;;  %2525 = vmatprep.mubr.msk.bf16.mxu1 %vm3045_vm0, %v3043_v4 }
 0x4b5   :  { %2549 = vmatprep.mubr.msk.bf16.mxu0 %vm3045_vm0, %v3043_v4  ;;  %2559 = vmatprep.subr.bf16.mxu0 %v3043_v4 }
 0x4b6   :  { %2529 = vmatprep.subr.bf16.mxu1 %v3043_v4  ;;  %v1025_v50 = vpop.permute.xlu1 %1024 }
 0x4ba   :  { %2526 = vmatmul.mubr.msk.bf16.vlgmr.msra.gmra.mrb[12].mxu1 %vm447_vm1, %v559_v34  ;;  %v1143_v53 = vpop.permute.xlu1 %1142 }
 0x4bb   :  { %2550 = vmatmul.mubr.msk.bf16.vlgmr.msra.gmra.mrb[8].mxu0 %vm447_vm1, %v795_v45  ;;  %2531 = vmatprep.mubr.msk.bf16.mxu1 %vm3045_vm0, %v3043_v4 }
 0x4bc   :  { %2560 = vmatpush3.bf16.xpose.msra.mxu0 %v917_v46  ;;  %2561 = vmatprep.mubr.msk.bf16.mxu0 %vm3045_vm0, %v3043_v4 }
 0x4bd   :  { %2571 = vmatprep.subr.bf16.mxu0 %v3043_v4 }
 0x4be   :  { %v1261_v59 = vpop.permute.xlu1 %1260 }
 0x4c3   :  { %2562 = vmatmul.mubr.msk.bf16.vlgmr.msra.gmra.mrb[12].mxu0 %vm447_vm1, %v911_v32 }
 0x4c4   :  { %2572 = vmatpush3.bf16.xpose.msra.mxu0 %v1032_v48  ;;  %2573 = vmatprep.mubr.msk.bf16.mxu0 %vm3045_vm0, %v3043_v4 }
 0x4c5   :  { %2583 = vmatprep.subr.bf16.mxu0 %v3043_v4 }
 0x4cb   :  { %2574 = vmatmul.mubr.msk.bf16.vlgmr.msra.gmra.mrb[16].mxu0 %vm447_vm1, %v1025_v50 }
 0x4cc   :  { %2584 = vmatpush3.bf16.xpose.msra.mxu0 %v1150_v51  ;;  %2585 = vmatprep.mubr.msk.bf16.mxu0 %vm3045_vm0, %v3043_v4 }
 0x4cd   :  { %2595 = vmatprep.subr.bf16.mxu0 %v3043_v4 }
 0x4d3   :  { %2586 = vmatmul.mubr.msk.bf16.vlgmr.msra.gmra.mrb[20].mxu0 %vm447_vm1, %v1143_v53 }
 0x4d4   :  { %2596 = vmatpush3.bf16.xpose.msra.mxu0 %v1268_v56  ;;  %2597 = vmatprep.mubr.msk.bf16.mxu0 %vm3045_vm0, %v3043_v4 }
 0x4d5   :  { %2607 = vmatprep.subr.bf16.mxu0 %v3043_v4 }
 0x4db   :  { %2598 = vmatmul.mubr.msk.bf16.vlgmr.msra.gmra.mrb[24].mxu0 %vm447_vm1, %v1261_v59 }
 0x4dc   :  { %2623 = vmatprep.mubr.msk.bf16.mxu0 %vm3045_vm0, %v3043_v4 }
 0x585   :  { %v548_v60 = vpop.f32.mrb[8].mxu1 }
 0x586   :  { %v554_v61 = vpack.c.bf16 %v548_v60, %v548_v60  ;;  %v2521_v62 = vpop.f32.mrb[9].mxu1  ;;  %v721_v63 = vpop.f32.mrb[4].mxu0 }
 0x587   :  { %v551_v0 = vpop.f32.mrb[10].mxu1  ;;  %v2539_v1 = vpop.f32.mrb[5].mxu0  ;;  %v727_v2 = vsel %vm494_vm3, %v721_v63, -inf }
 0x588   :  { %556 = vst.msk [vmem:[#allocation2] sm:$0xf] %vm555_vm4, %v554_v61  ;;  %728 = vmax.xlane.f32.xlu1 %v727_v2  ;;  %v2522_v3 = vpop.f32.mrb[11].mxu1  ;;  %v724_v5 = vpop.f32.mrb[6].mxu0 }
 0x589   :  { %v2540_v6 = vpop.f32.mrb[7].mxu0 }
 0x58d   :  { %v603_v7 = vpop.f32.mrb[12].mxu1 }
 0x58e   :  { %v2527_v8 = vpop.f32.mrb[13].mxu1  ;;  %v838_v9 = vpop.f32.mrb[8].mxu0  ;;  %v609_v10 = vsel %vm494_vm3, %v603_v7, -inf }
 0x58f   :  { %v2551_v11 = vpop.f32.mrb[9].mxu0  ;;  %610 = vmax.xlane.f32.xlu0 %v609_v10  ;;  %v606_v12 = vpop.f32.mrb[14].mxu1  ;;  %v844_v17 = vsel %vm494_vm3, %v838_v9, -inf }
 0x590   :  { %v2528_v13 = vpop.f32.mrb[15].mxu1  ;;  %v841_v14 = vpop.f32.mrb[10].mxu0 }
 0x591   :  { %v2552_v16 = vpop.f32.mrb[11].mxu0 }
 0x592   :  { %v971_v16 = vrot.slane %v3265_v15, 4 }
 0x593   :  { %845 = vmax.xlane.f32.xlu0 %v844_v17 }
 0x596   :  { %v953_v18 = vpop.f32.mrb[12].mxu0 }
 0x597   :  { %v2563_v19 = vpop.f32.mrb[13].mxu0  ;;  %v959_v20 = vsel %vm494_vm3, %v953_v18, -inf }
 0x598   :  { %v956_v21 = vpop.f32.mrb[14].mxu0  ;;  %960 = vmax.xlane.f32.xlu0 %v959_v20 }
 0x599   :  { %v2564_v22 = vpop.f32.mrb[15].mxu0 }
 0x59e   :  { %v1068_v23 = vpop.f32.mrb[16].mxu0 }
 0x59f   :  { %v2575_v24 = vpop.f32.mrb[17].mxu0  ;;  %v1074_v25 = vsel %vm494_vm3, %v1068_v23, -inf }
 0x5a0   :  { %v1071_v26 = vpop.f32.mrb[18].mxu0  ;;  %1075 = vmax.xlane.f32.xlu0 %v1074_v25 }
 0x5a1   :  { %v2576_v27 = vpop.f32.mrb[19].mxu0 }
 0x5a6   :  { %v1186_v28 = vpop.f32.mrb[20].mxu0 }
 0x5a7   :  { %v2587_v29 = vpop.f32.mrb[21].mxu0  ;;  %v1192_v31 = vsel %vm494_vm3, %v1186_v28, -inf }
 0x5a8   :  { %1193 = vmax.xlane.f32.xlu1 %v1192_v31  ;;  %v1189_v32 = vpop.f32.mrb[22].mxu0 }
 0x5a9   :  { %v2588_v33 = vpop.f32.mrb[23].mxu0 }
 0x5ae   :  { %v1304_v34 = vpop.f32.mrb[24].mxu0 }
 0x5af   :  { %v2599_v35 = vpop.f32.mrb[25].mxu0  ;;  %v1310_v36 = vsel %vm494_vm3, %v1304_v34, -inf }
 0x5b0   :  { %v1307_v37 = vpop.f32.mrb[26].mxu0  ;;  %1311 = vmax.xlane.f32.xlu0 %v1310_v36 }
 0x5b1   :  { %v2600_v38 = vpop.f32.mrb[27].mxu0 }
 0x5b2   :  { %v976_v38 = vsel %vm510_vm2, %v971_v16, 0 }
 0x615   :  { %v729_v39 = vpop.xlane.xlu1 %728 }
 0x616   :  { %v730_v40 = vsub.f32 %v721_v63, %v729_v39 }
 0x618   :  { %v731_v41 = vmul.f32 1.442695, %v730_v40 }
 0x61a   :  { %2776 = vpow2.f32 %v731_v41 }
 0x61c   :  { %v611_v42 = vpop.xlane.xlu0 %610 }
 0x61d   :  { %v612_v43 = vsub.f32 %v603_v7, %v611_v42 }
 0x61f   :  { %v613_v46 = vmul.f32 1.442695, %v612_v43 }
 0x620   :  { %v846_v44 = vpop.xlane.xlu0 %845 }
 0x621   :  { %v847_v45 = vsub.f32 %v838_v9, %v846_v44 }
 0x623   :  { %v848_v47 = vmul.f32 1.442695, %v847_v45 }
 0x624   :  { %v3334_v48 = vpop.eup %2776 }
 0x625   :  { %2778 = vpow2.f32 %v848_v47  ;;  %v961_v49 = vpop.xlane.xlu0 %960  ;;  %v733_v50 = vsel %vm494_vm3, %v3334_v48, 0.0 }
 0x626   :  { %v962_v51 = vsub.f32 %v953_v18, %v961_v49  ;;  %734 = vadd.xlane.f32.xlu0 %v733_v50  ;;  %2780 = vpow2.f32 %v613_v46 }
 0x628   :  { %v963_v52 = vmul.f32 1.442695, %v962_v51 }
 0x62a   :  { %2782 = vpow2.f32 %v963_v52 }
 0x62d   :  { %v1076_v53 = vpop.xlane.xlu0 %1075 }
 0x62e   :  { %v1077_v56 = vsub.f32 %v1068_v23, %v1076_v53 }
 0x62f   :  { %v3338_v59 = vpop.eup %2778 }
 0x630   :  { %v1078_v60 = vmul.f32 1.442695, %v1077_v56  ;;  %v850_v61 = vsel %vm494_vm3, %v3338_v59, 0.0  ;;  %v2781_v62 = vpop.eup %2780 }
 0x631   :  { %851 = vadd.xlane.f32.xlu1 %v850_v61  ;;  %v615_v0 = vsel %vm494_vm3, %v2781_v62, 0.0 }
 0x632   :  { %2784 = vpow2.f32 %v1078_v60 }
 0x634   :  { %v3342_v63 = vpop.eup %2782 }
 0x635   :  { %616 = vadd.xlane.f32.xlu1 %v615_v0  ;;  %v965_v1 = vsel %vm494_vm3, %v3342_v63, 0.0  ;;  %v1194_v5 = vpop.xlane.xlu1 %1193 }
 0x636   :  { %966 = vadd.xlane.f32.xlu0 %v965_v1  ;;  %v1195_v6 = vsub.f32 %v1186_v28, %v1194_v5 }
 0x638   :  { %v1196_v7 = vmul.f32 1.442695, %v1195_v6 }
 0x63a   :  { %2786 = vpow2.f32 %v1196_v7 }
 0x63c   :  { %v3347_v2 = vpop.eup %2784 }
 0x63d   :  { %v1080_v3 = vsel %vm494_vm3, %v3347_v2, 0.0  ;;  %v1312_v8 = vpop.xlane.xlu0 %1311 }
 0x63e   :  { %1081 = vadd.xlane.f32.xlu0 %v1080_v3  ;;  %v1313_v9 = vsub.f32 %v1304_v34, %v1312_v8  ;;  %v2680_v3 = vld [vmem:[#allocation11] sm:$0xff]  }
 0x63f   :  { %2608 = vmatpush3.bf16.msra.mxu0 %v2680_v3 }
 0x640   :  { %v1314_v10 = vmul.f32 1.442695, %v1313_v9  ;;  %2609 = vmatprep.subr.bf16.mxu0 %v3043_v4 }
 0x642   :  { %2788 = vpow2.f32 %v1314_v10 }
 0x644   :  { %v3357_v11 = vpop.eup %2786 }
 0x645   :  { %v1198_v12 = vsel %vm494_vm3, %v3357_v11, 0.0 }
 0x646   :  { %622 = vrot.lane.b32.xlu1 %v3265_v15, %s3046_s4 }
 0x64c   :  { %v3361_v13 = vpop.eup %2788 }
 0x64d   :  { %v1316_v14 = vsel %vm494_vm3, %v3361_v13, 0.0 }
 0x654   :  { %739 = vrot.lane.b32.xlu0 %v3265_v15, %s3040_s2 }
 0x658   :  { %856 = vrot.lane.b32.xlu0 %v3265_v15, %s3047_s27 }
 0x66a   :  { %1199 = vadd.xlane.f32.xlu1 %v1198_v12 }
 0x677   :  { %1317 = vadd.xlane.f32.xlu0 %v1316_v14 }
 0x67b   :  { %1086 = vrot.lane.b32.xlu1 %v971_v16, %s3046_s4 }
 0x67f   :  { %1322 = vrot.lane.b32.xlu1 %v971_v16, %s3047_s27 }
 0x68d   :  { %1204 = vrot.lane.b32.xlu0 %v971_v16, %s3040_s2 }
 0x6b3   :  { %v735_v19 = vpop.xlane.xlu0 %734 }
 0x6be   :  { %v852_v17 = vpop.xlane.xlu1 %851 }
 0x6c2   :  { %v617_v18 = vpop.xlane.xlu1 %616 }
 0x6c3   :  { %2790 = vrcp.f32 %v617_v18  ;;  %v967_v21 = vpop.xlane.xlu0 %966 }
 0x6c4   :  { %2792 = vrcp.f32 %v735_v19 }
 0x6c5   :  { %2794 = vrcp.f32 %v852_v17 }
 0x6c6   :  { %v623_v20 = vpop.permute.xlu1 %622  ;;  %2796 = vrcp.f32 %v967_v21 }
 0x6c7   :  { %v628_v22 = vsel %vm510_vm2, %v623_v20, 0 }
 0x6c8   :  { %2530 = vmatpush3.bf16.msra.mxu1 %v628_v22  ;;  %v2681_v22 = vld [vmem:[#allocation11 + $0x8] sm:$0xff]  }
 0x6c9   :  { %2541 = vmatprep.subr.bf16.mxu1 %v3043_v4  ;;  %2610 = vmatpush3.bf16.msra.mxu0 %v2681_v22  ;;  %v2705_v22 = vld [vmem:[#allocation12 + $0x4c] ss:$16 sps:$4 sm:$0xff]  }
 0x6ca   :  { %2611 = vmatprep.subr.bf16.mxu0 %v3043_v4 }
 0x6cb   :  { %v1082_v23 = vpop.xlane.xlu0 %1081 }
 0x6cc   :  { %2798 = vrcp.f32 %v1082_v23  ;;  %v2682_v23 = vld [vmem:[#allocation11 + $0x10] sm:$0xff]  }
 0x6cd   :  { %v2791_v15 = vpop.eup %2790  ;;  %2612 = vmatpush3.bf16.msra.mxu0 %v2682_v23  ;;  %v2700_v23 = vld [vmem:[#allocation12 + $0x40] ss:$16 sps:$4 sm:$0xff]  }
 0x6ce   :  { %v619_v24 = vmul.f32 %v2791_v15, %v2781_v62  ;;  %v2793_v28 = vpop.eup %2792  ;;  %v2683_v15 = vld [vmem:[#allocation11 + $0x18] sm:$0xff]   ;;  %2613 = vmatprep.subr.bf16.mxu0 %v3043_v4 }
 0x6cf   :  { %v740_v25 = vpop.permute.xlu0 %739  ;;  %v737_v29 = vmul.f32 %v2793_v28, %v3334_v48  ;;  %v2795_v33 = vpop.eup %2794 }
 0x6d0   :  { %v745_v26 = vsel %vm510_vm2, %v740_v25, 0  ;;  %v620_v27 = vpack.c.bf16 %v619_v24, %v619_v24  ;;  %v854_v35 = vmul.f32 %v2795_v33, %v3338_v59  ;;  %v2797_v37 = vpop.eup %2796 }
 0x6d1   :  { %v738_v32 = vpack.c.bf16 %v737_v29, %v737_v29  ;;  %v969_v39 = vmul.f32 %v2797_v37, %v3342_v63  ;;  %2614 = vmatpush3.bf16.msra.mxu0 %v2683_v15  ;;  %v2703_v15 = vld [vmem:[#allocation12 + $0x48] ss:$16 sps:$4 sm:$0xff]  }
 0x6d2   :  { %2532 = vmatmul.mubr.msk.bf16.vlgmr.msra.gmra.mrb[16].mxu1 %vm494_vm3, %v620_v27  ;;  %v855_v36 = vpack.c.bf16 %v854_v35, %v854_v35  ;;  %2615 = vmatprep.subr.bf16.mxu0 %v3043_v4 }
 0x6d3   :  { %2542 = vmatpush3.bf16.msra.mxu1 %v745_v26  ;;  %2543 = vmatprep.mubr.msk.bf16.mxu1 %vm3045_vm0, %v3043_v4  ;;  %v857_v31 = vpop.permute.xlu0 %856  ;;  %v970_v40 = vpack.c.bf16 %v969_v39, %v969_v39 }
 0x6d4   :  { %2553 = vmatprep.subr.bf16.mxu1 %v3043_v4  ;;  %v862_v34 = vsel %vm510_vm2, %v857_v31, 0  ;;  %v2684_v31 = vld [vmem:[#allocation11 + $0x20] sm:$0xff]  }
 0x6d5   :  { %2616 = vmatpush3.bf16.msra.mxu0 %v2684_v31  ;;  %v2712_v31 = vld [vmem:[#allocation12 + $0x80] ss:$16 sps:$4 sm:$0xff]  }
 0x6d6   :  { %v2799_v41 = vpop.eup %2798  ;;  %2617 = vmatprep.subr.bf16.mxu0 %v3043_v4 }
 0x6d7   :  { %v1084_v43 = vmul.f32 %v2799_v41, %v3347_v2 }
 0x6d9   :  { %v1085_v46 = vpack.c.bf16 %v1084_v43, %v1084_v43 }
 0x6da   :  { %2544 = vmatmul.mubr.msk.bf16.vlgmr.msra.gmra.mrb[20].mxu1 %vm494_vm3, %v738_v32  ;;  %v2685_v32 = vld [vmem:[#allocation11 + $0x28] sm:$0xff]  }
 0x6db   :  { %2554 = vmatpush3.bf16.msra.mxu1 %v862_v34  ;;  %2555 = vmatprep.mubr.msk.bf16.mxu1 %vm3045_vm0, %v3043_v4  ;;  %v2686_v34 = vld [vmem:[#allocation11 + $0x30] sm:$0xff]  }
 0x6dc   :  { %2565 = vmatprep.subr.bf16.mxu1 %v3043_v4  ;;  %2618 = vmatpush3.bf16.msra.mxu0 %v2685_v32  ;;  %v2715_v32 = vld [vmem:[#allocation12 + $0x88] ss:$16 sps:$4 sm:$0xff]  }
 0x6dd   :  { %2619 = vmatprep.subr.bf16.mxu0 %v3043_v4 }
 0x6e0   :  { %2620 = vmatpush3.bf16.msra.mxu0 %v2686_v34  ;;  %v2723_v34 = vld [vmem:[#allocation12 + $0xac] ss:$16 sps:$4 sm:$0xff]  }
 0x6e1   :  { %2621 = vmatprep.subr.bf16.mxu0 %v3043_v4 }
 0x6e2   :  { %2556 = vmatmul.mubr.msk.bf16.vlgmr.msra.gmra.mrb[24].mxu1 %vm494_vm3, %v855_v36 }
 0x6e3   :  { %2566 = vmatpush3.bf16.msra.mxu1 %v976_v38  ;;  %2567 = vmatprep.mubr.msk.bf16.mxu1 %vm3045_vm0, %v3043_v4  ;;  %v2687_v38 = vld [vmem:[#allocation11 + $0x38] sm:$0xff]  }
 0x6e4   :  { %2577 = vmatprep.subr.bf16.mxu1 %v3043_v4  ;;  %2622 = vmatpush3.bf16.msra.mxu0 %v2687_v38  ;;  %v2729_v38 = vld [vmem:[#allocation12 + $0xcc] ss:$16 sps:$4 sm:$0xff]  }
 0x6ea   :  { %2568 = vmatmul.mubr.msk.bf16.vlgmr.msra.gmra.mrb[28].mxu1 %vm494_vm3, %v970_v40 }
 0x6eb   :  { %2579 = vmatprep.mubr.msk.bf16.mxu1 %vm3045_vm0, %v3043_v4 }
 0x6f7   :  { %v1200_v42 = vpop.xlane.xlu1 %1199 }
 0x6f8   :  { %2800 = vrcp.f32 %v1200_v42 }
 0x6fb   :  { %v1087_v44 = vpop.permute.xlu1 %1086 }
 0x6fc   :  { %v1092_v45 = vsel %vm510_vm2, %v1087_v44, 0 }
 0x6fd   :  { %2578 = vmatpush3.bf16.msra.mxu1 %v1092_v45 }
 0x6fe   :  { %2589 = vmatprep.subr.bf16.mxu1 %v3043_v4 }
 0x6ff   :  { %v1323_v52 = vpop.permute.xlu1 %1322 }
 0x700   :  { %2580 = vmatmul.mubr.msk.bf16.vlgmr.msra.gmra.mrb[32].mxu1 %vm494_vm3, %v1085_v46  ;;  %v1328_v56 = vsel %vm510_vm2, %v1323_v52, 0 }
 0x701   :  { %2591 = vmatprep.mubr.msk.bf16.mxu1 %vm3045_vm0, %v3043_v4 }
 0x702   :  { %v2801_v47 = vpop.eup %2800 }
 0x703   :  { %v1202_v49 = vmul.f32 %v2801_v47, %v3357_v11 }
 0x704   :  { %v1318_v48 = vpop.xlane.xlu0 %1317 }
 0x705   :  { %2802 = vrcp.f32 %v1318_v48  ;;  %v1203_v53 = vpack.c.bf16 %v1202_v49, %v1202_v49 }
 0x708   :  { %v1205_v50 = vpop.permute.xlu0 %1204 }
 0x709   :  { %v1210_v51 = vsel %vm510_vm2, %v1205_v50, 0 }
 0x70a   :  { %2590 = vmatpush3.bf16.msra.mxu1 %v1210_v51 }
 0x70b   :  { %2601 = vmatprep.subr.bf16.mxu1 %v3043_v4 }
 0x70d   :  { %2592 = vmatmul.mubr.msk.bf16.vlgmr.msra.gmra.mrb[36].mxu1 %vm494_vm3, %v1203_v53  ;;  %v2313_v53 = vld [vmem:[%s3501_s6] ss:$0 sm:$0xff] }
 0x70e   :  { %2602 = vmatpush3.bf16.msra.mxu1 %v1328_v56  ;;  %2603 = vmatprep.mubr.msk.bf16.mxu1 %vm3045_vm0, %v3043_v4 }
 0x70f   :  { %v2803_v59 = vpop.eup %2802 }
 0x710   :  { %v1320_v60 = vmul.f32 %v2803_v59, %v3361_v13 }
 0x712   :  { %v1321_v61 = vpack.c.bf16 %v1320_v60, %v1320_v60 }
 0x715   :  { %2604 = vmatmul.mubr.msk.bf16.vlgmr.msra.gmra.mrb[40].mxu1 %vm494_vm3, %v1321_v61 }
 0x716   :  { %1780 = vmatprep.mubr.bf16.mxu1 %v3044_v30 }
 0x7a5   :  { %v664_v62 = vpop.f32.mrb[16].mxu1 }
 0x7a6   :  { %v670_v63 = vpack.c.bf16 %v664_v62, %v664_v62  ;;  %v2533_v0 = vpop.f32.mrb[17].mxu1  ;;  %v2840_v62 = vld [vmem:[#allocation3] sm:$0xff] }
 0x7a7   :  { %v667_v1 = vpop.f32.mrb[18].mxu1 }
 0x7a8   :  { %672 = vrot.lane.b32.xlu1 %v670_v63, %s3047_s27  ;;  %v2534_v2 = vpop.f32.mrb[19].mxu1 }
 0x7a9   :  { %v2841_v2 = vld [vmem:[#allocation3 + $0x8] sm:$0xff] }
 0x7ad   :  { %v781_v5 = vpop.f32.mrb[20].mxu1 }
 0x7ae   :  { %v787_v6 = vpack.c.bf16 %v781_v5, %v781_v5  ;;  %v2545_v7 = vpop.f32.mrb[21].mxu1  ;;  %v2690_v5 = vld [vmem:[#allocation12 + $0x4] ss:$16 sps:$4 sm:$0xff]  }
 0x7af   :  { %v784_v8 = vpop.f32.mrb[22].mxu1  ;;  %v2693_v7 = vld [vmem:[#allocation12 + $0xc] ss:$16 sps:$4 sm:$0xff]   ;;  %1748 = vmatprep.subr.bf16.mxu1 %v2690_v5  ;;  %v2738_v5 = vld [vmem:[#allocation14] sm:$0xff]  }
 0x7b0   :  { %789 = vrot.lane.b32.xlu1 %v787_v6, %s3040_s2  ;;  %v2546_v9 = vpop.f32.mrb[23].mxu1  ;;  %v2691_v6 = vld [vmem:[#allocation12 + $0x8] ss:$16 sps:$4 sm:$0xff]   ;;  %v2696_v8 = vld [vmem:[#allocation12 + $0x24] ss:$16 sps:$4 sm:$0xff]   ;;  %1791 = vmatprep.subr.bf16.mxu0 %v2693_v7 }
 0x7b1   :  { %v2699_v9 = vld [vmem:[#allocation12 + $0x2c] ss:$16 sps:$4 sm:$0xff]  }
 0x7b2   :  { %v2740_v7 = vld [vmem:[#allocation14 + $0x48] sm:$0xff]  }
 0x7b5   :  { %v898_v10 = vpop.f32.mrb[24].mxu1 }
 0x7b6   :  { %v904_v11 = vpack.c.bf16 %v898_v10, %v898_v10  ;;  %v2557_v12 = vpop.f32.mrb[25].mxu1  ;;  %v2694_v10 = vld [vmem:[#allocation12 + $0x20] ss:$16 sps:$4 sm:$0xff]  }
 0x7b7   :  { %v901_v13 = vpop.f32.mrb[26].mxu1 }
 0x7b8   :  { %906 = vrot.lane.b32.xlu0 %v904_v11, %s3046_s4  ;;  %v2558_v14 = vpop.f32.mrb[27].mxu1  ;;  %v2697_v11 = vld [vmem:[#allocation12 + $0x28] ss:$16 sps:$4 sm:$0xff]  }
 0x7bd   :  { %v1012_v16 = vpop.f32.mrb[28].mxu1 }
 0x7be   :  { %v1018_v17 = vpack.c.bf16 %v1012_v16, %v1012_v16  ;;  %v2569_v18 = vpop.f32.mrb[29].mxu1 }
 0x7bf   :  { %v1015_v19 = vpop.f32.mrb[30].mxu1 }
 0x7c0   :  { %v1020_v20 = vrot.slane %v1018_v17, 4  ;;  %v2570_v21 = vpop.f32.mrb[31].mxu1 }
 0x7c1   :  { %v2702_v21 = vld [vmem:[#allocation12 + $0x44] ss:$16 sps:$4 sm:$0xff]  }
 0x7c2   :  { %1023 = vst.msk [vmem:[#allocation2] sm:$0xf0] %vm1022_vm5, %v1020_v20 }
 0x7d3   :  { %v1128_v24 = vpop.f32.mrb[32].mxu1 }
 0x7d4   :  { %v1134_v25 = vpack.c.bf16 %v1128_v24, %v1128_v24  ;;  %v2581_v26 = vpop.f32.mrb[33].mxu1  ;;  %v2708_v24 = vld [vmem:[#allocation12 + $0x64] ss:$16 sps:$4 sm:$0xff]  }
 0x7d5   :  { %v1131_v27 = vpop.f32.mrb[34].mxu1  ;;  %v2706_v26 = vld [vmem:[#allocation12 + $0x60] ss:$16 sps:$4 sm:$0xff]  }
 0x7d6   :  { %v1136_v28 = vrot.slane %v1134_v25, 4  ;;  %v2582_v29 = vpop.f32.mrb[35].mxu1  ;;  %v2711_v25 = vld [vmem:[#allocation12 + $0x6c] ss:$16 sps:$4 sm:$0xff]   ;;  %v2709_v27 = vld [vmem:[#allocation12 + $0x68] ss:$16 sps:$4 sm:$0xff]  }
 0x7d7   :  { %v2717_v29 = vld [vmem:[#allocation12 + $0x8c] ss:$16 sps:$4 sm:$0xff]  }
 0x7d8   :  { %1137 = vrot.lane.b32.xlu1 %v1136_v28, %s3047_s27  ;;  %v2714_v28 = vld [vmem:[#allocation12 + $0x84] ss:$16 sps:$4 sm:$0xff]  }
 0x7e0   :  { %v1246_v33 = vpop.f32.mrb[36].mxu1 }
 0x7e1   :  { %v1252_v35 = vpack.c.bf16 %v1246_v33, %v1246_v33  ;;  %v2593_v36 = vpop.f32.mrb[37].mxu1  ;;  %v2720_v33 = vld [vmem:[#allocation12 + $0xa4] ss:$16 sps:$4 sm:$0xff]  }
 0x7e2   :  { %v1249_v37 = vpop.f32.mrb[38].mxu1  ;;  %v2721_v36 = vld [vmem:[#allocation12 + $0xa8] ss:$16 sps:$4 sm:$0xff]  }
 0x7e3   :  { %v1254_v39 = vrot.slane %v1252_v35, 4  ;;  %v2594_v40 = vpop.f32.mrb[39].mxu1  ;;  %v2718_v35 = vld [vmem:[#allocation12 + $0xa0] ss:$16 sps:$4 sm:$0xff]   ;;  %v2726_v37 = vld [vmem:[#allocation12 + $0xc4] ss:$16 sps:$4 sm:$0xff]  }
 0x7e4   :  { %v2727_v40 = vld [vmem:[#allocation12 + $0xc8] ss:$16 sps:$4 sm:$0xff]  }
 0x7e5   :  { %1255 = vrot.lane.b32.xlu1 %v1254_v39, %s3040_s2  ;;  %v2724_v39 = vld [vmem:[#allocation12 + $0xc0] ss:$16 sps:$4 sm:$0xff]  }
 0x7e8   :  { %v1364_v41 = vpop.f32.mrb[40].mxu1 }
 0x7e9   :  { %v1370_v42 = vpack.c.bf16 %v1364_v41, %v1364_v41  ;;  %v2605_v43 = vpop.f32.mrb[41].mxu1  ;;  %v2732_v41 = vld [vmem:[#allocation12 + $0xe4] ss:$16 sps:$4 sm:$0xff]  }
 0x7ea   :  { %v1367_v44 = vpop.f32.mrb[42].mxu1  ;;  %v2730_v43 = vld [vmem:[#allocation12 + $0xe0] ss:$16 sps:$4 sm:$0xff]  }
 0x7eb   :  { %v1372_v45 = vrot.slane %v1370_v42, 4  ;;  %v2606_v46 = vpop.f32.mrb[43].mxu1  ;;  %v2735_v42 = vld [vmem:[#allocation12 + $0xec] ss:$16 sps:$4 sm:$0xff]   ;;  %v2733_v44 = vld [vmem:[#allocation12 + $0xe8] ss:$16 sps:$4 sm:$0xff]  }
 0x7ed   :  { %1373 = vrot.lane.b32.xlu1 %v1372_v45, %s3046_s4 }
 0x81a   :  { %v673_v47 = vpop.permute.xlu1 %672 }
 0x81b   :  { %676 = vst.msk [vmem:[#allocation2] sm:$0xf] %vm675_vm6, %v673_v47 }
 0x822   :  { %v790_v48 = vpop.permute.xlu1 %789 }
 0x823   :  { %793 = vst.msk [vmem:[#allocation2] sm:$0xf] %vm792_vm7, %v790_v48 }
 0x82a   :  { %v907_v49 = vpop.permute.xlu0 %906 }
 0x82b   :  { %910 = vst.msk [vmem:[#allocation2] sm:$0xf] %vm909_vm8, %v907_v49 }
 0x84a   :  { %v1138_v4 = vpop.permute.xlu1 %1137 }
 0x84b   :  { %1141 = vst.msk [vmem:[#allocation2] sm:$0xf0] %vm1140_vm9, %v1138_v4 }
 0x857   :  { %v1256_v50 = vpop.permute.xlu1 %1255 }
 0x858   :  { %1259 = vst.msk [vmem:[#allocation2] sm:$0xf0] %vm1258_vm10, %v1256_v50 }
 0x85f   :  { %v1374_v51 = vpop.permute.xlu1 %1373 }
 0x860   :  { %1377 = vst.msk [vmem:[#allocation2] sm:$0xf0] %vm1376_vm11, %v1374_v51 }
 0x867   :  { %v1378_v52 = vld [vmem:[#allocation2] sm:$0xff] }
 0x868   :  { %2624 = vmatmul.mubr.bf16.vlgmr.msra.gmra.mrb[28].mxu0 %v1378_v52  ;;  %v2322_v52 = vld [vmem:[%s3502_s7] ss:$0 sm:$0xff] }
 0x869   :  { %1823 = vmatprep.mubr.bf16.mxu0 %v3044_v30  ;;  %v2688_v30 = vld [vmem:[#allocation12] ss:$16 sps:$4 sm:$0xff]   ;;  %1792 = vmatpush1.bf16.msra.mxu0 %v2691_v6 }
 0x86a   :  { %1749 = vmatpush1.bf16.msra.mxu1 %v2688_v30  ;;  %1793 = vmatprep.subr.bf16.mxu0 %v2699_v9  ;;  %v2737_v30 = vld [vmem:[#allocation14 + $0xc0] sm:$0xff]   ;;  %v2742_v9 = vld [vmem:[#allocation14 + $0x8] sm:$0xff]  }
 0x86b   :  { %1750 = vmatprep.subr.bf16.mxu1 %v2696_v8  ;;  %v2739_v6 = vld [vmem:[#allocation14 + $0x80] sm:$0xff]   ;;  %v2741_v8 = vld [vmem:[#allocation14 + $0xc8] sm:$0xff]  }
 0x86d   :  { %1794 = vmatpush1.bf16.msra.mxu0 %v2697_v11  ;;  %v2744_v11 = vld [vmem:[#allocation14 + $0x50] sm:$0xff]  }
 0x86e   :  { %1751 = vmatpush1.bf16.msra.mxu1 %v2694_v10  ;;  %1795 = vmatprep.subr.bf16.mxu0 %v2705_v22  ;;  %v2743_v10 = vld [vmem:[#allocation14 + $0x88] sm:$0xff]   ;;  %v2754_v22 = vld [vmem:[#allocation14 + $0x20] sm:$0xff]  }
 0x86f   :  { %1752 = vmatprep.subr.bf16.mxu1 %v2702_v21  ;;  %v2753_v21 = vld [vmem:[#allocation14 + $0xe0] sm:$0xff]  }
 0x871   :  { %1796 = vmatpush1.bf16.msra.mxu0 %v2703_v15  ;;  %v2756_v15 = vld [vmem:[#allocation14 + $0x68] sm:$0xff]  }
 0x872   :  { %1753 = vmatpush1.bf16.msra.mxu1 %v2700_v23  ;;  %1797 = vmatprep.subr.bf16.mxu0 %v2711_v25  ;;  %v2755_v23 = vld [vmem:[#allocation14 + $0xa0] sm:$0xff]   ;;  %v2758_v25 = vld [vmem:[#allocation14 + $0x28] sm:$0xff]  }
 0x873   :  { %1754 = vmatprep.subr.bf16.mxu1 %v2708_v24  ;;  %v2757_v24 = vld [vmem:[#allocation14 + $0xe8] sm:$0xff]  }
 0x875   :  { %1798 = vmatpush1.bf16.msra.mxu0 %v2709_v27  ;;  %v2760_v27 = vld [vmem:[#allocation14 + $0x70] sm:$0xff]  }
 0x876   :  { %1755 = vmatpush1.bf16.msra.mxu1 %v2706_v26  ;;  %1799 = vmatprep.subr.bf16.mxu0 %v2717_v29  ;;  %v2759_v26 = vld [vmem:[#allocation14 + $0xa8] sm:$0xff]   ;;  %v2762_v29 = vld [vmem:[#allocation14 + $0x30] sm:$0xff]  }
 0x877   :  { %1756 = vmatprep.subr.bf16.mxu1 %v2714_v28  ;;  %v2761_v28 = vld [vmem:[#allocation14 + $0xf0] sm:$0xff]  }
 0x879   :  { %1800 = vmatpush1.bf16.msra.mxu0 %v2715_v32  ;;  %v2764_v32 = vld [vmem:[#allocation14 + $0x78] sm:$0xff]  }
 0x87a   :  { %1757 = vmatpush1.bf16.msra.mxu1 %v2712_v31  ;;  %1801 = vmatprep.subr.bf16.mxu0 %v2723_v34  ;;  %v2763_v31 = vld [vmem:[#allocation14 + $0xb0] sm:$0xff]   ;;  %v2766_v34 = vld [vmem:[#allocation14 + $0x38] sm:$0xff]  }
 0x87b   :  { %1758 = vmatprep.subr.bf16.mxu1 %v2720_v33  ;;  %v2765_v33 = vld [vmem:[#allocation14 + $0xf8] sm:$0xff]  }
 0x87d   :  { %1802 = vmatpush1.bf16.msra.mxu0 %v2721_v36  ;;  %v1566_v36 = vld [vmem:[%s3505_s10] sm:$0xf] }
 0x87e   :  { %1759 = vmatpush1.bf16.msra.mxu1 %v2718_v35  ;;  %1803 = vmatprep.subr.bf16.mxu0 %v2729_v38  ;;  %v2767_v35 = vld [vmem:[#allocation14 + $0xb8] sm:$0xff]   ;;  %v1571_v38 = vrot.slane %v1566_v36, %v217_v55 }
 0x87f   :  { %1760 = vmatprep.subr.bf16.mxu1 %v2726_v37  ;;  %v1582_v37 = vsub.s32 3, %v3251_v54 }
 0x881   :  { %1804 = vmatpush1.bf16.msra.mxu0 %v2727_v40  ;;  %v1575_v40 = vrot.slane %v1566_v36, %v221_v58 }
 0x882   :  { %1761 = vmatpush1.bf16.msra.mxu1 %v2724_v39  ;;  %1805 = vmatprep.subr.bf16.mxu0 %v2735_v42  ;;  %v1579_v39 = vrot.slane %v1566_v36, %v225_v57 }
 0x883   :  { %1762 = vmatprep.subr.bf16.mxu1 %v2732_v41  ;;  %v1583_v41 = vrot.slane %v1566_v36, %v1582_v37 }
 0x885   :  { %1806 = vmatpush1.bf16.msra.mxu0 %v2733_v44 }
 0x886   :  { %1763 = vmatpush1.bf16.msra.mxu1 %v2730_v43  ;;  %2469 = vmatprep.subr.bf16.mxu0 %v2737_v30 }
 0x93b   :  { %v1484_v56 = vpop.f32.mrb[28].mxu0 }
 0x93c   :  { %v1485_v59 = vadd.f32 %v2313_v53, %v1484_v56  ;;  %v2625_v60 = vpop.f32.mrb[29].mxu0 }
 0x93d   :  { %v1487_v61 = vpop.f32.mrb[30].mxu0  ;;  %v2323_v60 = vld [vmem:[%s3503_s8] ss:$0 sm:$0xff] }
 0x93e   :  { %v3425_v63 = vadd.f32 %v2840_v62, %v1485_v59  ;;  %v1488_v0 = vadd.f32 %v2313_v53, %v1487_v61  ;;  %v2626_v1 = vpop.f32.mrb[31].mxu0 }
 0x940   :  { %v3427_v3 = vadd.f32 %v2841_v2, %v1488_v0  ;;  %1495 = vadd.xlane.f32.xlu0 %v3425_v63  ;;  %v2736_v2 = vld [vmem:[#allocation14 + $0x40] sm:$0xff]  }
 0x941   :  { %2447 = vmatprep.subr.bf16.mxu1 %v2736_v2 }
 0x942   :  { %1497 = vadd.xlane.f32.xlu1 %v3427_v3 }
 0x9cd   :  { %v1496_v12 = vpop.xlane.xlu0 %1495 }
 0x9ce   :  { %v1499_v13 = vmul.f32 0.0078125, %v1496_v12  ;;  %v2745_v12 = vld [vmem:[#allocation14 + $0xd0] sm:$0xff]  }
 0x9cf   :  { %v1498_v14 = vpop.xlane.xlu1 %1497 }
 0x9d0   :  { %v3432_v16 = vsub.f32 %v3425_v63, %v1499_v13  ;;  %v1500_v17 = vmul.f32 0.0078125, %v1498_v14  ;;  %v2746_v13 = vld [vmem:[#allocation14 + $0x10] sm:$0xff]  }
 0x9d1   :  { %v2747_v14 = vld [vmem:[#allocation14 + $0x90] sm:$0xff]  }
 0x9d2   :  { %v3435_v18 = vsub.f32 %v3427_v3, %v1500_v17  ;;  %v1503_v19 = vmul.f32 %v3432_v16, %v3432_v16  ;;  %v2749_v17 = vld [vmem:[#allocation14 + $0xd8] sm:$0xff]  }
 0x9d4   :  { %1505 = vadd.xlane.f32.xlu0 %v1503_v19  ;;  %v1504_v20 = vmul.f32 %v3435_v18, %v3435_v18  ;;  %v2751_v19 = vld [vmem:[#allocation14 + $0x98] sm:$0xff]  }
 0x9d8   :  { %1507 = vadd.xlane.f32.xlu0 %v1504_v20  ;;  %v2752_v20 = vld [vmem:[#allocation14 + $0x60] sm:$0xff]  }
 0xa61   :  { %v1506_v45 = vpop.xlane.xlu0 %1505 }
 0xa62   :  { %v1509_v46 = vmul.f32 0.0078125, %v1506_v45 }
 0xa64   :  { %v1511_v47 = vadd.f32 1e-05, %v1509_v46 }
 0xa65   :  { %v1508_v48 = vpop.xlane.xlu0 %1507 }
 0xa66   :  { %2804 = vrsqrt.f32 %v1511_v47  ;;  %v1510_v49 = vmul.f32 0.0078125, %v1508_v48 }
 0xa68   :  { %v1512_v4 = vadd.f32 1e-05, %v1510_v49 }
 0xa6a   :  { %2806 = vrsqrt.f32 %v1512_v4 }
 0xa70   :  { %v2805_v50 = vpop.eup %2804 }
 0xa71   :  { %v1515_v51 = vmul.f32 %v2805_v50, %v3432_v16  ;;  %v2748_v16 = vld [vmem:[#allocation14 + $0x58] sm:$0xff]  }
 0xa73   :  { %v1523_v59 = vmul.f32 %v2322_v52, %v1515_v51 }
 0xa74   :  { %v2807_v53 = vpop.eup %2806 }
 0xa75   :  { %v1516_v56 = vmul.f32 %v2807_v53, %v3435_v18  ;;  %v1531_v62 = vadd.f32 %v2323_v60, %v1523_v59  ;;  %v2750_v18 = vld [vmem:[#allocation14 + $0x18] sm:$0xff]  }
 0xa77   :  { %v1524_v61 = vmul.f32 %v2322_v52, %v1516_v56 }
 0xa79   :  { %v1532_v0 = vadd.f32 %v2323_v60, %v1524_v61 }
 0xa7b   :  { %v1533_v1 = vpack.c.bf16 %v1532_v0, %v1531_v62 }
 0xa7d   :  { %1781 = vmatmul.mubr.bf16.vlgmr.msra.gmra.mrb[44].mxu1 %v1533_v1  ;;  %1824 = vmatmul.mubr.bf16.vlgmr.msra.gmra.mrb[32].mxu0 %v1533_v1 }
 0xa7e   :  { %2448 = vmatpush3.bf16.msra.mxu1 %v2738_v5  ;;  %2470 = vmatpush3.bf16.msra.mxu0 %v2739_v6 }
 0xa7f   :  { %2449 = vmatprep.subr.bf16.mxu1 %v2740_v7  ;;  %2471 = vmatprep.subr.bf16.mxu0 %v2741_v8 }
 0xa82   :  { %2450 = vmatpush3.bf16.msra.mxu1 %v2742_v9  ;;  %2472 = vmatpush3.bf16.msra.mxu0 %v2743_v10 }
 0xa83   :  { %2451 = vmatprep.subr.bf16.mxu1 %v2744_v11  ;;  %2473 = vmatprep.subr.bf16.mxu0 %v2745_v12 }
 0xa86   :  { %2452 = vmatpush3.bf16.msra.mxu1 %v2746_v13  ;;  %2474 = vmatpush3.bf16.msra.mxu0 %v2747_v14 }
 0xa87   :  { %2453 = vmatprep.subr.bf16.mxu1 %v2748_v16  ;;  %2475 = vmatprep.subr.bf16.mxu0 %v2749_v17 }
 0xa8a   :  { %2454 = vmatpush3.bf16.msra.mxu1 %v2750_v18  ;;  %2476 = vmatpush3.bf16.msra.mxu0 %v2751_v19 }
 0xa8b   :  { %2455 = vmatprep.subr.bf16.mxu1 %v2752_v20  ;;  %2477 = vmatprep.subr.bf16.mxu0 %v2753_v21 }
 0xa8e   :  { %2456 = vmatpush3.bf16.msra.mxu1 %v2754_v22  ;;  %2478 = vmatpush3.bf16.msra.mxu0 %v2755_v23 }
 0xa8f   :  { %2457 = vmatprep.subr.bf16.mxu1 %v2756_v15  ;;  %2479 = vmatprep.subr.bf16.mxu0 %v2757_v24 }
 0xa92   :  { %2458 = vmatpush3.bf16.msra.mxu1 %v2758_v25  ;;  %2480 = vmatpush3.bf16.msra.mxu0 %v2759_v26 }
 0xa93   :  { %2459 = vmatprep.subr.bf16.mxu1 %v2760_v27  ;;  %2481 = vmatprep.subr.bf16.mxu0 %v2761_v28 }
 0xa96   :  { %2460 = vmatpush3.bf16.msra.mxu1 %v2762_v29  ;;  %2482 = vmatpush3.bf16.msra.mxu0 %v2763_v31 }
 0xa97   :  { %2461 = vmatprep.subr.bf16.mxu1 %v2764_v32  ;;  %2483 = vmatprep.subr.bf16.mxu0 %v2765_v33 }
 0xa9a   :  { %2462 = vmatpush3.bf16.msra.mxu1 %v2766_v34  ;;  %2484 = vmatpush3.bf16.msra.mxu0 %v2767_v35 }
 0xb50   :  { %v1782_v42 = vpop.f32.mrb[44].mxu1  ;;  %v1825_v43 = vpop.f32.mrb[32].mxu0 }
 0xb51   :  { %v3459_v44 = vadd.f32 %v1782_v42, %v1571_v38  ;;  %v3461_v45 = vadd.f32 %v1825_v43, %v1579_v39  ;;  %v1784_v46 = vpop.f32.mrb[45].mxu1  ;;  %v1827_v47 = vpop.f32.mrb[33].mxu0 }
 0xb52   :  { %v3463_v48 = vadd.f32 %v1784_v46, %v1575_v40  ;;  %v3465_v49 = vadd.f32 %v1827_v47, %v1583_v41  ;;  %v1786_v55 = vpop.f32.mrb[46].mxu1  ;;  %v1829_v4 = vpop.f32.mrb[34].mxu0 }
 0xb53   :  { %v2356_v57 = vmul.f32 -1.702, %v3459_v44  ;;  %v2358_v54 = vmul.f32 -1.702, %v3461_v45  ;;  %v1787_v58 = vadd.f32 %v1786_v55, %v1571_v38  ;;  %v1830_v50 = vadd.f32 %v1829_v4, %v1579_v39  ;;  %v1788_v51 = vpop.f32.mrb[47].mxu1  ;;  %v1831_v52 = vpop.f32.mrb[35].mxu0 }
 0xb54   :  { %v2357_v53 = vmul.f32 -1.702, %v3463_v48  ;;  %v2359_v56 = vmul.f32 -1.702, %v3465_v49  ;;  %v1789_v59 = vadd.f32 %v1788_v51, %v1575_v40  ;;  %v1832_v60 = vadd.f32 %v1831_v52, %v1583_v41 }
 0xb55   :  { %v1850_v61 = vmul.f32 1.442695, %v2356_v57  ;;  %v1854_v62 = vmul.f32 1.442695, %v2358_v54  ;;  %v2360_v0 = vmul.f32 -1.702, %v1787_v58 }
 0xb56   :  { %v1852_v1 = vmul.f32 1.442695, %v2357_v53  ;;  %v1856_v2 = vmul.f32 1.442695, %v2359_v56  ;;  %v2362_v30 = vmul.f32 -1.702, %v1830_v50 }
 0xb57   :  { %2808 = vpow2.f32 %v1850_v61  ;;  %v1858_v5 = vmul.f32 1.442695, %v2360_v0  ;;  %v2361_v6 = vmul.f32 -1.702, %v1789_v59  ;;  %v2363_v7 = vmul.f32 -1.702, %v1832_v60 }
 0xb58   :  { %2810 = vpow2.f32 %v1854_v62  ;;  %v1862_v8 = vmul.f32 1.442695, %v2362_v30 }
 0xb59   :  { %2812 = vpow2.f32 %v1852_v1  ;;  %v1860_v9 = vmul.f32 1.442695, %v2361_v6  ;;  %v1864_v10 = vmul.f32 1.442695, %v2363_v7 }
 0xb5a   :  { %2814 = vpow2.f32 %v1856_v2 }
 0xb5b   :  { %2816 = vpow2.f32 %v1858_v5 }
 0xb5c   :  { %2818 = vpow2.f32 %v1862_v8 }
 0xb5d   :  { %2820 = vpow2.f32 %v1860_v9 }
 0xb5e   :  { %2822 = vpow2.f32 %v1864_v10 }
 0xb61   :  { %v2809_v11 = vpop.eup %2808 }
 0xb62   :  { %v2811_v12 = vpop.eup %2810  ;;  %v1866_v13 = vadd.f32 1.0, %v2809_v11 }
 0xb63   :  { %v2813_v14 = vpop.eup %2812  ;;  %v1868_v16 = vadd.f32 1.0, %v2811_v12 }
 0xb64   :  { %v2815_v17 = vpop.eup %2814  ;;  %2824 = vrcp.f32 %v1866_v13  ;;  %v1867_v18 = vadd.f32 1.0, %v2813_v14 }
 0xb65   :  { %v2817_v19 = vpop.eup %2816  ;;  %2826 = vrcp.f32 %v1868_v16  ;;  %v1869_v20 = vadd.f32 1.0, %v2815_v17 }
 0xb66   :  { %v2819_v21 = vpop.eup %2818  ;;  %2828 = vrcp.f32 %v1867_v18  ;;  %v1870_v22 = vadd.f32 1.0, %v2817_v19 }
 0xb67   :  { %v2821_v23 = vpop.eup %2820  ;;  %2830 = vrcp.f32 %v1869_v20  ;;  %v1872_v15 = vadd.f32 1.0, %v2819_v21 }
 0xb68   :  { %v2823_v24 = vpop.eup %2822  ;;  %2832 = vrcp.f32 %v1870_v22  ;;  %v1871_v25 = vadd.f32 1.0, %v2821_v23 }
 0xb69   :  { %2834 = vrcp.f32 %v1872_v15  ;;  %v1873_v26 = vadd.f32 1.0, %v2823_v24 }
 0xb6a   :  { %2836 = vrcp.f32 %v1871_v25 }
 0xb6b   :  { %2838 = vrcp.f32 %v1873_v26 }
 0xb6e   :  { %v2825_v27 = vpop.eup %2824 }
 0xb6f   :  { %v2827_v28 = vpop.eup %2826  ;;  %v1890_v34 = vmul.f32 %v2825_v27, %v3459_v44 }
 0xb70   :  { %v2829_v29 = vpop.eup %2828  ;;  %v1892_v37 = vmul.f32 %v2827_v28, %v3461_v45  ;;  %v2364_v45 = vld [vmem:[%s3507_s12] ss:$0 sm:$0xff]  ;;  %s2996_s12 = scalar_lea.vmem %s2257_s16, 256 }
 0xb71   :  { %v2831_v31 = vpop.eup %2830  ;;  %v1891_v40 = vmul.f32 %v2829_v29, %v3463_v48  ;;  %p2997_p0 = scmp.ne.s32.totalorder %s2257_s16, %s2996_s12  ;;  %p3002_p2 = scmp.lt.s32.totalorder %s2996_s12, %s2996_s12 }
 0xb72   :  { %v2833_v32 = vpop.eup %2832  ;;  %v1893_v43 = vmul.f32 %v2831_v31, %v3465_v49 }
 0xb73   :  { %v2835_v33 = vpop.eup %2834  ;;  %v1894_v35 = vmul.f32 %v2833_v32, %v1787_v58  ;;  %p3003_p3 = por %p3002_p2, %p3001_p1 }
 0xb74   :  { %v2837_v36 = vpop.eup %2836  ;;  %v1896_v38 = vmul.f32 %v2835_v33, %v1830_v50 }
 0xb75   :  { %v2839_v39 = vpop.eup %2838  ;;  %v1898_v41 = vpack.c.bf16 %v1894_v35, %v1890_v34  ;;  %v1895_v42 = vmul.f32 %v2837_v36, %v1789_v59  ;;  %p3004_p4 = pnand %p3003_p3, %p2997_p0 }
 0xb76   :  { %v1900_v46 = vpack.c.bf16 %v1896_v38, %v1892_v37  ;;  %v1897_v47 = vmul.f32 %v2839_v39, %v1832_v60 }
 0xb77   :  { %v1899_v55 = vpack.c.bf16 %v1895_v42, %v1891_v40 }
 0xb78   :  { %v1901_v4 = vpack.c.bf16 %v1897_v47, %v1893_v43 }
 0xb79   :  { %2197 = vmatprep.mubr.bf16.mxu1 %v1899_v55 }
 0xb7a   :  { %2238 = vmatprep.mubr.bf16.mxu0 %v1901_v4  ;;  %2198 = vmatmul.mubr.bf16.vlgmr.msra.gmra.mrb[48].mxu1 %v1898_v41 }
 0xb7b   :  { %2239 = vmatmul.mubr.bf16.vlgmr.msra.gmra.mrb[36].mxu0 %v1900_v46 }
 0xc4d   :  { %v2463_v44 = vpop.f32.mrb[48].mxu1 }
 0xc4e   :  { %v2485_v57 = vpop.f32.mrb[36].mxu0  ;;  %v2464_v54 = vpop.f32.mrb[49].mxu1 }
 0xc4f   :  { %v2465_v48 = vadd.f32 %v2464_v54, %v2463_v44  ;;  %v2486_v58 = vpop.f32.mrb[37].mxu0  ;;  %v2466_v50 = vpop.f32.mrb[50].mxu1 }
 0xc50   :  { %v2487_v51 = vadd.f32 %v2486_v58, %v2485_v57  ;;  %v2488_v49 = vpop.f32.mrb[38].mxu0  ;;  %v2467_v52 = vpop.f32.mrb[51].mxu1 }
 0xc51   :  { %v2200_v53 = vadd.f32 %v2465_v48, %v2364_v45  ;;  %v2468_v56 = vadd.f32 %v2467_v52, %v2466_v50  ;;  %v2489_v59 = vpop.f32.mrb[39].mxu0 }
 0xc52   :  { %v2490_v60 = vadd.f32 %v2489_v59, %v2488_v49 }
 0xc53   :  { %v2241_v61 = vadd.f32 %v2487_v51, %v2200_v53  ;;  %v2203_v62 = vadd.f32 %v2468_v56, %v2364_v45 }
 0xc55   :  { %v2247_v0 = vadd.f32 %v2241_v61, %v3425_v63  ;;  %v2244_v1 = vadd.f32 %v2490_v60, %v2203_v62 }
 0xc57   :  { %2249 = vst [vmem:[#allocation15] sm:$0xff] %v2247_v0  ;;  %v2248_v2 = vadd.f32 %v2244_v1, %v3427_v3 }
 0xc59   :  { %2250 = vst [vmem:[#allocation15 + $0x8] sm:$0xff] %v2248_v2 }
 0xc5a   :  { %3007 = shalt.err (!%p3004_p4)
}
 0xc5b   :  { %s3008_s0 = scalar_lea.hbm %s3508_s13, 256 }
 0xc5c   :  { %p3009_p5 = scmp.ne.s32.totalorder %s3508_s13, %s3008_s0  ;;  %p3012_p6 = scmp.lt.u32.totalorder %s3008_s0, %s3508_s13 }
 0xc5e   :  { %p3014_p7 = pnand %p3012_p6, %p3009_p5 }
 0xc60   :  { %3017 = shalt.err (!%p3014_p7)
}
 0xc61   :  { %2262 = dma.vmem_to_hbm [thread:$0]  %s2257_s16, 256, %s3508_s13, [#allocation5], %s3036_s9, %s3036_s9, %s3037_s19  }
 0xc62   :  { %3026 = dma.done.wait [#allocation5], 256  }
 0xc63   :  { %3027 = vsyncadd [#allocation5], 4294967040 }
 0xc64   :  { %2266 = vsyncpa [#allocation4], 1 }
 0xc65   :  { %2267 = vsyncpa [#allocation7], 1 }
 0xc66   :  { %2268 = vsyncpa [#allocation10], 1 }
 0xc67   :  { %2269 = vsyncpa [#allocation13], 1 }
 0xc68   :  { %2270 = vsyncpa [#allocation5], 1 }

// kernel: tpu_custom_call.1
= control target key start
LH: loop header
LB: loop body
LE: loop exit
PB: predicated region body
PF: predicated region fallthrough
CT: control target
= control target key end

     0   :  { %18 = vsyncpa [#allocation4], 0  ;;  %s3495_s0 = inlined_call_operand.hbm [shape: f32[16,128], index: 0, kind: input, shape index: {}]   ;;  %s3496_s1 = inlined_call_operand.hbm [shape: f32[1,128], index: 1, kind: input, shape index: {}]   ;;  %s3497_s2 = inlined_call_operand.hbm [shape: f32[1,128], index: 2, kind: input, shape index: {}]   ;;  %s3498_s3 = inlined_call_operand.hbm [shape: bf16[128,384], index: 3, kind: input, shape index: {}]   ;;  %s3499_s4 = inlined_call_operand.vmem [shape: f32[1,384], index: 4, kind: input, shape index: {}]   ;;  %s3500_s5 = inlined_call_operand.hbm [shape: bf16[128,128], index: 5, kind: input, shape index: {}]   ;;  %s3501_s6 = inlined_call_operand.vmem [shape: f32[1,128], index: 6, kind: input, shape index: {}]   ;;  %s3502_s7 = inlined_call_operand.vmem [shape: f32[1,128], index: 7, kind: input, shape index: {}]   ;;  %s3503_s8 = inlined_call_operand.vmem [shape: f32[1,128], index: 8, kind: input, shape index: {}]   ;;  %s3504_s9 = inlined_call_operand.hbm [shape: bf16[128,512], index: 9, kind: input, shape index: {}]   ;;  %s3505_s10 = inlined_call_operand.vmem [shape: f32[1,512], index: 10, kind: input, shape index: {}]   ;;  %s3506_s11 = inlined_call_operand.hbm [shape: bf16[512,128], index: 11, kind: input, shape index: {}]   ;;  %s3507_s12 = inlined_call_operand.vmem [shape: f32[1,128], index: 12, kind: input, shape index: {}]   ;;  %s3508_s13 = inlined_call_operand.hbm [shape: f32[16,128], index: 13, kind: output, shape index: {}]  }
   0x1   :  { %19 = vsyncpa [#allocation7], 0 }
   0x2   :  { %20 = vsyncpa [#allocation10], 0 }
   0x3   :  { %21 = vsyncpa [#allocation13], 0 }
   0x4   :  { %22 = vsyncpa [#allocation5], 0  ;;  %s3028_s25 = smov [#allocation6]   ;;  %s3029_s27 = smov [#allocation9]  }
   0x5   :  { %s41_s26 = sshll.u32 %s3028_s25, 4  ;;  %s60_s28 = sshll.u32 %s3029_s27, 4  ;;  %s42_s26 = int_to_ptr.vmem [resolvable:$true] %s41_s26  ;;  %s3119_s28 = int_to_ptr.vmem [resolvable:$true] %s60_s28 }
   0x6   :  { %s2842_s14 = scalar_lea.hbm %s3496_s1, 16 }
   0x7   :  { %p2843_p0 = scmp.ne.s32.totalorder %s3496_s1, %s2842_s14  ;;  %p2846_p1 = scmp.lt.u32.totalorder %s2842_s14, %s3496_s1 }
   0x9   :  { %p2848_p2 = pnand %p2846_p1, %p2843_p0 }
   0xb   :  { %2851 = shalt.err (!%p2848_p2)
}
   0xc   :  { %s2852_s19 = scalar_lea.vmem %s42_s26, 16  ;;  %s2856_s20 = scalar_lea.vmem %s42_s26, 32 }
   0xd   :  { %p2853_p3 = scmp.ne.s32.totalorder %s42_s26, %s2852_s19  ;;  %p2857_p4 = scmp.lt.s32.totalorder %s42_s26, %s42_s26 }
   0xe   :  { %p2858_p5 = scmp.lt.s32.totalorder %s2856_s20, %s2852_s19 }
  0x10   :  { %p2859_p6 = por %p2858_p5, %p2857_p4 }
  0x12   :  { %p2860_p7 = pnand %p2859_p6, %p2853_p3 }
  0x14   :  { %2863 = shalt.err (!%p2860_p7)
}
  0x15   :  { %44 = dma.hbm_to_vmem [thread:$0]  %s3496_s1, 16, %s42_s26, [#allocation7]  }
  0x16   :  { %s2864_s25 = scalar_lea.hbm %s3498_s3, 3072 }
  0x17   :  { %p2865_p8 = scmp.ne.s32.totalorder %s3498_s3, %s2864_s25  ;;  %p2868_p9 = scmp.lt.u32.totalorder %s2864_s25, %s3498_s3 }
  0x19   :  { %p2870_p10 = pnand %p2868_p9, %p2865_p8 }
  0x1b   :  { %2873 = shalt.err (!%p2870_p10)
}
  0x1c   :  { %s2874_s15 = scalar_lea.vmem %s3119_s28, 3072  ;;  %p2879_p12 = scmp.lt.s32.totalorder %s3119_s28, %s3119_s28 }
  0x1d   :  { %p2875_p11 = scmp.ne.s32.totalorder %s3119_s28, %s2874_s15  ;;  %p2880_p13 = scmp.lt.s32.totalorder %s2874_s15, %s2874_s15 }
  0x1f   :  { %p2881_p0 = por %p2880_p13, %p2879_p12 }
  0x21   :  { %p2882_p1 = pnand %p2881_p0, %p2875_p11 }
  0x23   :  { %2885 = shalt.err (!%p2882_p1)
}
  0x24   :  { %s3030_s1 = smov 192   ;;  %s3031_s26 = smov 12  }
  0x25   :  { %66 = dma.hbm_to_vmem [thread:$0]  %s3498_s3, 3072, %s3119_s28, [#allocation10], %s3030_s1, %s3030_s1, %s3031_s26  }
  0x26   :  { %s3032_s18 = smov [#allocation12]   ;;  %s2886_s22 = scalar_lea.hbm %s3504_s9, 4096 }
  0x27   :  { %s92_s19 = sshll.u32 %s3032_s18, 4  ;;  %p2887_p2 = scmp.ne.s32.totalorder %s3504_s9, %s2886_s22  ;;  %s93_s19 = int_to_ptr.vmem [resolvable:$true] %s92_s19 }
  0x28   :  { %p2890_p3 = scmp.lt.u32.totalorder %s2886_s22, %s3504_s9 }
  0x2a   :  { %p2892_p4 = pnand %p2890_p3, %p2887_p2 }
  0x2c   :  { %2895 = shalt.err (!%p2892_p4)
}
  0x2d   :  { %s2896_s29 = scalar_lea.vmem %s93_s19, 4096  ;;  %p2901_p6 = scmp.lt.s32.totalorder %s93_s19, %s93_s19 }
  0x2e   :  { %p2897_p5 = scmp.ne.s32.totalorder %s93_s19, %s2896_s29  ;;  %p2902_p7 = scmp.lt.s32.totalorder %s2896_s29, %s2896_s29 }
  0x30   :  { %p2903_p8 = por %p2902_p7, %p2901_p6 }
  0x32   :  { %p2904_p9 = pnand %p2903_p8, %p2897_p5 }
  0x34   :  { %2907 = shalt.err (!%p2904_p9)
}
  0x35   :  { %s3033_s3 = smov 256   ;;  %s3034_s28 = smov 16  }
  0x36   :  { %98 = dma.hbm_to_vmem [thread:$0]  %s3504_s9, 4096, %s93_s19, [#allocation13], %s3033_s3, %s3033_s3, %s3034_s28  }
  0x37   :  { %s3035_s15 = smov [#allocation3]   ;;  %s2908_s17 = scalar_lea.hbm %s3495_s0, 256 }
  0x38   :  { %s28_s1 = sshll.u32 %s3035_s15, 4  ;;  %p2909_p10 = scmp.ne.s32.totalorder %s3495_s0, %s2908_s17  ;;  %s29_s1 = int_to_ptr.vmem [resolvable:$true] %s28_s1 }
  0x39   :  { %p2912_p11 = scmp.lt.u32.totalorder %s2908_s17, %s3495_s0 }
  0x3b   :  { %p2914_p12 = pnand %p2912_p11, %p2909_p10 }
  0x3d   :  { %2917 = shalt.err (!%p2914_p12)
}
  0x3e   :  { %s2918_s23 = scalar_lea.vmem %s29_s1, 256  ;;  %p2923_p0 = scmp.lt.s32.totalorder %s29_s1, %s29_s1 }
  0x3f   :  { %p2919_p13 = scmp.ne.s32.totalorder %s29_s1, %s2918_s23  ;;  %p2924_p1 = scmp.lt.s32.totalorder %s2918_s23, %s2918_s23 }
  0x41   :  { %p2925_p2 = por %p2924_p1, %p2923_p0 }
  0x43   :  { %p2926_p3 = pnand %p2925_p2, %p2919_p13 }
  0x45   :  { %2929 = shalt.err (!%p2926_p3)
}
  0x46   :  { %s3036_s9 = smov 128   ;;  %s3037_s19 = smov 8  }
  0x47   :  { %34 = dma.hbm_to_vmem [thread:$0]  %s3495_s0, 256, %s29_s1, [#allocation4], %s3036_s9, %s3036_s9, %s3037_s19  }
  0x48   :  { %s3038_s27 = smov [#allocation8]   ;;  %s3039_s3 = smov [#allocation11]  }
  0x49   :  { %s51_s29 = sshll.u32 %s3038_s27, 4  ;;  %s74_s28 = sshll.u32 %s3039_s3, 4  ;;  %s52_s29 = int_to_ptr.vmem [resolvable:$true] %s51_s29  ;;  %s3177_s28 = int_to_ptr.vmem [resolvable:$true] %s74_s28 }
  0x4a   :  { %s2930_s15 = scalar_lea.hbm %s3497_s2, 16 }
  0x4b   :  { %p2931_p4 = scmp.ne.s32.totalorder %s3497_s2, %s2930_s15  ;;  %p2934_p5 = scmp.lt.u32.totalorder %s2930_s15, %s3497_s2 }
  0x4d   :  { %p2936_p6 = pnand %p2934_p5, %p2931_p4 }
  0x4f   :  { %2939 = shalt.err (!%p2936_p6)
}
  0x50   :  { %s2940_s0 = scalar_lea.vmem %s52_s29, 16  ;;  %s2944_s1 = scalar_lea.vmem %s52_s29, 32 }
  0x51   :  { %p2941_p7 = scmp.ne.s32.totalorder %s52_s29, %s2940_s0  ;;  %p2945_p8 = scmp.lt.s32.totalorder %s52_s29, %s52_s29 }
  0x52   :  { %p2946_p9 = scmp.lt.s32.totalorder %s2944_s1, %s2940_s0 }
  0x54   :  { %p2947_p10 = por %p2946_p9, %p2945_p8 }
  0x56   :  { %p2948_p11 = pnand %p2947_p10, %p2941_p7 }
  0x58   :  { %2951 = shalt.err (!%p2948_p11)
}
  0x59   :  { %54 = dma.hbm_to_vmem [thread:$0]  %s3497_s2, 16, %s52_s29, [#allocation7]  }
  0x5a   :  { %s2952_s24 = scalar_lea.hbm %s3500_s5, 1024 }
  0x5b   :  { %p2953_p12 = scmp.ne.s32.totalorder %s3500_s5, %s2952_s24  ;;  %p2956_p13 = scmp.lt.u32.totalorder %s2952_s24, %s3500_s5 }
  0x5d   :  { %p2958_p0 = pnand %p2956_p13, %p2953_p12 }
  0x5f   :  { %2961 = shalt.err (!%p2958_p0)
}
  0x60   :  { %s2962_s14 = scalar_lea.vmem %s3177_s28, 1024  ;;  %p2967_p2 = scmp.lt.s32.totalorder %s3177_s28, %s3177_s28 }
  0x61   :  { %p2963_p1 = scmp.ne.s32.totalorder %s3177_s28, %s2962_s14  ;;  %p2968_p3 = scmp.lt.s32.totalorder %s2962_s14, %s2962_s14 }
  0x63   :  { %p2969_p4 = por %p2968_p3, %p2967_p2 }
  0x65   :  { %p2970_p5 = pnand %p2969_p4, %p2963_p1 }
  0x67   :  { %2973 = shalt.err (!%p2970_p5)
}
  0x68   :  { %s3040_s2 = smov 64   ;;  %s3041_s29 = smov 4  }
  0x69   :  { %80 = dma.hbm_to_vmem [thread:$0]  %s3500_s5, 1024, %s3177_s28, [#allocation10], %s3040_s2, %s3040_s2, %s3041_s29  }
  0x6a   :  { %s3042_s16 = smov [#allocation14]   ;;  %s2974_s1 = scalar_lea.hbm %s3506_s11, 4096 }
  0x6b   :  { %s106_s17 = sshll.u32 %s3042_s16, 4  ;;  %p2975_p6 = scmp.ne.s32.totalorder %s3506_s11, %s2974_s1  ;;  %s107_s17 = int_to_ptr.vmem [resolvable:$true] %s106_s17 }
  0x6c   :  { %p2978_p7 = scmp.lt.u32.totalorder %s2974_s1, %s3506_s11 }
  0x6e   :  { %p2980_p8 = pnand %p2978_p7, %p2975_p6 }
  0x70   :  { %2983 = shalt.err (!%p2980_p8)
}
  0x71   :  { %s2984_s24 = scalar_lea.vmem %s107_s17, 4096  ;;  %p2989_p10 = scmp.lt.s32.totalorder %s107_s17, %s107_s17 }
  0x72   :  { %p2985_p9 = scmp.ne.s32.totalorder %s107_s17, %s2984_s24  ;;  %p2990_p11 = scmp.lt.s32.totalorder %s2984_s24, %s2984_s24 }
  0x74   :  { %p2991_p12 = por %p2990_p11, %p2989_p10 }
  0x76   :  { %p2992_p13 = pnand %p2991_p12, %p2985_p9 }
  0x78   :  { %2995 = shalt.err (!%p2992_p13)
}
  0x79   :  { %112 = dma.hbm_to_vmem [thread:$0]  %s3506_s11, 4096, %s107_s17, [#allocation13], %s3040_s2, %s3040_s2, %s3041_s29  }
  0x7a   :  { %3018 = dma.done.wait [#allocation4], 256  }
  0x7b   :  { %3019 = vsyncadd [#allocation4], 4294967040 }
  0x7c   :  { %3020 = dma.done.wait [#allocation7], 32  }
  0x7d   :  { %3021 = vsyncadd [#allocation7], 4294967264 }
  0x7e   :  { %3022 = dma.done.wait [#allocation10], 4096  }
  0x7f   :  { %3023 = vsyncadd [#allocation10], 4294963200 }
  0x80   :  { %3024 = dma.done.wait [#allocation13], 8192  }
  0x81   :  { %3025 = vsyncadd [#allocation13], 4294959104  ;;  %v137_v0 = vld [vmem:[#allocation3] sm:$0xff]  ;;  %v138_v1 = vld [vmem:[#allocation3 + $0x8] sm:$0xff]  ;;  %v3043_v4 = vmov 0.0   ;;  %v3044_v30 = vmov 0   ;;  %v215_v53 = vlaneseq }
  0x82   :  { %141 = vadd.xlane.f32.xlu0 %v137_v0  ;;  %v2648_v2 = vld [vmem:[#allocation9 + $0x4] ss:$12 sps:$4 sm:$0xff]   ;;  %v2650_v3 = vld [vmem:[#allocation9] ss:$12 sps:$4 sm:$0xff]   ;;  %2491 = vmatprep.subr.bf16.mxu1 %v3043_v4  ;;  %v2651_v5 = vld [vmem:[#allocation9 + $0x8] ss:$12 sps:$4 sm:$0xff]  }
  0x83   :  { %v2652_v6 = vld [vmem:[#allocation9 + $0x1c] ss:$12 sps:$4 sm:$0xff]   ;;  %358 = vmatprep.subr.bf16.mxu0 %v2648_v2  ;;  %2492 = vmatpush3.bf16.msra.mxu1 %v2651_v5  ;;  %v2654_v15 = vld [vmem:[#allocation9 + $0x18] ss:$12 sps:$4 sm:$0xff]   ;;  %v2655_v16 = vld [vmem:[#allocation9 + $0x20] ss:$12 sps:$4 sm:$0xff]  }
  0x84   :  { %359 = vmatpush1.bf16.msra.mxu0 %v2650_v3  ;;  %2493 = vmatprep.subr.bf16.mxu1 %v3043_v4  ;;  %v2656_v17 = vld [vmem:[#allocation9 + $0x34] ss:$12 sps:$4 sm:$0xff]   ;;  %v2658_v18 = vld [vmem:[#allocation9 + $0x30] ss:$12 sps:$4 sm:$0xff]   ;;  %v2659_v19 = vld [vmem:[#allocation9 + $0x38] ss:$12 sps:$4 sm:$0xff]  }
  0x85   :  { %360 = vmatprep.subr.bf16.mxu0 %v2652_v6  ;;  %v2660_v20 = vld [vmem:[#allocation9 + $0x4c] ss:$12 sps:$4 sm:$0xff]   ;;  %v2662_v21 = vld [vmem:[#allocation9 + $0x48] ss:$12 sps:$4 sm:$0xff]   ;;  %v2663_v22 = vld [vmem:[#allocation9 + $0x50] ss:$12 sps:$4 sm:$0xff]   ;;  %390 = vmatprep.mubr.bf16.mxu0 %v3044_v30 }
  0x86   :  { %143 = vadd.xlane.f32.xlu0 %v138_v1  ;;  %v2664_v23 = vld [vmem:[#allocation9 + $0x64] ss:$12 sps:$4 sm:$0xff]   ;;  %v2666_v24 = vld [vmem:[#allocation9 + $0x60] ss:$12 sps:$4 sm:$0xff]   ;;  %v2667_v25 = vld [vmem:[#allocation9 + $0x68] ss:$12 sps:$4 sm:$0xff]  }
  0x87   :  { %2494 = vmatpush3.bf16.msra.mxu1 %v2655_v16  ;;  %v2668_v26 = vld [vmem:[#allocation9 + $0x7c] ss:$12 sps:$4 sm:$0xff]   ;;  %v2670_v27 = vld [vmem:[#allocation9 + $0x78] ss:$12 sps:$4 sm:$0xff]   ;;  %v2671_v28 = vld [vmem:[#allocation9 + $0x80] ss:$12 sps:$4 sm:$0xff]  }
  0x88   :  { %361 = vmatpush1.bf16.msra.mxu0 %v2654_v15  ;;  %2495 = vmatprep.subr.bf16.mxu1 %v3043_v4  ;;  %v2672_v29 = vld [vmem:[#allocation9 + $0x94] ss:$12 sps:$4 sm:$0xff]   ;;  %vm3045_vm0 = vmmov 0   ;;  %v2674_v31 = vld [vmem:[#allocation9 + $0x90] ss:$12 sps:$4 sm:$0xff]   ;;  %v3251_v54 = vshrl.u32 %v215_v53, 7 }
  0x89   :  { %362 = vmatprep.subr.bf16.mxu0 %v2656_v17  ;;  %2507 = vmatprep.mubr.msk.bf16.mxu1 %vm3045_vm0, %v3043_v4  ;;  %v2675_v32 = vld [vmem:[#allocation9 + $0x98] ss:$12 sps:$4 sm:$0xff]   ;;  %v2678_v34 = vld [vmem:[#allocation9 + $0xa8] ss:$12 sps:$4 sm:$0xff]   ;;  %v2679_v35 = vld [vmem:[#allocation9 + $0xb0] ss:$12 sps:$4 sm:$0xff]  }
  0x8a   :  { %v2676_v33 = vld [vmem:[#allocation9 + $0xac] ss:$12 sps:$4 sm:$0xff]   ;;  %v2271_v44 = vld [vmem:[#allocation6] ss:$0 sm:$0xff]  ;;  %v2272_v48 = vld [vmem:[#allocation8] ss:$0 sm:$0xff] }
  0x8b   :  { %2496 = vmatpush3.bf16.msra.mxu1 %v2659_v19  ;;  %v217_v55 = vsub.s32 0, %v3251_v54  ;;  %v213_v56 = vld [vmem:[%s3499_s4] sm:$0x7]  ;;  %v225_v57 = vsub.s32 2, %v3251_v54  ;;  %v221_v58 = vsub.s32 1, %v3251_v54  ;;  %vm447_vm1 = vcmask 261120  }
  0x8c   :  { %363 = vmatpush1.bf16.msra.mxu0 %v2658_v18  ;;  %2497 = vmatprep.subr.bf16.mxu1 %v3043_v4  ;;  %vm510_vm2 = vcmask 1043456   ;;  %vm494_vm3 = vcmask 64512   ;;  %s3046_s4 = smov 96   ;;  %s3047_s27 = smov 32   ;;  %vm555_vm4 = vcmask 257024   ;;  %vm1022_vm5 = vcmask 261124  }
  0x8d   :  { %364 = vmatprep.subr.bf16.mxu0 %v2660_v20  ;;  %v218_v59 = vrot.slane %v213_v56, %v217_v55  ;;  %v226_v60 = vrot.slane %v213_v56, %v225_v57  ;;  %v222_v63 = vrot.slane %v213_v56, %v221_v58  ;;  %vm675_vm6 = vcmask 519424   ;;  %s3048_s26 = smov [#allocation15]  }
  0x8e   :  { %vm792_vm7 = vcmask 781824   ;;  %vm909_vm8 = vcmask 1044224   ;;  %vm1140_vm9 = vcmask 523524   ;;  %vm1258_vm10 = vcmask 785924   ;;  %s2256_s16 = sshll.u32 %s3048_s26, 4  ;;  %s2257_s16 = int_to_ptr.vmem [resolvable:$true] %s2256_s16 }
  0x8f   :  { %2498 = vmatpush3.bf16.msra.mxu1 %v2663_v22  ;;  %vm1376_vm11 = vcmask 1048324   ;;  %p3001_p1 = scmp.lt.s32.totalorder %s2257_s16, %s2257_s16 }
  0x90   :  { %365 = vmatpush1.bf16.msra.mxu0 %v2662_v21  ;;  %2499 = vmatprep.subr.bf16.mxu1 %v3043_v4 }
  0x91   :  { %366 = vmatprep.subr.bf16.mxu0 %v2664_v23 }
  0x93   :  { %2500 = vmatpush3.bf16.msra.mxu1 %v2667_v25 }
  0x94   :  { %367 = vmatpush1.bf16.msra.mxu0 %v2666_v24  ;;  %2501 = vmatprep.subr.bf16.mxu1 %v3043_v4 }
  0x95   :  { %368 = vmatprep.subr.bf16.mxu0 %v2668_v26 }
  0x97   :  { %2502 = vmatpush3.bf16.msra.mxu1 %v2671_v28 }
  0x98   :  { %369 = vmatpush1.bf16.msra.mxu0 %v2670_v27  ;;  %2503 = vmatprep.subr.bf16.mxu1 %v3043_v4 }
  0x99   :  { %370 = vmatprep.subr.bf16.mxu0 %v2672_v29 }
  0x9b   :  { %2504 = vmatpush3.bf16.msra.mxu1 %v2675_v32 }
  0x9c   :  { %371 = vmatpush1.bf16.msra.mxu0 %v2674_v31  ;;  %2505 = vmatprep.subr.bf16.mxu1 %v3043_v4 }
  0x9d   :  { %372 = vmatprep.subr.bf16.mxu0 %v2676_v33 }
  0x9f   :  { %2506 = vmatpush3.bf16.msra.mxu1 %v2679_v35 }
  0xa0   :  { %373 = vmatpush1.bf16.msra.mxu0 %v2678_v34  ;;  %2511 = vmatprep.subr.bf16.mxu1 %v3043_v4 }
  0xa1   :  { %2535 = vmatprep.subr.bf16.mxu0 %v3043_v4 }
 0x10f   :  { %v142_v7 = vpop.xlane.xlu0 %141 }
 0x110   :  { %v146_v8 = vmul.f32 0.0078125, %v142_v7 }
 0x112   :  { %v3226_v9 = vsub.f32 %v137_v0, %v146_v8 }
 0x113   :  { %v144_v10 = vpop.xlane.xlu0 %143 }
 0x114   :  { %v147_v11 = vmul.f32 0.0078125, %v144_v10  ;;  %v150_v12 = vmul.f32 %v3226_v9, %v3226_v9 }
 0x116   :  { %v3230_v13 = vsub.f32 %v138_v1, %v147_v11  ;;  %152 = vadd.xlane.f32.xlu1 %v150_v12 }
 0x118   :  { %v151_v14 = vmul.f32 %v3230_v13, %v3230_v13 }
 0x11a   :  { %154 = vadd.xlane.f32.xlu1 %v151_v14 }
 0x1a3   :  { %v153_v36 = vpop.xlane.xlu1 %152 }
 0x1a4   :  { %v156_v37 = vmul.f32 0.0078125, %v153_v36 }
 0x1a6   :  { %v158_v38 = vadd.f32 1e-05, %v156_v37 }
 0x1a7   :  { %v155_v39 = vpop.xlane.xlu1 %154 }
 0x1a8   :  { %2768 = vrsqrt.f32 %v158_v38  ;;  %v157_v40 = vmul.f32 0.0078125, %v155_v39 }
 0x1aa   :  { %v159_v41 = vadd.f32 1e-05, %v157_v40 }
 0x1ac   :  { %2770 = vrsqrt.f32 %v159_v41 }
 0x1b2   :  { %v2769_v42 = vpop.eup %2768 }
 0x1b3   :  { %v162_v43 = vmul.f32 %v2769_v42, %v3226_v9 }
 0x1b5   :  { %v170_v47 = vmul.f32 %v2271_v44, %v162_v43 }
 0x1b6   :  { %v2771_v45 = vpop.eup %2770 }
 0x1b7   :  { %v163_v46 = vmul.f32 %v2771_v45, %v3230_v13  ;;  %v178_v50 = vadd.f32 %v2272_v48, %v170_v47 }
 0x1b9   :  { %v171_v49 = vmul.f32 %v2271_v44, %v163_v46 }
 0x1bb   :  { %v179_v51 = vadd.f32 %v2272_v48, %v171_v49 }
 0x1bd   :  { %v180_v52 = vpack.c.bf16 %v179_v51, %v178_v50 }
 0x1bf   :  { %391 = vmatmul.mubr.bf16.vlgmr.msra.gmra.mrb[0].mxu0 %v180_v52  ;;  %2508 = vmatmul.mubr.bf16.vlgmr.msra.gmra.mrb[0].mxu1 %v180_v52 }
 0x1c0   :  { %2513 = vmatprep.mubr.msk.bf16.mxu1 %vm3045_vm0, %v3043_v4  ;;  %2537 = vmatprep.mubr.msk.bf16.mxu0 %vm3045_vm0, %v3043_v4 }
 0x292   :  { %v392_v61 = vpop.f32.mrb[0].mxu0  ;;  %v435_v62 = vpop.f32.mrb[0].mxu1 }
 0x293   :  { %v393_v0 = vadd.f32 %v392_v61, %v218_v59  ;;  %v394_v1 = vpop.f32.mrb[1].mxu0  ;;  %v2509_v2 = vpop.f32.mrb[1].mxu1  ;;  %v436_v6 = vadd.f32 %v435_v62, %v226_v60 }
 0x294   :  { %v396_v3 = vpop.f32.mrb[2].mxu0  ;;  %v438_v5 = vpop.f32.mrb[2].mxu1  ;;  %v395_v11 = vadd.f32 %v394_v1, %v222_v63 }
 0x295   :  { %v397_v7 = vadd.f32 %v396_v3, %v218_v59  ;;  %v439_v8 = vadd.f32 %v438_v5, %v226_v60  ;;  %v398_v9 = vpop.f32.mrb[3].mxu0  ;;  %v2510_v10 = vpop.f32.mrb[3].mxu1  ;;  %v442_v13 = vmul.f32 0.17677669, %v393_v0 }
 0x296   :  { %v399_v12 = vadd.f32 %v398_v9, %v222_v63 }
 0x297   :  { %v443_v14 = vmul.f32 0.17677669, %v397_v7  ;;  %v3265_v15 = vpack.c.bf16 %v439_v8, %v436_v6 }
 0x298   :  { %v445_v16 = vpack.c.bf16 %v399_v12, %v395_v11 }
 0x299   :  { %v444_v17 = vpack.c.bf16 %v443_v14, %v442_v13  ;;  %v512_v19 = vsel %vm510_vm2, %v3265_v15, 0 }
 0x29a   :  { %v452_v18 = vsel %vm447_vm1, %v445_v16, 0  ;;  %v912_v25 = vrot.slane %v445_v16, 4 }
 0x29b   :  { %2512 = vmatpush3.bf16.xpose.msra.mxu1 %v452_v18  ;;  %v911_v32 = vrot.slane %v444_v17, 4 }
 0x29c   :  { %2517 = vmatprep.subr.bf16.mxu1 %v3043_v4  ;;  %v917_v46 = vsel %vm447_vm1, %v912_v25, 0 }
 0x2a2   :  { %2514 = vmatmul.mubr.msk.bf16.vlgmr.msra.gmra.mrb[4].mxu1 %vm447_vm1, %v444_v17 }
 0x2a3   :  { %2518 = vmatpush3.bf16.msra.mxu1 %v512_v19  ;;  %2519 = vmatprep.mubr.msk.bf16.mxu1 %vm3045_vm0, %v3043_v4 }
 0x2a4   :  { %2523 = vmatprep.subr.bf16.mxu1 %v3043_v4 }
 0x375   :  { %v488_v20 = vpop.f32.mrb[4].mxu1 }
 0x376   :  { %v2515_v21 = vpop.f32.mrb[5].mxu1  ;;  %v495_v22 = vsel %vm494_vm3, %v488_v20, -inf }
 0x377   :  { %496 = vmax.xlane.f32.xlu0 %v495_v22  ;;  %v491_v23 = vpop.f32.mrb[6].mxu1 }
 0x378   :  { %v2516_v24 = vpop.f32.mrb[7].mxu1 }
 0x38d   :  { %561 = vrot.lane.b32.xlu0 %v445_v16, %s3046_s4 }
 0x391   :  { %796 = vrot.lane.b32.xlu0 %v445_v16, %s3047_s27 }
 0x395   :  { %1026 = vrot.lane.b32.xlu0 %v912_v25, %s3046_s4 }
 0x399   :  { %1144 = vrot.lane.b32.xlu0 %v912_v25, %s3040_s2 }
 0x39d   :  { %1262 = vrot.lane.b32.xlu0 %v912_v25, %s3047_s27 }
 0x404   :  { %v497_v26 = vpop.xlane.xlu0 %496 }
 0x405   :  { %v498_v27 = vsub.f32 %v488_v20, %v497_v26 }
 0x407   :  { %v499_v28 = vmul.f32 1.442695, %v498_v27 }
 0x408   :  { %v562_v35 = vpop.permute.xlu0 %561 }
 0x409   :  { %2772 = vpow2.f32 %v499_v28  ;;  %v567_v42 = vsel %vm447_vm1, %v562_v35, 0 }
 0x40c   :  { %v797_v40 = vpop.permute.xlu0 %796 }
 0x40d   :  { %v802_v44 = vsel %vm447_vm1, %v797_v40, 0 }
 0x410   :  { %v1027_v47 = vpop.permute.xlu0 %1026 }
 0x411   :  { %v1032_v48 = vsel %vm447_vm1, %v1027_v47, 0 }
 0x413   :  { %v2773_v29 = vpop.eup %2772 }
 0x414   :  { %v501_v31 = vsel %vm494_vm3, %v2773_v29, 0.0  ;;  %v1145_v49 = vpop.permute.xlu0 %1144 }
 0x415   :  { %502 = vadd.xlane.f32.xlu1 %v501_v31  ;;  %v1150_v51 = vsel %vm447_vm1, %v1145_v49, 0 }
 0x418   :  { %v1263_v52 = vpop.permute.xlu0 %1262 }
 0x419   :  { %v1268_v56 = vsel %vm447_vm1, %v1263_v52, 0 }
 0x426   :  { %558 = vrot.lane.b32.xlu1 %v444_v17, %s3046_s4 }
 0x42a   :  { %679 = vrot.lane.b32.xlu1 %v445_v16, %s3040_s2 }
 0x42e   :  { %677 = vrot.lane.b32.xlu1 %v444_v17, %s3040_s2 }
 0x432   :  { %794 = vrot.lane.b32.xlu1 %v444_v17, %s3047_s27 }
 0x436   :  { %1024 = vrot.lane.b32.xlu1 %v911_v32, %s3046_s4 }
 0x43a   :  { %1142 = vrot.lane.b32.xlu1 %v911_v32, %s3040_s2 }
 0x43e   :  { %1260 = vrot.lane.b32.xlu1 %v911_v32, %s3047_s27 }
 0x4a2   :  { %v503_v33 = vpop.xlane.xlu1 %502 }
 0x4a3   :  { %2774 = vrcp.f32 %v503_v33 }
 0x4a6   :  { %v559_v34 = vpop.permute.xlu1 %558 }
 0x4aa   :  { %v680_v36 = vpop.permute.xlu1 %679 }
 0x4ab   :  { %v685_v37 = vsel %vm447_vm1, %v680_v36, 0 }
 0x4ac   :  { %2536 = vmatpush3.bf16.xpose.msra.mxu0 %v685_v37 }
 0x4ad   :  { %v2775_v38 = vpop.eup %2774  ;;  %2547 = vmatprep.subr.bf16.mxu0 %v3043_v4 }
 0x4ae   :  { %v505_v39 = vmul.f32 %v2775_v38, %v2773_v29  ;;  %v678_v43 = vpop.permute.xlu1 %677 }
 0x4b0   :  { %v506_v41 = vpack.c.bf16 %v505_v39, %v505_v39 }
 0x4b2   :  { %2520 = vmatmul.mubr.msk.bf16.vlgmr.msra.gmra.mrb[8].mxu1 %vm494_vm3, %v506_v41  ;;  %v795_v45 = vpop.permute.xlu1 %794 }
 0x4b3   :  { %2524 = vmatpush3.bf16.xpose.msra.mxu1 %v567_v42  ;;  %2538 = vmatmul.mubr.msk.bf16.vlgmr.msra.gmra.mrb[4].mxu0 %vm447_vm1, %v678_v43 }
 0x4b4   :  { %2548 = vmatpush3.bf16.xpose.msra.mxu0 %v802_v44  ;;  %2525 = vmatprep.mubr.msk.bf16.mxu1 %vm3045_vm0, %v3043_v4 }
 0x4b5   :  { %2549 = vmatprep.mubr.msk.bf16.mxu0 %vm3045_vm0, %v3043_v4  ;;  %2559 = vmatprep.subr.bf16.mxu0 %v3043_v4 }
 0x4b6   :  { %2529 = vmatprep.subr.bf16.mxu1 %v3043_v4  ;;  %v1025_v50 = vpop.permute.xlu1 %1024 }
 0x4ba   :  { %2526 = vmatmul.mubr.msk.bf16.vlgmr.msra.gmra.mrb[12].mxu1 %vm447_vm1, %v559_v34  ;;  %v1143_v53 = vpop.permute.xlu1 %1142 }
 0x4bb   :  { %2550 = vmatmul.mubr.msk.bf16.vlgmr.msra.gmra.mrb[8].mxu0 %vm447_vm1, %v795_v45  ;;  %2531 = vmatprep.mubr.msk.bf16.mxu1 %vm3045_vm0, %v3043_v4 }
 0x4bc   :  { %2560 = vmatpush3.bf16.xpose.msra.mxu0 %v917_v46  ;;  %2561 = vmatprep.mubr.msk.bf16.mxu0 %vm3045_vm0, %v3043_v4 }
 0x4bd   :  { %2571 = vmatprep.subr.bf16.mxu0 %v3043_v4 }
 0x4be   :  { %v1261_v59 = vpop.permute.xlu1 %1260 }
 0x4c3   :  { %2562 = vmatmul.mubr.msk.bf16.vlgmr.msra.gmra.mrb[12].mxu0 %vm447_vm1, %v911_v32 }
 0x4c4   :  { %2572 = vmatpush3.bf16.xpose.msra.mxu0 %v1032_v48  ;;  %2573 = vmatprep.mubr.msk.bf16.mxu0 %vm3045_vm0, %v3043_v4 }
 0x4c5   :  { %2583 = vmatprep.subr.bf16.mxu0 %v3043_v4 }
 0x4cb   :  { %2574 = vmatmul.mubr.msk.bf16.vlgmr.msra.gmra.mrb[16].mxu0 %vm447_vm1, %v1025_v50 }
 0x4cc   :  { %2584 = vmatpush3.bf16.xpose.msra.mxu0 %v1150_v51  ;;  %2585 = vmatprep.mubr.msk.bf16.mxu0 %vm3045_vm0, %v3043_v4 }
 0x4cd   :  { %2595 = vmatprep.subr.bf16.mxu0 %v3043_v4 }
 0x4d3   :  { %2586 = vmatmul.mubr.msk.bf16.vlgmr.msra.gmra.mrb[20].mxu0 %vm447_vm1, %v1143_v53 }
 0x4d4   :  { %2596 = vmatpush3.bf16.xpose.msra.mxu0 %v1268_v56  ;;  %2597 = vmatprep.mubr.msk.bf16.mxu0 %vm3045_vm0, %v3043_v4 }
 0x4d5   :  { %2607 = vmatprep.subr.bf16.mxu0 %v3043_v4 }
 0x4db   :  { %2598 = vmatmul.mubr.msk.bf16.vlgmr.msra.gmra.mrb[24].mxu0 %vm447_vm1, %v1261_v59 }
 0x4dc   :  { %2623 = vmatprep.mubr.msk.bf16.mxu0 %vm3045_vm0, %v3043_v4 }
 0x585   :  { %v548_v60 = vpop.f32.mrb[8].mxu1 }
 0x586   :  { %v554_v61 = vpack.c.bf16 %v548_v60, %v548_v60  ;;  %v2521_v62 = vpop.f32.mrb[9].mxu1  ;;  %v721_v63 = vpop.f32.mrb[4].mxu0 }
 0x587   :  { %v551_v0 = vpop.f32.mrb[10].mxu1  ;;  %v2539_v1 = vpop.f32.mrb[5].mxu0  ;;  %v727_v2 = vsel %vm494_vm3, %v721_v63, -inf }
 0x588   :  { %556 = vst.msk [vmem:[#allocation2] sm:$0xf] %vm555_vm4, %v554_v61  ;;  %728 = vmax.xlane.f32.xlu1 %v727_v2  ;;  %v2522_v3 = vpop.f32.mrb[11].mxu1  ;;  %v724_v5 = vpop.f32.mrb[6].mxu0 }
 0x589   :  { %v2540_v6 = vpop.f32.mrb[7].mxu0 }
 0x58d   :  { %v603_v7 = vpop.f32.mrb[12].mxu1 }
 0x58e   :  { %v2527_v8 = vpop.f32.mrb[13].mxu1  ;;  %v838_v9 = vpop.f32.mrb[8].mxu0  ;;  %v609_v10 = vsel %vm494_vm3, %v603_v7, -inf }
 0x58f   :  { %v2551_v11 = vpop.f32.mrb[9].mxu0  ;;  %610 = vmax.xlane.f32.xlu0 %v609_v10  ;;  %v606_v12 = vpop.f32.mrb[14].mxu1  ;;  %v844_v17 = vsel %vm494_vm3, %v838_v9, -inf }
 0x590   :  { %v2528_v13 = vpop.f32.mrb[15].mxu1  ;;  %v841_v14 = vpop.f32.mrb[10].mxu0 }
 0x591   :  { %v2552_v16 = vpop.f32.mrb[11].mxu0 }
 0x592   :  { %v971_v16 = vrot.slane %v3265_v15, 4 }
 0x593   :  { %845 = vmax.xlane.f32.xlu0 %v844_v17 }
 0x596   :  { %v953_v18 = vpop.f32.mrb[12].mxu0 }
 0x597   :  { %v2563_v19 = vpop.f32.mrb[13].mxu0  ;;  %v959_v20 = vsel %vm494_vm3, %v953_v18, -inf }
 0x598   :  { %v956_v21 = vpop.f32.mrb[14].mxu0  ;;  %960 = vmax.xlane.f32.xlu0 %v959_v20 }
 0x599   :  { %v2564_v22 = vpop.f32.mrb[15].mxu0 }
 0x59e   :  { %v1068_v23 = vpop.f32.mrb[16].mxu0 }
 0x59f   :  { %v2575_v24 = vpop.f32.mrb[17].mxu0  ;;  %v1074_v25 = vsel %vm494_vm3, %v1068_v23, -inf }
 0x5a0   :  { %v1071_v26 = vpop.f32.mrb[18].mxu0  ;;  %1075 = vmax.xlane.f32.xlu0 %v1074_v25 }
 0x5a1   :  { %v2576_v27 = vpop.f32.mrb[19].mxu0 }
 0x5a6   :  { %v1186_v28 = vpop.f32.mrb[20].mxu0 }
 0x5a7   :  { %v2587_v29 = vpop.f32.mrb[21].mxu0  ;;  %v1192_v31 = vsel %vm494_vm3, %v1186_v28, -inf }
 0x5a8   :  { %1193 = vmax.xlane.f32.xlu1 %v1192_v31  ;;  %v1189_v32 = vpop.f32.mrb[22].mxu0 }
 0x5a9   :  { %v2588_v33 = vpop.f32.mrb[23].mxu0 }
 0x5ae   :  { %v1304_v34 = vpop.f32.mrb[24].mxu0 }
 0x5af   :  { %v2599_v35 = vpop.f32.mrb[25].mxu0  ;;  %v1310_v36 = vsel %vm494_vm3, %v1304_v34, -inf }
 0x5b0   :  { %v1307_v37 = vpop.f32.mrb[26].mxu0  ;;  %1311 = vmax.xlane.f32.xlu0 %v1310_v36 }
 0x5b1   :  { %v2600_v38 = vpop.f32.mrb[27].mxu0 }
 0x5b2   :  { %v976_v38 = vsel %vm510_vm2, %v971_v16, 0 }
 0x615   :  { %v729_v39 = vpop.xlane.xlu1 %728 }
 0x616   :  { %v730_v40 = vsub.f32 %v721_v63, %v729_v39 }
 0x618   :  { %v731_v41 = vmul.f32 1.442695, %v730_v40 }
 0x61a   :  { %2776 = vpow2.f32 %v731_v41 }
 0x61c   :  { %v611_v42 = vpop.xlane.xlu0 %610 }
 0x61d   :  { %v612_v43 = vsub.f32 %v603_v7, %v611_v42 }
 0x61f   :  { %v613_v46 = vmul.f32 1.442695, %v612_v43 }
 0x620   :  { %v846_v44 = vpop.xlane.xlu0 %845 }
 0x621   :  { %v847_v45 = vsub.f32 %v838_v9, %v846_v44 }
 0x623   :  { %v848_v47 = vmul.f32 1.442695, %v847_v45 }
 0x624   :  { %v3334_v48 = vpop.eup %2776 }
 0x625   :  { %2778 = vpow2.f32 %v848_v47  ;;  %v961_v49 = vpop.xlane.xlu0 %960  ;;  %v733_v50 = vsel %vm494_vm3, %v3334_v48, 0.0 }
 0x626   :  { %v962_v51 = vsub.f32 %v953_v18, %v961_v49  ;;  %734 = vadd.xlane.f32.xlu0 %v733_v50  ;;  %2780 = vpow2.f32 %v613_v46 }
 0x628   :  { %v963_v52 = vmul.f32 1.442695, %v962_v51 }
 0x62a   :  { %2782 = vpow2.f32 %v963_v52 }
 0x62d   :  { %v1076_v53 = vpop.xlane.xlu0 %1075 }
 0x62e   :  { %v1077_v56 = vsub.f32 %v1068_v23, %v1076_v53 }
 0x62f   :  { %v3338_v59 = vpop.eup %2778 }
 0x630   :  { %v1078_v60 = vmul.f32 1.442695, %v1077_v56  ;;  %v850_v61 = vsel %vm494_vm3, %v3338_v59, 0.0  ;;  %v2781_v62 = vpop.eup %2780 }
 0x631   :  { %851 = vadd.xlane.f32.xlu1 %v850_v61  ;;  %v615_v0 = vsel %vm494_vm3, %v2781_v62, 0.0 }
 0x632   :  { %2784 = vpow2.f32 %v1078_v60 }
 0x634   :  { %v3342_v63 = vpop.eup %2782 }
 0x635   :  { %616 = vadd.xlane.f32.xlu1 %v615_v0  ;;  %v965_v1 = vsel %vm494_vm3, %v3342_v63, 0.0  ;;  %v1194_v5 = vpop.xlane.xlu1 %1193 }
 0x636   :  { %966 = vadd.xlane.f32.xlu0 %v965_v1  ;;  %v1195_v6 = vsub.f32 %v1186_v28, %v1194_v5 }
 0x638   :  { %v1196_v7 = vmul.f32 1.442695, %v1195_v6 }
 0x63a   :  { %2786 = vpow2.f32 %v1196_v7 }
 0x63c   :  { %v3347_v2 = vpop.eup %2784 }
 0x63d   :  { %v1080_v3 = vsel %vm494_vm3, %v3347_v2, 0.0  ;;  %v1312_v8 = vpop.xlane.xlu0 %1311 }
 0x63e   :  { %1081 = vadd.xlane.f32.xlu0 %v1080_v3  ;;  %v1313_v9 = vsub.f32 %v1304_v34, %v1312_v8  ;;  %v2680_v3 = vld [vmem:[#allocation11] sm:$0xff]  }
 0x63f   :  { %2608 = vmatpush3.bf16.msra.mxu0 %v2680_v3 }
 0x640   :  { %v1314_v10 = vmul.f32 1.442695, %v1313_v9  ;;  %2609 = vmatprep.subr.bf16.mxu0 %v3043_v4 }
 0x642   :  { %2788 = vpow2.f32 %v1314_v10 }
 0x644   :  { %v3357_v11 = vpop.eup %2786 }
 0x645   :  { %v1198_v12 = vsel %vm494_vm3, %v3357_v11, 0.0 }
 0x646   :  { %622 = vrot.lane.b32.xlu1 %v3265_v15, %s3046_s4 }
 0x64c   :  { %v3361_v13 = vpop.eup %2788 }
 0x64d   :  { %v1316_v14 = vsel %vm494_vm3, %v3361_v13, 0.0 }
 0x654   :  { %739 = vrot.lane.b32.xlu0 %v3265_v15, %s3040_s2 }
 0x658   :  { %856 = vrot.lane.b32.xlu0 %v3265_v15, %s3047_s27 }
 0x66a   :  { %1199 = vadd.xlane.f32.xlu1 %v1198_v12 }
 0x677   :  { %1317 = vadd.xlane.f32.xlu0 %v1316_v14 }
 0x67b   :  { %1086 = vrot.lane.b32.xlu1 %v971_v16, %s3046_s4 }
 0x67f   :  { %1322 = vrot.lane.b32.xlu1 %v971_v16, %s3047_s27 }
 0x68d   :  { %1204 = vrot.lane.b32.xlu0 %v971_v16, %s3040_s2 }
 0x6b3   :  { %v735_v19 = vpop.xlane.xlu0 %734 }
 0x6be   :  { %v852_v17 = vpop.xlane.xlu1 %851 }
 0x6c2   :  { %v617_v18 = vpop.xlane.xlu1 %616 }
 0x6c3   :  { %2790 = vrcp.f32 %v617_v18  ;;  %v967_v21 = vpop.xlane.xlu0 %966 }
 0x6c4   :  { %2792 = vrcp.f32 %v735_v19 }
 0x6c5   :  { %2794 = vrcp.f32 %v852_v17 }
 0x6c6   :  { %v623_v20 = vpop.permute.xlu1 %622  ;;  %2796 = vrcp.f32 %v967_v21 }
 0x6c7   :  { %v628_v22 = vsel %vm510_vm2, %v623_v20, 0 }
 0x6c8   :  { %2530 = vmatpush3.bf16.msra.mxu1 %v628_v22  ;;  %v2681_v22 = vld [vmem:[#allocation11 + $0x8] sm:$0xff]  }
 0x6c9   :  { %2541 = vmatprep.subr.bf16.mxu1 %v3043_v4  ;;  %2610 = vmatpush3.bf16.msra.mxu0 %v2681_v22  ;;  %v2705_v22 = vld [vmem:[#allocation12 + $0x4c] ss:$16 sps:$4 sm:$0xff]  }
 0x6ca   :  { %2611 = vmatprep.subr.bf16.mxu0 %v3043_v4 }
 0x6cb   :  { %v1082_v23 = vpop.xlane.xlu0 %1081 }
 0x6cc   :  { %2798 = vrcp.f32 %v1082_v23  ;;  %v2682_v23 = vld [vmem:[#allocation11 + $0x10] sm:$0xff]  }
 0x6cd   :  { %v2791_v15 = vpop.eup %2790  ;;  %2612 = vmatpush3.bf16.msra.mxu0 %v2682_v23  ;;  %v2700_v23 = vld [vmem:[#allocation12 + $0x40] ss:$16 sps:$4 sm:$0xff]  }
 0x6ce   :  { %v619_v24 = vmul.f32 %v2791_v15, %v2781_v62  ;;  %v2793_v28 = vpop.eup %2792  ;;  %v2683_v15 = vld [vmem:[#allocation11 + $0x18] sm:$0xff]   ;;  %2613 = vmatprep.subr.bf16.mxu0 %v3043_v4 }
 0x6cf   :  { %v740_v25 = vpop.permute.xlu0 %739  ;;  %v737_v29 = vmul.f32 %v2793_v28, %v3334_v48  ;;  %v2795_v33 = vpop.eup %2794 }
 0x6d0   :  { %v745_v26 = vsel %vm510_vm2, %v740_v25, 0  ;;  %v620_v27 = vpack.c.bf16 %v619_v24, %v619_v24  ;;  %v854_v35 = vmul.f32 %v2795_v33, %v3338_v59  ;;  %v2797_v37 = vpop.eup %2796 }
 0x6d1   :  { %v738_v32 = vpack.c.bf16 %v737_v29, %v737_v29  ;;  %v969_v39 = vmul.f32 %v2797_v37, %v3342_v63  ;;  %2614 = vmatpush3.bf16.msra.mxu0 %v2683_v15  ;;  %v2703_v15 = vld [vmem:[#allocation12 + $0x48] ss:$16 sps:$4 sm:$0xff]  }
 0x6d2   :  { %2532 = vmatmul.mubr.msk.bf16.vlgmr.msra.gmra.mrb[16].mxu1 %vm494_vm3, %v620_v27  ;;  %v855_v36 = vpack.c.bf16 %v854_v35, %v854_v35  ;;  %2615 = vmatprep.subr.bf16.mxu0 %v3043_v4 }
 0x6d3   :  { %2542 = vmatpush3.bf16.msra.mxu1 %v745_v26  ;;  %2543 = vmatprep.mubr.msk.bf16.mxu1 %vm3045_vm0, %v3043_v4  ;;  %v857_v31 = vpop.permute.xlu0 %856  ;;  %v970_v40 = vpack.c.bf16 %v969_v39, %v969_v39 }
 0x6d4   :  { %2553 = vmatprep.subr.bf16.mxu1 %v3043_v4  ;;  %v862_v34 = vsel %vm510_vm2, %v857_v31, 0  ;;  %v2684_v31 = vld [vmem:[#allocation11 + $0x20] sm:$0xff]  }
 0x6d5   :  { %2616 = vmatpush3.bf16.msra.mxu0 %v2684_v31  ;;  %v2712_v31 = vld [vmem:[#allocation12 + $0x80] ss:$16 sps:$4 sm:$0xff]  }
 0x6d6   :  { %v2799_v41 = vpop.eup %2798  ;;  %2617 = vmatprep.subr.bf16.mxu0 %v3043_v4 }
 0x6d7   :  { %v1084_v43 = vmul.f32 %v2799_v41, %v3347_v2 }
 0x6d9   :  { %v1085_v46 = vpack.c.bf16 %v1084_v43, %v1084_v43 }
 0x6da   :  { %2544 = vmatmul.mubr.msk.bf16.vlgmr.msra.gmra.mrb[20].mxu1 %vm494_vm3, %v738_v32  ;;  %v2685_v32 = vld [vmem:[#allocation11 + $0x28] sm:$0xff]  }
 0x6db   :  { %2554 = vmatpush3.bf16.msra.mxu1 %v862_v34  ;;  %2555 = vmatprep.mubr.msk.bf16.mxu1 %vm3045_vm0, %v3043_v4  ;;  %v2686_v34 = vld [vmem:[#allocation11 + $0x30] sm:$0xff]  }
 0x6dc   :  { %2565 = vmatprep.subr.bf16.mxu1 %v3043_v4  ;;  %2618 = vmatpush3.bf16.msra.mxu0 %v2685_v32  ;;  %v2715_v32 = vld [vmem:[#allocation12 + $0x88] ss:$16 sps:$4 sm:$0xff]  }
 0x6dd   :  { %2619 = vmatprep.subr.bf16.mxu0 %v3043_v4 }
 0x6e0   :  { %2620 = vmatpush3.bf16.msra.mxu0 %v2686_v34  ;;  %v2723_v34 = vld [vmem:[#allocation12 + $0xac] ss:$16 sps:$4 sm:$0xff]  }
 0x6e1   :  { %2621 = vmatprep.subr.bf16.mxu0 %v3043_v4 }
 0x6e2   :  { %2556 = vmatmul.mubr.msk.bf16.vlgmr.msra.gmra.mrb[24].mxu1 %vm494_vm3, %v855_v36 }
 0x6e3   :  { %2566 = vmatpush3.bf16.msra.mxu1 %v976_v38  ;;  %2567 = vmatprep.mubr.msk.bf16.mxu1 %vm3045_vm0, %v3043_v4  ;;  %v2687_v38 = vld [vmem:[#allocation11 + $0x38] sm:$0xff]  }
 0x6e4   :  { %2577 = vmatprep.subr.bf16.mxu1 %v3043_v4  ;;  %2622 = vmatpush3.bf16.msra.mxu0 %v2687_v38  ;;  %v2729_v38 = vld [vmem:[#allocation12 + $0xcc] ss:$16 sps:$4 sm:$0xff]  }
 0x6ea   :  { %2568 = vmatmul.mubr.msk.bf16.vlgmr.msra.gmra.mrb[28].mxu1 %vm494_vm3, %v970_v40 }
 0x6eb   :  { %2579 = vmatprep.mubr.msk.bf16.mxu1 %vm3045_vm0, %v3043_v4 }
 0x6f7   :  { %v1200_v42 = vpop.xlane.xlu1 %1199 }
 0x6f8   :  { %2800 = vrcp.f32 %v1200_v42 }
 0x6fb   :  { %v1087_v44 = vpop.permute.xlu1 %1086 }
 0x6fc   :  { %v1092_v45 = vsel %vm510_vm2, %v1087_v44, 0 }
 0x6fd   :  { %2578 = vmatpush3.bf16.msra.mxu1 %v1092_v45 }
 0x6fe   :  { %2589 = vmatprep.subr.bf16.mxu1 %v3043_v4 }
 0x6ff   :  { %v1323_v52 = vpop.permute.xlu1 %1322 }
 0x700   :  { %2580 = vmatmul.mubr.msk.bf16.vlgmr.msra.gmra.mrb[32].mxu1 %vm494_vm3, %v1085_v46  ;;  %v1328_v56 = vsel %vm510_vm2, %v1323_v52, 0 }
 0x701   :  { %2591 = vmatprep.mubr.msk.bf16.mxu1 %vm3045_vm0, %v3043_v4 }
 0x702   :  { %v2801_v47 = vpop.eup %2800 }
 0x703   :  { %v1202_v49 = vmul.f32 %v2801_v47, %v3357_v11 }
 0x704   :  { %v1318_v48 = vpop.xlane.xlu0 %1317 }
 0x705   :  { %2802 = vrcp.f32 %v1318_v48  ;;  %v1203_v53 = vpack.c.bf16 %v1202_v49, %v1202_v49 }
 0x708   :  { %v1205_v50 = vpop.permute.xlu0 %1204 }
 0x709   :  { %v1210_v51 = vsel %vm510_vm2, %v1205_v50, 0 }
 0x70a   :  { %2590 = vmatpush3.bf16.msra.mxu1 %v1210_v51 }
 0x70b   :  { %2601 = vmatprep.subr.bf16.mxu1 %v3043_v4 }
 0x70d   :  { %2592 = vmatmul.mubr.msk.bf16.vlgmr.msra.gmra.mrb[36].mxu1 %vm494_vm3, %v1203_v53  ;;  %v2313_v53 = vld [vmem:[%s3501_s6] ss:$0 sm:$0xff] }
 0x70e   :  { %2602 = vmatpush3.bf16.msra.mxu1 %v1328_v56  ;;  %2603 = vmatprep.mubr.msk.bf16.mxu1 %vm3045_vm0, %v3043_v4 }
 0x70f   :  { %v2803_v59 = vpop.eup %2802 }
 0x710   :  { %v1320_v60 = vmul.f32 %v2803_v59, %v3361_v13 }
 0x712   :  { %v1321_v61 = vpack.c.bf16 %v1320_v60, %v1320_v60 }
 0x715   :  { %2604 = vmatmul.mubr.msk.bf16.vlgmr.msra.gmra.mrb[40].mxu1 %vm494_vm3, %v1321_v61 }
 0x716   :  { %1780 = vmatprep.mubr.bf16.mxu1 %v3044_v30 }
 0x7a5   :  { %v664_v62 = vpop.f32.mrb[16].mxu1 }
 0x7a6   :  { %v670_v63 = vpack.c.bf16 %v664_v62, %v664_v62  ;;  %v2533_v0 = vpop.f32.mrb[17].mxu1  ;;  %v2840_v62 = vld [vmem:[#allocation3] sm:$0xff] }
 0x7a7   :  { %v667_v1 = vpop.f32.mrb[18].mxu1 }
 0x7a8   :  { %672 = vrot.lane.b32.xlu1 %v670_v63, %s3047_s27  ;;  %v2534_v2 = vpop.f32.mrb[19].mxu1 }
 0x7a9   :  { %v2841_v2 = vld [vmem:[#allocation3 + $0x8] sm:$0xff] }
 0x7ad   :  { %v781_v5 = vpop.f32.mrb[20].mxu1 }
 0x7ae   :  { %v787_v6 = vpack.c.bf16 %v781_v5, %v781_v5  ;;  %v2545_v7 = vpop.f32.mrb[21].mxu1  ;;  %v2690_v5 = vld [vmem:[#allocation12 + $0x4] ss:$16 sps:$4 sm:$0xff]  }
 0x7af   :  { %v784_v8 = vpop.f32.mrb[22].mxu1  ;;  %v2693_v7 = vld [vmem:[#allocation12 + $0xc] ss:$16 sps:$4 sm:$0xff]   ;;  %1748 = vmatprep.subr.bf16.mxu1 %v2690_v5  ;;  %v2738_v5 = vld [vmem:[#allocation14] sm:$0xff]  }
 0x7b0   :  { %789 = vrot.lane.b32.xlu1 %v787_v6, %s3040_s2  ;;  %v2546_v9 = vpop.f32.mrb[23].mxu1  ;;  %v2691_v6 = vld [vmem:[#allocation12 + $0x8] ss:$16 sps:$4 sm:$0xff]   ;;  %v2696_v8 = vld [vmem:[#allocation12 + $0x24] ss:$16 sps:$4 sm:$0xff]   ;;  %1791 = vmatprep.subr.bf16.mxu0 %v2693_v7 }
 0x7b1   :  { %v2699_v9 = vld [vmem:[#allocation12 + $0x2c] ss:$16 sps:$4 sm:$0xff]  }
 0x7b2   :  { %v2740_v7 = vld [vmem:[#allocation14 + $0x48] sm:$0xff]  }
 0x7b5   :  { %v898_v10 = vpop.f32.mrb[24].mxu1 }
 0x7b6   :  { %v904_v11 = vpack.c.bf16 %v898_v10, %v898_v10  ;;  %v2557_v12 = vpop.f32.mrb[25].mxu1  ;;  %v2694_v10 = vld [vmem:[#allocation12 + $0x20] ss:$16 sps:$4 sm:$0xff]  }
 0x7b7   :  { %v901_v13 = vpop.f32.mrb[26].mxu1 }
 0x7b8   :  { %906 = vrot.lane.b32.xlu0 %v904_v11, %s3046_s4  ;;  %v2558_v14 = vpop.f32.mrb[27].mxu1  ;;  %v2697_v11 = vld [vmem:[#allocation12 + $0x28] ss:$16 sps:$4 sm:$0xff]  }
 0x7bd   :  { %v1012_v16 = vpop.f32.mrb[28].mxu1 }
 0x7be   :  { %v1018_v17 = vpack.c.bf16 %v1012_v16, %v1012_v16  ;;  %v2569_v18 = vpop.f32.mrb[29].mxu1 }
 0x7bf   :  { %v1015_v19 = vpop.f32.mrb[30].mxu1 }
 0x7c0   :  { %v1020_v20 = vrot.slane %v1018_v17, 4  ;;  %v2570_v21 = vpop.f32.mrb[31].mxu1 }
 0x7c1   :  { %v2702_v21 = vld [vmem:[#allocation12 + $0x44] ss:$16 sps:$4 sm:$0xff]  }
 0x7c2   :  { %1023 = vst.msk [vmem:[#allocation2] sm:$0xf0] %vm1022_vm5, %v1020_v20 }
 0x7d3   :  { %v1128_v24 = vpop.f32.mrb[32].mxu1 }
 0x7d4   :  { %v1134_v25 = vpack.c.bf16 %v1128_v24, %v1128_v24  ;;  %v2581_v26 = vpop.f32.mrb[33].mxu1  ;;  %v2708_v24 = vld [vmem:[#allocation12 + $0x64] ss:$16 sps:$4 sm:$0xff]  }
 0x7d5   :  { %v1131_v27 = vpop.f32.mrb[34].mxu1  ;;  %v2706_v26 = vld [vmem:[#allocation12 + $0x60] ss:$16 sps:$4 sm:$0xff]  }
 0x7d6   :  { %v1136_v28 = vrot.slane %v1134_v25, 4  ;;  %v2582_v29 = vpop.f32.mrb[35].mxu1  ;;  %v2711_v25 = vld [vmem:[#allocation12 + $0x6c] ss:$16 sps:$4 sm:$0xff]   ;;  %v2709_v27 = vld [vmem:[#allocation12 + $0x68] ss:$16 sps:$4 sm:$0xff]  }
 0x7d7   :  { %v2717_v29 = vld [vmem:[#allocation12 + $0x8c] ss:$16 sps:$4 sm:$0xff]  }
 0x7d8   :  { %1137 = vrot.lane.b32.xlu1 %v1136_v28, %s3047_s27  ;;  %v2714_v28 = vld [vmem:[#allocation12 + $0x84] ss:$16 sps:$4 sm:$0xff]  }
 0x7e0   :  { %v1246_v33 = vpop.f32.mrb[36].mxu1 }
 0x7e1   :  { %v1252_v35 = vpack.c.bf16 %v1246_v33, %v1246_v33  ;;  %v2593_v36 = vpop.f32.mrb[37].mxu1  ;;  %v2720_v33 = vld [vmem:[#allocation12 + $0xa4] ss:$16 sps:$4 sm:$0xff]  }
 0x7e2   :  { %v1249_v37 = vpop.f32.mrb[38].mxu1  ;;  %v2721_v36 = vld [vmem:[#allocation12 + $0xa8] ss:$16 sps:$4 sm:$0xff]  }
 0x7e3   :  { %v1254_v39 = vrot.slane %v1252_v35, 4  ;;  %v2594_v40 = vpop.f32.mrb[39].mxu1  ;;  %v2718_v35 = vld [vmem:[#allocation12 + $0xa0] ss:$16 sps:$4 sm:$0xff]   ;;  %v2726_v37 = vld [vmem:[#allocation12 + $0xc4] ss:$16 sps:$4 sm:$0xff]  }
 0x7e4   :  { %v2727_v40 = vld [vmem:[#allocation12 + $0xc8] ss:$16 sps:$4 sm:$0xff]  }
 0x7e5   :  { %1255 = vrot.lane.b32.xlu1 %v1254_v39, %s3040_s2  ;;  %v2724_v39 = vld [vmem:[#allocation12 + $0xc0] ss:$16 sps:$4 sm:$0xff]  }
 0x7e8   :  { %v1364_v41 = vpop.f32.mrb[40].mxu1 }
 0x7e9   :  { %v1370_v42 = vpack.c.bf16 %v1364_v41, %v1364_v41  ;;  %v2605_v43 = vpop.f32.mrb[41].mxu1  ;;  %v2732_v41 = vld [vmem:[#allocation12 + $0xe4] ss:$16 sps:$4 sm:$0xff]  }
 0x7ea   :  { %v1367_v44 = vpop.f32.mrb[42].mxu1  ;;  %v2730_v43 = vld [vmem:[#allocation12 + $0xe0] ss:$16 sps:$4 sm:$0xff]  }
 0x7eb   :  { %v1372_v45 = vrot.slane %v1370_v42, 4  ;;  %v2606_v46 = vpop.f32.mrb[43].mxu1  ;;  %v2735_v42 = vld [vmem:[#allocation12 + $0xec] ss:$16 sps:$4 sm:$0xff]   ;;  %v2733_v44 = vld [vmem:[#allocation12 + $0xe8] ss:$16 sps:$4 sm:$0xff]  }
 0x7ed   :  { %1373 = vrot.lane.b32.xlu1 %v1372_v45, %s3046_s4 }
 0x81a   :  { %v673_v47 = vpop.permute.xlu1 %672 }
 0x81b   :  { %676 = vst.msk [vmem:[#allocation2] sm:$0xf] %vm675_vm6, %v673_v47 }
 0x822   :  { %v790_v48 = vpop.permute.xlu1 %789 }
 0x823   :  { %793 = vst.msk [vmem:[#allocation2] sm:$0xf] %vm792_vm7, %v790_v48 }
 0x82a   :  { %v907_v49 = vpop.permute.xlu0 %906 }
 0x82b   :  { %910 = vst.msk [vmem:[#allocation2] sm:$0xf] %vm909_vm8, %v907_v49 }
 0x84a   :  { %v1138_v4 = vpop.permute.xlu1 %1137 }
 0x84b   :  { %1141 = vst.msk [vmem:[#allocation2] sm:$0xf0] %vm1140_vm9, %v1138_v4 }
 0x857   :  { %v1256_v50 = vpop.permute.xlu1 %1255 }
 0x858   :  { %1259 = vst.msk [vmem:[#allocation2] sm:$0xf0] %vm1258_vm10, %v1256_v50 }
 0x85f   :  { %v1374_v51 = vpop.permute.xlu1 %1373 }
 0x860   :  { %1377 = vst.msk [vmem:[#allocation2] sm:$0xf0] %vm1376_vm11, %v1374_v51 }
 0x867   :  { %v1378_v52 = vld [vmem:[#allocation2] sm:$0xff] }
 0x868   :  { %2624 = vmatmul.mubr.bf16.vlgmr.msra.gmra.mrb[28].mxu0 %v1378_v52  ;;  %v2322_v52 = vld [vmem:[%s3502_s7] ss:$0 sm:$0xff] }
 0x869   :  { %1823 = vmatprep.mubr.bf16.mxu0 %v3044_v30  ;;  %v2688_v30 = vld [vmem:[#allocation12] ss:$16 sps:$4 sm:$0xff]   ;;  %1792 = vmatpush1.bf16.msra.mxu0 %v2691_v6 }
 0x86a   :  { %1749 = vmatpush1.bf16.msra.mxu1 %v2688_v30  ;;  %1793 = vmatprep.subr.bf16.mxu0 %v2699_v9  ;;  %v2737_v30 = vld [vmem:[#allocation14 + $0xc0] sm:$0xff]   ;;  %v2742_v9 = vld [vmem:[#allocation14 + $0x8] sm:$0xff]  }
 0x86b   :  { %1750 = vmatprep.subr.bf16.mxu1 %v2696_v8  ;;  %v2739_v6 = vld [vmem:[#allocation14 + $0x80] sm:$0xff]   ;;  %v2741_v8 = vld [vmem:[#allocation14 + $0xc8] sm:$0xff]  }
 0x86d   :  { %1794 = vmatpush1.bf16.msra.mxu0 %v2697_v11  ;;  %v2744_v11 = vld [vmem:[#allocation14 + $0x50] sm:$0xff]  }
 0x86e   :  { %1751 = vmatpush1.bf16.msra.mxu1 %v2694_v10  ;;  %1795 = vmatprep.subr.bf16.mxu0 %v2705_v22  ;;  %v2743_v10 = vld [vmem:[#allocation14 + $0x88] sm:$0xff]   ;;  %v2754_v22 = vld [vmem:[#allocation14 + $0x20] sm:$0xff]  }
 0x86f   :  { %1752 = vmatprep.subr.bf16.mxu1 %v2702_v21  ;;  %v2753_v21 = vld [vmem:[#allocation14 + $0xe0] sm:$0xff]  }
 0x871   :  { %1796 = vmatpush1.bf16.msra.mxu0 %v2703_v15  ;;  %v2756_v15 = vld [vmem:[#allocation14 + $0x68] sm:$0xff]  }
 0x872   :  { %1753 = vmatpush1.bf16.msra.mxu1 %v2700_v23  ;;  %1797 = vmatprep.subr.bf16.mxu0 %v2711_v25  ;;  %v2755_v23 = vld [vmem:[#allocation14 + $0xa0] sm:$0xff]   ;;  %v2758_v25 = vld [vmem:[#allocation14 + $0x28] sm:$0xff]  }
 0x873   :  { %1754 = vmatprep.subr.bf16.mxu1 %v2708_v24  ;;  %v2757_v24 = vld [vmem:[#allocation14 + $0xe8] sm:$0xff]  }
 0x875   :  { %1798 = vmatpush1.bf16.msra.mxu0 %v2709_v27  ;;  %v2760_v27 = vld [vmem:[#allocation14 + $0x70] sm:$0xff]  }
 0x876   :  { %1755 = vmatpush1.bf16.msra.mxu1 %v2706_v26  ;;  %1799 = vmatprep.subr.bf16.mxu0 %v2717_v29  ;;  %v2759_v26 = vld [vmem:[#allocation14 + $0xa8] sm:$0xff]   ;;  %v2762_v29 = vld [vmem:[#allocation14 + $0x30] sm:$0xff]  }
 0x877   :  { %1756 = vmatprep.subr.bf16.mxu1 %v2714_v28  ;;  %v2761_v28 = vld [vmem:[#allocation14 + $0xf0] sm:$0xff]  }
 0x879   :  { %1800 = vmatpush1.bf16.msra.mxu0 %v2715_v32  ;;  %v2764_v32 = vld [vmem:[#allocation14 + $0x78] sm:$0xff]  }
 0x87a   :  { %1757 = vmatpush1.bf16.msra.mxu1 %v2712_v31  ;;  %1801 = vmatprep.subr.bf16.mxu0 %v2723_v34  ;;  %v2763_v31 = vld [vmem:[#allocation14 + $0xb0] sm:$0xff]   ;;  %v2766_v34 = vld [vmem:[#allocation14 + $0x38] sm:$0xff]  }
 0x87b   :  { %1758 = vmatprep.subr.bf16.mxu1 %v2720_v33  ;;  %v2765_v33 = vld [vmem:[#allocation14 + $0xf8] sm:$0xff]  }
 0x87d   :  { %1802 = vmatpush1.bf16.msra.mxu0 %v2721_v36  ;;  %v1566_v36 = vld [vmem:[%s3505_s10] sm:$0xf] }
 0x87e   :  { %1759 = vmatpush1.bf16.msra.mxu1 %v2718_v35  ;;  %1803 = vmatprep.subr.bf16.mxu0 %v2729_v38  ;;  %v2767_v35 = vld [vmem:[#allocation14 + $0xb8] sm:$0xff]   ;;  %v1571_v38 = vrot.slane %v1566_v36, %v217_v55 }
 0x87f   :  { %1760 = vmatprep.subr.bf16.mxu1 %v2726_v37  ;;  %v1582_v37 = vsub.s32 3, %v3251_v54 }
 0x881   :  { %1804 = vmatpush1.bf16.msra.mxu0 %v2727_v40  ;;  %v1575_v40 = vrot.slane %v1566_v36, %v221_v58 }
 0x882   :  { %1761 = vmatpush1.bf16.msra.mxu1 %v2724_v39  ;;  %1805 = vmatprep.subr.bf16.mxu0 %v2735_v42  ;;  %v1579_v39 = vrot.slane %v1566_v36, %v225_v57 }
 0x883   :  { %1762 = vmatprep.subr.bf16.mxu1 %v2732_v41  ;;  %v1583_v41 = vrot.slane %v1566_v36, %v1582_v37 }
 0x885   :  { %1806 = vmatpush1.bf16.msra.mxu0 %v2733_v44 }
 0x886   :  { %1763 = vmatpush1.bf16.msra.mxu1 %v2730_v43  ;;  %2469 = vmatprep.subr.bf16.mxu0 %v2737_v30 }
 0x93b   :  { %v1484_v56 = vpop.f32.mrb[28].mxu0 }
 0x93c   :  { %v1485_v59 = vadd.f32 %v2313_v53, %v1484_v56  ;;  %v2625_v60 = vpop.f32.mrb[29].mxu0 }
 0x93d   :  { %v1487_v61 = vpop.f32.mrb[30].mxu0  ;;  %v2323_v60 = vld [vmem:[%s3503_s8] ss:$0 sm:$0xff] }
 0x93e   :  { %v3425_v63 = vadd.f32 %v2840_v62, %v1485_v59  ;;  %v1488_v0 = vadd.f32 %v2313_v53, %v1487_v61  ;;  %v2626_v1 = vpop.f32.mrb[31].mxu0 }
 0x940   :  { %v3427_v3 = vadd.f32 %v2841_v2, %v1488_v0  ;;  %1495 = vadd.xlane.f32.xlu0 %v3425_v63  ;;  %v2736_v2 = vld [vmem:[#allocation14 + $0x40] sm:$0xff]  }
 0x941   :  { %2447 = vmatprep.subr.bf16.mxu1 %v2736_v2 }
 0x942   :  { %1497 = vadd.xlane.f32.xlu1 %v3427_v3 }
 0x9cd   :  { %v1496_v12 = vpop.xlane.xlu0 %1495 }
 0x9ce   :  { %v1499_v13 = vmul.f32 0.0078125, %v1496_v12  ;;  %v2745_v12 = vld [vmem:[#allocation14 + $0xd0] sm:$0xff]  }
 0x9cf   :  { %v1498_v14 = vpop.xlane.xlu1 %1497 }
 0x9d0   :  { %v3432_v16 = vsub.f32 %v3425_v63, %v1499_v13  ;;  %v1500_v17 = vmul.f32 0.0078125, %v1498_v14  ;;  %v2746_v13 = vld [vmem:[#allocation14 + $0x10] sm:$0xff]  }
 0x9d1   :  { %v2747_v14 = vld [vmem:[#allocation14 + $0x90] sm:$0xff]  }
 0x9d2   :  { %v3435_v18 = vsub.f32 %v3427_v3, %v1500_v17  ;;  %v1503_v19 = vmul.f32 %v3432_v16, %v3432_v16  ;;  %v2749_v17 = vld [vmem:[#allocation14 + $0xd8] sm:$0xff]  }
 0x9d4   :  { %1505 = vadd.xlane.f32.xlu0 %v1503_v19  ;;  %v1504_v20 = vmul.f32 %v3435_v18, %v3435_v18  ;;  %v2751_v19 = vld [vmem:[#allocation14 + $0x98] sm:$0xff]  }
 0x9d8   :  { %1507 = vadd.xlane.f32.xlu0 %v1504_v20  ;;  %v2752_v20 = vld [vmem:[#allocation14 + $0x60] sm:$0xff]  }
 0xa61   :  { %v1506_v45 = vpop.xlane.xlu0 %1505 }
 0xa62   :  { %v1509_v46 = vmul.f32 0.0078125, %v1506_v45 }
 0xa64   :  { %v1511_v47 = vadd.f32 1e-05, %v1509_v46 }
 0xa65   :  { %v1508_v48 = vpop.xlane.xlu0 %1507 }
 0xa66   :  { %2804 = vrsqrt.f32 %v1511_v47  ;;  %v1510_v49 = vmul.f32 0.0078125, %v1508_v48 }
 0xa68   :  { %v1512_v4 = vadd.f32 1e-05, %v1510_v49 }
 0xa6a   :  { %2806 = vrsqrt.f32 %v1512_v4 }
 0xa70   :  { %v2805_v50 = vpop.eup %2804 }
 0xa71   :  { %v1515_v51 = vmul.f32 %v2805_v50, %v3432_v16  ;;  %v2748_v16 = vld [vmem:[#allocation14 + $0x58] sm:$0xff]  }
 0xa73   :  { %v1523_v59 = vmul.f32 %v2322_v52, %v1515_v51 }
 0xa74   :  { %v2807_v53 = vpop.eup %2806 }
 0xa75   :  { %v1516_v56 = vmul.f32 %v2807_v53, %v3435_v18  ;;  %v1531_v62 = vadd.f32 %v2323_v60, %v1523_v59  ;;  %v2750_v18 = vld [vmem:[#allocation14 + $0x18] sm:$0xff]  }
 0xa77   :  { %v1524_v61 = vmul.f32 %v2322_v52, %v1516_v56 }
 0xa79   :  { %v1532_v0 = vadd.f32 %v2323_v60, %v1524_v61 }
 0xa7b   :  { %v1533_v1 = vpack.c.bf16 %v1532_v0, %v1531_v62 }
 0xa7d   :  { %1781 = vmatmul.mubr.bf16.vlgmr.msra.gmra.mrb[44].mxu1 %v1533_v1  ;;  %1824 = vmatmul.mubr.bf16.vlgmr.msra.gmra.mrb[32].mxu0 %v1533_v1 }
 0xa7e   :  { %2448 = vmatpush3.bf16.msra.mxu1 %v2738_v5  ;;  %2470 = vmatpush3.bf16.msra.mxu0 %v2739_v6 }
 0xa7f   :  { %2449 = vmatprep.subr.bf16.mxu1 %v2740_v7  ;;  %2471 = vmatprep.subr.bf16.mxu0 %v2741_v8 }
 0xa82   :  { %2450 = vmatpush3.bf16.msra.mxu1 %v2742_v9  ;;  %2472 = vmatpush3.bf16.msra.mxu0 %v2743_v10 }
 0xa83   :  { %2451 = vmatprep.subr.bf16.mxu1 %v2744_v11  ;;  %2473 = vmatprep.subr.bf16.mxu0 %v2745_v12 }
 0xa86   :  { %2452 = vmatpush3.bf16.msra.mxu1 %v2746_v13  ;;  %2474 = vmatpush3.bf16.msra.mxu0 %v2747_v14 }
 0xa87   :  { %2453 = vmatprep.subr.bf16.mxu1 %v2748_v16  ;;  %2475 = vmatprep.subr.bf16.mxu0 %v2749_v17 }
 0xa8a   :  { %2454 = vmatpush3.bf16.msra.mxu1 %v2750_v18  ;;  %2476 = vmatpush3.bf16.msra.mxu0 %v2751_v19 }
 0xa8b   :  { %2455 = vmatprep.subr.bf16.mxu1 %v2752_v20  ;;  %2477 = vmatprep.subr.bf16.mxu0 %v2753_v21 }
 0xa8e   :  { %2456 = vmatpush3.bf16.msra.mxu1 %v2754_v22  ;;  %2478 = vmatpush3.bf16.msra.mxu0 %v2755_v23 }
 0xa8f   :  { %2457 = vmatprep.subr.bf16.mxu1 %v2756_v15  ;;  %2479 = vmatprep.subr.bf16.mxu0 %v2757_v24 }
 0xa92   :  { %2458 = vmatpush3.bf16.msra.mxu1 %v2758_v25  ;;  %2480 = vmatpush3.bf16.msra.mxu0 %v2759_v26 }
 0xa93   :  { %2459 = vmatprep.subr.bf16.mxu1 %v2760_v27  ;;  %2481 = vmatprep.subr.bf16.mxu0 %v2761_v28 }
 0xa96   :  { %2460 = vmatpush3.bf16.msra.mxu1 %v2762_v29  ;;  %2482 = vmatpush3.bf16.msra.mxu0 %v2763_v31 }
 0xa97   :  { %2461 = vmatprep.subr.bf16.mxu1 %v2764_v32  ;;  %2483 = vmatprep.subr.bf16.mxu0 %v2765_v33 }
 0xa9a   :  { %2462 = vmatpush3.bf16.msra.mxu1 %v2766_v34  ;;  %2484 = vmatpush3.bf16.msra.mxu0 %v2767_v35 }
 0xb50   :  { %v1782_v42 = vpop.f32.mrb[44].mxu1  ;;  %v1825_v43 = vpop.f32.mrb[32].mxu0 }
 0xb51   :  { %v3459_v44 = vadd.f32 %v1782_v42, %v1571_v38  ;;  %v3461_v45 = vadd.f32 %v1825_v43, %v1579_v39  ;;  %v1784_v46 = vpop.f32.mrb[45].mxu1  ;;  %v1827_v47 = vpop.f32.mrb[33].mxu0 }
 0xb52   :  { %v3463_v48 = vadd.f32 %v1784_v46, %v1575_v40  ;;  %v3465_v49 = vadd.f32 %v1827_v47, %v1583_v41  ;;  %v1786_v55 = vpop.f32.mrb[46].mxu1  ;;  %v1829_v4 = vpop.f32.mrb[34].mxu0 }
 0xb53   :  { %v2356_v57 = vmul.f32 -1.702, %v3459_v44  ;;  %v2358_v54 = vmul.f32 -1.702, %v3461_v45  ;;  %v1787_v58 = vadd.f32 %v1786_v55, %v1571_v38  ;;  %v1830_v50 = vadd.f32 %v1829_v4, %v1579_v39  ;;  %v1788_v51 = vpop.f32.mrb[47].mxu1  ;;  %v1831_v52 = vpop.f32.mrb[35].mxu0 }
 0xb54   :  { %v2357_v53 = vmul.f32 -1.702, %v3463_v48  ;;  %v2359_v56 = vmul.f32 -1.702, %v3465_v49  ;;  %v1789_v59 = vadd.f32 %v1788_v51, %v1575_v40  ;;  %v1832_v60 = vadd.f32 %v1831_v52, %v1583_v41 }
 0xb55   :  { %v1850_v61 = vmul.f32 1.442695, %v2356_v57  ;;  %v1854_v62 = vmul.f32 1.442695, %v2358_v54  ;;  %v2360_v0 = vmul.f32 -1.702, %v1787_v58 }
 0xb56   :  { %v1852_v1 = vmul.f32 1.442695, %v2357_v53  ;;  %v1856_v2 = vmul.f32 1.442695, %v2359_v56  ;;  %v2362_v30 = vmul.f32 -1.702, %v1830_v50 }
 0xb57   :  { %2808 = vpow2.f32 %v1850_v61  ;;  %v1858_v5 = vmul.f32 1.442695, %v2360_v0  ;;  %v2361_v6 = vmul.f32 -1.702, %v1789_v59  ;;  %v2363_v7 = vmul.f32 -1.702, %v1832_v60 }
 0xb58   :  { %2810 = vpow2.f32 %v1854_v62  ;;  %v1862_v8 = vmul.f32 1.442695, %v2362_v30 }
 0xb59   :  { %2812 = vpow2.f32 %v1852_v1  ;;  %v1860_v9 = vmul.f32 1.442695, %v2361_v6  ;;  %v1864_v10 = vmul.f32 1.442695, %v2363_v7 }
 0xb5a   :  { %2814 = vpow2.f32 %v1856_v2 }
 0xb5b   :  { %2816 = vpow2.f32 %v1858_v5 }
 0xb5c   :  { %2818 = vpow2.f32 %v1862_v8 }
 0xb5d   :  { %2820 = vpow2.f32 %v1860_v9 }
 0xb5e   :  { %2822 = vpow2.f32 %v1864_v10 }
 0xb61   :  { %v2809_v11 = vpop.eup %2808 }
 0xb62   :  { %v2811_v12 = vpop.eup %2810  ;;  %v1866_v13 = vadd.f32 1.0, %v2809_v11 }
 0xb63   :  { %v2813_v14 = vpop.eup %2812  ;;  %v1868_v16 = vadd.f32 1.0, %v2811_v12 }
 0xb64   :  { %v2815_v17 = vpop.eup %2814  ;;  %2824 = vrcp.f32 %v1866_v13  ;;  %v1867_v18 = vadd.f32 1.0, %v2813_v14 }
 0xb65   :  { %v2817_v19 = vpop.eup %2816  ;;  %2826 = vrcp.f32 %v1868_v16  ;;  %v1869_v20 = vadd.f32 1.0, %v2815_v17 }
 0xb66   :  { %v2819_v21 = vpop.eup %2818  ;;  %2828 = vrcp.f32 %v1867_v18  ;;  %v1870_v22 = vadd.f32 1.0, %v2817_v19 }
 0xb67   :  { %v2821_v23 = vpop.eup %2820  ;;  %2830 = vrcp.f32 %v1869_v20  ;;  %v1872_v15 = vadd.f32 1.0, %v2819_v21 }
 0xb68   :  { %v2823_v24 = vpop.eup %2822  ;;  %2832 = vrcp.f32 %v1870_v22  ;;  %v1871_v25 = vadd.f32 1.0, %v2821_v23 }
 0xb69   :  { %2834 = vrcp.f32 %v1872_v15  ;;  %v1873_v26 = vadd.f32 1.0, %v2823_v24 }
 0xb6a   :  { %2836 = vrcp.f32 %v1871_v25 }
 0xb6b   :  { %2838 = vrcp.f32 %v1873_v26 }
 0xb6e   :  { %v2825_v27 = vpop.eup %2824 }
 0xb6f   :  { %v2827_v28 = vpop.eup %2826  ;;  %v1890_v34 = vmul.f32 %v2825_v27, %v3459_v44 }
 0xb70   :  { %v2829_v29 = vpop.eup %2828  ;;  %v1892_v37 = vmul.f32 %v2827_v28, %v3461_v45  ;;  %v2364_v45 = vld [vmem:[%s3507_s12] ss:$0 sm:$0xff]  ;;  %s2996_s12 = scalar_lea.vmem %s2257_s16, 256 }
 0xb71   :  { %v2831_v31 = vpop.eup %2830  ;;  %v1891_v40 = vmul.f32 %v2829_v29, %v3463_v48  ;;  %p2997_p0 = scmp.ne.s32.totalorder %s2257_s16, %s2996_s12  ;;  %p3002_p2 = scmp.lt.s32.totalorder %s2996_s12, %s2996_s12 }
 0xb72   :  { %v2833_v32 = vpop.eup %2832  ;;  %v1893_v43 = vmul.f32 %v2831_v31, %v3465_v49 }
 0xb73   :  { %v2835_v33 = vpop.eup %2834  ;;  %v1894_v35 = vmul.f32 %v2833_v32, %v1787_v58  ;;  %p3003_p3 = por %p3002_p2, %p3001_p1 }
 0xb74   :  { %v2837_v36 = vpop.eup %2836  ;;  %v1896_v38 = vmul.f32 %v2835_v33, %v1830_v50 }
 0xb75   :  { %v2839_v39 = vpop.eup %2838  ;;  %v1898_v41 = vpack.c.bf16 %v1894_v35, %v1890_v34  ;;  %v1895_v42 = vmul.f32 %v2837_v36, %v1789_v59  ;;  %p3004_p4 = pnand %p3003_p3, %p2997_p0 }
 0xb76   :  { %v1900_v46 = vpack.c.bf16 %v1896_v38, %v1892_v37  ;;  %v1897_v47 = vmul.f32 %v2839_v39, %v1832_v60 }
 0xb77   :  { %v1899_v55 = vpack.c.bf16 %v1895_v42, %v1891_v40 }
 0xb78   :  { %v1901_v4 = vpack.c.bf16 %v1897_v47, %v1893_v43 }
 0xb79   :  { %2197 = vmatprep.mubr.bf16.mxu1 %v1899_v55 }
 0xb7a   :  { %2238 = vmatprep.mubr.bf16.mxu0 %v1901_v4  ;;  %2198 = vmatmul.mubr.bf16.vlgmr.msra.gmra.mrb[48].mxu1 %v1898_v41 }
 0xb7b   :  { %2239 = vmatmul.mubr.bf16.vlgmr.msra.gmra.mrb[36].mxu0 %v1900_v46 }
 0xc4d   :  { %v2463_v44 = vpop.f32.mrb[48].mxu1 }
 0xc4e   :  { %v2485_v57 = vpop.f32.mrb[36].mxu0  ;;  %v2464_v54 = vpop.f32.mrb[49].mxu1 }
 0xc4f   :  { %v2465_v48 = vadd.f32 %v2464_v54, %v2463_v44  ;;  %v2486_v58 = vpop.f32.mrb[37].mxu0  ;;  %v2466_v50 = vpop.f32.mrb[50].mxu1 }
 0xc50   :  { %v2487_v51 = vadd.f32 %v2486_v58, %v2485_v57  ;;  %v2488_v49 = vpop.f32.mrb[38].mxu0  ;;  %v2467_v52 = vpop.f32.mrb[51].mxu1 }
 0xc51   :  { %v2200_v53 = vadd.f32 %v2465_v48, %v2364_v45  ;;  %v2468_v56 = vadd.f32 %v2467_v52, %v2466_v50  ;;  %v2489_v59 = vpop.f32.mrb[39].mxu0 }
 0xc52   :  { %v2490_v60 = vadd.f32 %v2489_v59, %v2488_v49 }
 0xc53   :  { %v2241_v61 = vadd.f32 %v2487_v51, %v2200_v53  ;;  %v2203_v62 = vadd.f32 %v2468_v56, %v2364_v45 }
 0xc55   :  { %v2247_v0 = vadd.f32 %v2241_v61, %v3425_v63  ;;  %v2244_v1 = vadd.f32 %v2490_v60, %v2203_v62 }
 0xc57   :  { %2249 = vst [vmem:[#allocation15] sm:$0xff] %v2247_v0  ;;  %v2248_v2 = vadd.f32 %v2244_v1, %v3427_v3 }
 0xc59   :  { %2250 = vst [vmem:[#allocation15 + $0x8] sm:$0xff] %v2248_v2 }
 0xc5a   :  { %3007 = shalt.err (!%p3004_p4)
}
 0xc5b   :  { %s3008_s0 = scalar_lea.hbm %s3508_s13, 256 }
 0xc5c   :  { %p3009_p5 = scmp.ne.s32.totalorder %s3508_s13, %s3008_s0  ;;  %p3012_p6 = scmp.lt.u32.totalorder %s3008_s0, %s3508_s13 }
 0xc5e   :  { %p3014_p7 = pnand %p3012_p6, %p3009_p5 }
 0xc60   :  { %3017 = shalt.err (!%p3014_p7)
}
 0xc61   :  { %2262 = dma.vmem_to_hbm [thread:$0]  %s2257_s16, 256, %s3508_s13, [#allocation5], %s3036_s9, %s3036_s9, %s3037_s19  }
 0xc62   :  { %3026 = dma.done.wait [#allocation5], 256  }
 0xc63   :  { %3027 = vsyncadd [#allocation5], 4294967040 }
 0xc64   :  { %2266 = vsyncpa [#allocation4], 1 }
 0xc65   :  { %2267 = vsyncpa [#allocation7], 1 }
 0xc66   :  { %2268 = vsyncpa [#allocation10], 1 }
 0xc67   :  { %2269 = vsyncpa [#allocation13], 1 }
 0xc68   :  { %2270 = vsyncpa [#allocation5], 1 }

</bundles_post_ra>
